<compile_context>
chip_gen: v5e
topology: v5e:2x2
jax: 0.10.0
libtpu: 0.0.40
codegen_flags: <defaults>
</compile_context>

<pallas_src>
import functools

import numpy as np
import jax
import jax.numpy as jnp
from jax.experimental import pallas as pl
from jax.experimental.pallas import tpu as pltpu


_TILE_M = 512                       # row tile (multiple of 8); whole-array block if m <= tile
_VMEM_LIMIT = 32 * 1024 * 1024      # explicit scoped-VMEM budget (safe on v5e/v6e/v7x)


def _round_up(x, m):
    return ((x + m - 1) // m) * m


def _row_tile(m):
    # If everything fits in one block, use the exact row count (always a legal block
    # shape); otherwise use a multiple-of-8 tile and let Pallas mask the partial block.
    return m if m <= _TILE_M else _TILE_M


def _compiler_params():
    return pltpu.CompilerParams(
        dimension_semantics=("parallel",),
        vmem_limit_bytes=_VMEM_LIMIT,
    )


# ----------------------------- Pallas kernels -----------------------------

def _fused_mlp_kernel(*refs, n_layers, activate_last):
    """refs = (x_ref, w0, b0, w1, b1, ..., o_ref). Whole MLP on one row tile; the
    hidden activations live in VMEM/vregs only (never written back to HBM)."""
    o_ref = refs[-1]
    h = refs[0][...]                                   # f32 row tile
    for i in range(n_layers):
        w = refs[1 + 2 * i][...]
        b = refs[2 + 2 * i][...]
        # bf16 MXU operands, f32 accumulation; bias + LeakyReLU stay f32 on the VPU.
        h = jnp.dot(h.astype(jnp.bfloat16), w.astype(jnp.bfloat16),
                    preferred_element_type=jnp.float32) + b
        if i < n_layers - 1 or activate_last:          # nn.LeakyReLU(0.01)
            h = jnp.where(h > 0.0, h, 0.01 * h)
    o_ref[...] = h.astype(o_ref.dtype)


def pallas_mlp(layers, x, *, activate_last=False):
    """y = L_{n-1}(LeakyReLU(... LeakyReLU(L_0(x)))) fused into one Pallas kernel,
    row-tiled over a parallel grid with all weights resident in VMEM."""
    m, k_in = x.shape
    n_layers = len(layers)
    n_out = layers[-1]["w"].shape[1]
    tm = _row_tile(m)
    grid = (pl.cdiv(m, tm),)

    in_specs = [pl.BlockSpec((tm, k_in), lambda i: (i, 0))]
    args = [x.astype(jnp.float32)]
    flops = 0
    bytes_accessed = (m * k_in + m * n_out) * 4
    for lyr in layers:
        kk, nn = lyr["w"].shape
        in_specs.append(pl.BlockSpec((kk, nn), lambda i: (0, 0)))   # weights: resident
        in_specs.append(pl.BlockSpec((1, nn), lambda i: (0, 0)))    # bias: resident
        args.append(lyr["w"].astype(jnp.float32))
        args.append(lyr["b"].reshape(1, nn).astype(jnp.float32))
        flops += 2 * m * kk * nn
        bytes_accessed += (kk * nn + nn) * 4

    return pl.pallas_call(
        functools.partial(_fused_mlp_kernel, n_layers=n_layers, activate_last=activate_last),
        out_shape=jax.ShapeDtypeStruct((m, n_out), jnp.float32),
        grid=grid,
        in_specs=in_specs,
        out_specs=pl.BlockSpec((tm, n_out), lambda i: (i, 0)),
        compiler_params=_compiler_params(),
        cost_estimate=pl.CostEstimate(flops=int(flops), transcendentals=0,
                                      bytes_accessed=int(bytes_accessed)),
    )(*args)


def pallas_linear(x, w, b=None, activate=False):
    """Single linear layer (optionally LeakyReLU-fused) via the fused-MLP kernel."""
    if b is None:
        b = jnp.zeros((w.shape[1],), jnp.float32)
    return pallas_mlp([{"w": w, "b": b}], x, activate_last=activate)


def _envelope_head_kernel(x_ref, w_ref, b_ref, pref_ref, sel_ref, o_ref, *, kt):
    """out = 100 * sum_o ((x @ W + b)[:, k*num_obj + o] * pref[:, o]) for each k.
    One lane-dense MXU matmul; the per-objective reduction is a second tiny matmul
    against a constant 0/1 selection matrix (avoids 3-D reshapes / strided slices)."""
    x = x_ref[...].astype(jnp.bfloat16)
    w = w_ref[...].astype(jnp.bfloat16)
    q = jnp.dot(x, w, preferred_element_type=jnp.float32) + b_ref[...]     # (tm, kt*num_obj)
    pref = pref_ref[...]                                                   # (tm, num_obj), f32
    # column c of q corresponds to objective o = c % num_obj
    pref_full = jnp.concatenate([pref] * kt, axis=-1)                      # (tm, kt*num_obj)
    weighted = q * pref_full
    out = jnp.dot(weighted, sel_ref[...], preferred_element_type=jnp.float32)
    o_ref[...] = (out * 100.0).astype(o_ref.dtype)


def pallas_envelope_head(x, w, b, pref, num_obj):
    """Fused head: 100 * sum_o ((x @ W + b).reshape(M, K, num_obj)[:, :, o] * pref[:, o])."""
    m, f = x.shape
    ncols = w.shape[1]
    kt = ncols // num_obj
    # constant selection matrix S[c, k] = 1 iff c // num_obj == k (built once, XLA const-folds)
    sel = np.zeros((ncols, kt), np.float32)
    sel[np.arange(ncols), np.arange(ncols) // num_obj] = 1.0

    tm = _row_tile(m)
    grid = (pl.cdiv(m, tm),)
    flops = 2 * m * f * ncols + 2 * m * ncols * kt
    bytes_accessed = (m * f + f * ncols + ncols + m * num_obj + ncols * kt + m * kt) * 4

    return pl.pallas_call(
        functools.partial(_envelope_head_kernel, kt=kt),
        out_shape=jax.ShapeDtypeStruct((m, kt), jnp.float32),
        grid=grid,
        in_specs=[
            pl.BlockSpec((tm, f), lambda i: (i, 0)),          # activations: row-tiled
            pl.BlockSpec((f, ncols), lambda i: (0, 0)),       # weight: resident
            pl.BlockSpec((1, ncols), lambda i: (0, 0)),       # bias: resident
            pl.BlockSpec((tm, num_obj), lambda i: (i, 0)),    # per-row preference weights
            pl.BlockSpec((ncols, kt), lambda i: (0, 0)),      # selection matrix: resident
        ],
        out_specs=pl.BlockSpec((tm, kt), lambda i: (i, 0)),
        compiler_params=_compiler_params(),
        cost_estimate=pl.CostEstimate(flops=int(flops), transcendentals=0,
                                      bytes_accessed=int(bytes_accessed)),
    )(x.astype(jnp.float32), w.astype(jnp.float32),
      b.reshape(1, ncols).astype(jnp.float32), pref.astype(jnp.float32),
      jnp.asarray(sel))


# ----------------------------- parameter init -----------------------------

def init_linear(key, n_in, n_out, bias=True):
    kw, kb = jax.random.split(key)
    s = 1.0 / (n_in ** 0.5)
    w = jax.random.normal(kw, (n_in, n_out), jnp.float32) * s
    b = jax.random.normal(kb, (n_out,), jnp.float32) * s if bias else jnp.zeros((n_out,), jnp.float32)
    return {"w": w, "b": b}


def init_mlp(key, n_in, n_hid, n_out, n_layer):
    dims = [n_in] + [n_hid] * n_layer + [n_out]
    keys = jax.random.split(key, len(dims) - 1)
    return [init_linear(k, dims[i], dims[i + 1]) for i, k in enumerate(keys)]


def init_graph_transformer(key, x_dim, e_dim, g_dim, num_emb, num_layers, num_heads):
    keys = jax.random.split(key, 3 + num_layers)
    params = {
        "x2h": init_mlp(keys[0], x_dim, num_emb, num_emb, 2),
        "e2h": init_mlp(keys[1], e_dim, num_emb, num_emb, 2),
        "c2h": init_mlp(keys[2], g_dim, num_emb, num_emb, 2),
        "layers": [],
    }
    E, H = num_emb, num_heads
    for li in range(num_layers):
        lk = jax.random.split(keys[3 + li], 5)
        params["layers"].append({
            "gen_mlp": init_linear(lk[0], E, E),                   # GENConv(num_layers=1, norm=None)
            # Q | K | V | skip fused along the output axis (one lane-dense matmul per layer)
            "lin_qkvs": init_linear(lk[1], 2 * E, 4 * H * E),
            "lin_e": init_linear(lk[2], E, H * E, bias=False),     # TransformerConv lin_edge (no bias)
            "lin_o": init_linear(lk[3], H * E, E),
            "ff": init_mlp(lk[4], E, 4 * E, E, 1),
        })
    return params


# ----------------------------- GraphTransformer forward -----------------------------

def graph_layernorm(x, batch, num_graphs, eps=1e-5):
    """PyG gnn.LayerNorm(affine=False, mode='graph'): per-graph mean/var over nodes+features."""
    feat = x.shape[1]
    denom = jax.ops.segment_sum(jnp.ones((x.shape[0],), jnp.float32), batch, num_graphs) * feat
    mean = jax.ops.segment_sum(x, batch, num_graphs).sum(axis=1) / denom
    xc = x - mean[batch][:, None]
    var = jax.ops.segment_sum(xc * xc, batch, num_graphs).sum(axis=1) / denom
    return xc / jnp.sqrt(var + eps)[batch][:, None]


def graph_transformer_forward(params, g, cond, num_emb, num_heads):
    x = pallas_mlp(params["x2h"], g["x"])
    e = pallas_mlp(params["e2h"], g["edge_attr"])
    c = pallas_mlp(params["c2h"], cond)
    N, B = g["x"].shape[0], cond.shape[0]
    N_aug = N + B

    # augment with a per-graph conditioning node connected (both ways) to every node
    u = jnp.arange(N, dtype=jnp.int32)
    v = g["batch"] + N
    src = jnp.concatenate([g["edge_index"][0], u, v])
    dst = jnp.concatenate([g["edge_index"][1], v, u])
    e_p = jnp.zeros((2 * N, num_emb), jnp.float32).at[:, 0].set(1.0)
    aug_e = jnp.concatenate([e, e_p], axis=0)

    # add_self_loops(..., fill_value='mean'): per-node mean of incoming edge attrs
    cnt = jax.ops.segment_sum(jnp.ones((dst.shape[0],), jnp.float32), dst, N_aug)
    loop_attr = jax.ops.segment_sum(aug_e, dst, N_aug) / jnp.maximum(cnt, 1.0)[:, None]
    loops = jnp.arange(N_aug, dtype=jnp.int32)
    src = jnp.concatenate([src, loops])
    dst = jnp.concatenate([dst, loops])
    aug_e = jnp.concatenate([aug_e, loop_attr], axis=0)
    aug_batch = jnp.concatenate([g["batch"], jnp.arange(B, dtype=jnp.int32)])

    o = jnp.concatenate([x, c], axis=0)
    H, E = num_heads, num_emb
    HE = H * E
    scale = 1.0 / jnp.sqrt(jnp.float32(E))

    for lp in params["layers"]:
        # --- GENConv(num_emb, num_emb, aggr='add', norm=None, num_layers=1) ---
        # TODO(synk): edge-list scatter-add stays in XLA segment ops (ragged, data-dependent).
        msg = jax.nn.relu(o[src] + aug_e) + 1e-7
        agg = jax.ops.segment_sum(msg, dst, N_aug) + o
        agg = pallas_linear(agg, lp["gen_mlp"]["w"], lp["gen_mlp"]["b"])

        # --- TransformerConv(2E -> E, heads=H, edge_dim=E) on cat([o, agg], 1) ---
        h_in = jnp.concatenate([o, agg], axis=1)
        qkvs = pallas_linear(h_in, lp["lin_qkvs"]["w"], lp["lin_qkvs"]["b"])   # (N_aug, 4*H*E)
        q = qkvs[:, 0 * HE:1 * HE].reshape(N_aug, H, E)
        k = qkvs[:, 1 * HE:2 * HE].reshape(N_aug, H, E)
        vv = qkvs[:, 2 * HE:3 * HE].reshape(N_aug, H, E)
        skip = qkvs[:, 3 * HE:4 * HE]
        eh = pallas_linear(aug_e, lp["lin_e"]["w"], None).reshape(-1, H, E)

        k_j = k[src] + eh
        alpha = (q[dst] * k_j).sum(-1) * scale                         # (n_edges, H)
        amax = jax.ops.segment_max(alpha, dst, N_aug)
        amax = jnp.where(jnp.isfinite(amax), amax, 0.0)                # guard empty segments
        alpha = jnp.exp(alpha - amax[dst])
        alpha = alpha / (jax.ops.segment_sum(alpha, dst, N_aug)[dst] + 1e-16)
        attn = jax.ops.segment_sum((vv[src] + eh) * alpha[..., None], dst, N_aug)
        attn = attn.reshape(N_aug, HE) + skip

        l_h = pallas_linear(attn, lp["lin_o"]["w"], lp["lin_o"]["b"])
        o = graph_layernorm(o + l_h, aug_batch, B)
        ff = pallas_mlp(lp["ff"], o)                                   # fused E -> 4E -> E FFN
        o = graph_layernorm(o + ff, aug_batch, B)

    o_nodes, o_cond = o[:N], o[N:]
    n_per_g = jax.ops.segment_sum(jnp.ones((N,), jnp.float32), g["batch"], B)
    pooled = jax.ops.segment_sum(o_nodes, g["batch"], B) / n_per_g[:, None]
    graph_emb = jnp.concatenate([pooled, o_cond, c], axis=1)           # (B, 3*num_emb)
    node_emb = jnp.concatenate([o_nodes, c[g["batch"]]], axis=1)       # (N, 2*num_emb)
    return node_emb, graph_emb


# ----------------------------- GraphTransformerEnvelopeQL forward -----------------------------

def envelope_ql_forward(params, g, cond, num_emb, num_heads, num_objectives, output_Qs=False):
    node_emb, graph_emb = graph_transformer_forward(params["transf"], g, cond, num_emb, num_heads)

    ne_row, ne_col = g["non_edge_index"]
    e_row, e_col = g["edge_index"][:, ::2]
    non_edge_emb = node_emb[ne_row] + node_emb[ne_col]
    edge_emb = node_emb[e_row] + node_emb[e_col]

    r_pred = pallas_linear(graph_emb, params["emb2reward"][0]["w"], params["emb2reward"][0]["b"])

    # fuse the two node-input heads along the output axis (single node_emb read, wider lanes)
    w_node = jnp.concatenate([params["emb2add_node"][0]["w"],
                              params["emb2set_node_attr"][0]["w"]], axis=1)
    b_node = jnp.concatenate([params["emb2add_node"][0]["b"],
                              params["emb2set_node_attr"][0]["b"]], axis=0)
    n_add_node = params["emb2add_node"][0]["w"].shape[1]

    if output_Qs:
        node_q = pallas_linear(node_emb, w_node, b_node)
        raw = [
            pallas_linear(graph_emb, params["emb2stop"][0]["w"], params["emb2stop"][0]["b"]),
            node_q[:, :n_add_node],
            node_q[:, n_add_node:],
            pallas_linear(non_edge_emb, params["emb2add_edge"][0]["w"], params["emb2add_edge"][0]["b"]),
            pallas_linear(edge_emb, params["emb2set_edge_attr"][0]["w"], params["emb2set_edge_attr"][0]["b"]),
        ]
        return raw, r_pred

    w = cond[:, -num_objectives:]
    kt_add_node = n_add_node // num_objectives

    # per-row graph index of each logits tensor (GraphActionCategorical.batch)
    node_wq = pallas_envelope_head(node_emb, w_node, b_node, w[g["batch"]], num_objectives)
    logits = [
        pallas_envelope_head(graph_emb, params["emb2stop"][0]["w"], params["emb2stop"][0]["b"],
                             w, num_objectives),
        node_wq[:, :kt_add_node],
        node_wq[:, kt_add_node:],
        pallas_envelope_head(non_edge_emb, params["emb2add_edge"][0]["w"], params["emb2add_edge"][0]["b"],
                             w[g["batch"][ne_row]], num_objectives),
        pallas_envelope_head(edge_emb, params["emb2set_edge_attr"][0]["w"], params["emb2set_edge_attr"][0]["b"],
                             w[g["batch"][e_row]], num_objectives),
    ]
    return logits, r_pred


# ----------------------------- example run -----------------------------

if __name__ == "__main__":
    key = jax.random.PRNGKey(0)
    num_emb, num_layers, num_heads, num_objectives = 64, 2, 2, 2
    env_ctx = dict(num_node_dim=5, num_edge_dim=4, num_cond_dim=6,
                   num_new_node_values=3, num_node_attr_logits=4, num_edge_attr_logits=5)

    ks = jax.random.split(key, 12)
    params = {
        "transf": init_graph_transformer(ks[0], env_ctx["num_node_dim"], env_ctx["num_edge_dim"],
                                         env_ctx["num_cond_dim"], num_emb, num_layers, num_heads),
        "emb2add_edge": init_mlp(ks[1], num_emb * 2, num_emb, num_objectives, 0),
        "emb2add_node": init_mlp(ks[2], num_emb * 2, num_emb, env_ctx["num_new_node_values"] * num_objectives, 0),
        "emb2set_node_attr": init_mlp(ks[3], num_emb * 2, num_emb, env_ctx["num_node_attr_logits"] * num_objectives, 0),
        "emb2set_edge_attr": init_mlp(ks[4], num_emb * 2, num_emb, env_ctx["num_edge_attr_logits"] * num_objectives, 0),
        "emb2stop": init_mlp(ks[5], num_emb * 3, num_emb, num_objectives, 0),
        "emb2reward": init_mlp(ks[6], num_emb * 3, num_emb, 1, 0),
        "logZ": init_mlp(ks[7], env_ctx["num_cond_dim"], num_emb * 2, 1, 2),  # not used in forward()
    }

    # batch of 2 small graphs (3 + 4 nodes); undirected edges stored in both directions (PyG style)
    x = jax.random.normal(ks[8], (7, env_ctx["num_node_dim"]), jnp.float32)
    edge_index = jnp.array([[0, 1, 1, 2, 3, 4, 4, 5, 5, 6],
                            [1, 0, 2, 1, 4, 3, 5, 4, 6, 5]], dtype=jnp.int32)
    edge_attr = jnp.repeat(jax.random.normal(ks[9], (5, env_ctx["num_edge_dim"]), jnp.float32), 2, axis=0)
    non_edge_index = jnp.array([[0, 3, 3, 4], [2, 5, 6, 6]], dtype=jnp.int32)
    batch = jnp.array([0, 0, 0, 1, 1, 1, 1], dtype=jnp.int32)
    g = {"x": x, "edge_index": edge_index, "edge_attr": edge_attr,
         "non_edge_index": non_edge_index, "batch": batch}
    cond = jax.random.normal(ks[10], (2, env_ctx["num_cond_dim"]), jnp.float32)

    fwd = jax.jit(functools.partial(envelope_ql_forward, num_emb=num_emb, num_heads=num_heads,
                                    num_objectives=num_objectives, output_Qs=False))
    logits, r_pred = fwd(params, g, cond)
    jax.block_until_ready(logits)
    jax.block_until_ready(r_pred)

    # [stop, add_node, set_node_attr, add_edge, set_edge_attr]; last dim = raw_dim / num_objectives
    assert [tuple(t.shape) for t in logits] == [(2, 1), (7, 3), (7, 4), (4, 1), (5, 5)]
    assert tuple(r_pred.shape) == (2, 1)
    assert all(bool(jnp.all(jnp.isfinite(t))) for t in logits) and bool(jnp.all(jnp.isfinite(r_pred)))

    # also exercise the output_Qs=True (raw Q-values) path
    fwd_q = jax.jit(functools.partial(envelope_ql_forward, num_emb=num_emb, num_heads=num_heads,
                                      num_objectives=num_objectives, output_Qs=True))
    raw, r_pred_q = fwd_q(params, g, cond)
    jax.block_until_ready(raw)
    jax.block_until_ready(r_pred_q)
    assert all(bool(jnp.all(jnp.isfinite(t))) for t in raw) and bool(jnp.all(jnp.isfinite(r_pred_q)))

    print("KERNEL_OK")
</pallas_src>

<mosaic_0001>
module attributes {stable_mosaic.version = 11 : i64} {
  func.func @_fused_mlp_kernel(%arg0: i32, %arg1: memref<10x4xf32, #tpu.memory_space<vmem>>, %arg2: memref<4x64xf32, #tpu.memory_space<vmem>>, %arg3: memref<1x64xf32, #tpu.memory_space<vmem>>, %arg4: memref<64x64xf32, #tpu.memory_space<vmem>>, %arg5: memref<1x64xf32, #tpu.memory_space<vmem>>, %arg6: memref<64x64xf32, #tpu.memory_space<vmem>>, %arg7: memref<1x64xf32, #tpu.memory_space<vmem>>, %arg8: memref<10x64xf32, #tpu.memory_space<vmem>>) attributes {dimension_semantics = [#tpu.dimension_semantics<parallel>], iteration_bounds = array<i64: 1>, scalar_prefetch = 0 : i64, scratch_operands = 0 : i64, tpu.core_type = #tpu.core_type<tc>, window_params = [{transform_indices = @transform_0, window_bounds = array<i64: 10, 4>}, {pipeline_mode = #tpu.pipeline_mode<synchronous>, transform_indices = @transform_1, window_bounds = array<i64: 4, 64>}, {pipeline_mode = #tpu.pipeline_mode<synchronous>, transform_indices = @transform_2, window_bounds = array<i64: 1, 64>}, {pipeline_mode = #tpu.pipeline_mode<synchronous>, transform_indices = @transform_3, window_bounds = array<i64: 64, 64>}, {pipeline_mode = #tpu.pipeline_mode<synchronous>, transform_indices = @transform_4, window_bounds = array<i64: 1, 64>}, {pipeline_mode = #tpu.pipeline_mode<synchronous>, transform_indices = @transform_5, window_bounds = array<i64: 64, 64>}, {pipeline_mode = #tpu.pipeline_mode<synchronous>, transform_indices = @transform_6, window_bounds = array<i64: 1, 64>}, {transform_indices = @transform_7, window_bounds = array<i64: 10, 64>}]} {
    %c0 = arith.constant 0 : index
    %c0_0 = arith.constant 0 : index
    %0 = vector.load %arg1[%c0, %c0_0] : memref<10x4xf32, #tpu.memory_space<vmem>>, vector<10x4xf32>
    %c0_1 = arith.constant 0 : index
    %c0_2 = arith.constant 0 : index
    %1 = vector.load %arg2[%c0_1, %c0_2] : memref<4x64xf32, #tpu.memory_space<vmem>>, vector<4x64xf32>
    %c0_3 = arith.constant 0 : index
    %c0_4 = arith.constant 0 : index
    %2 = vector.load %arg3[%c0_3, %c0_4] : memref<1x64xf32, #tpu.memory_space<vmem>>, vector<1x64xf32>
    %3 = arith.truncf %0 : vector<10x4xf32> to vector<10x4xbf16>
    %4 = arith.truncf %1 : vector<4x64xf32> to vector<4x64xbf16>
    %cst = arith.constant dense<0.000000e+00> : vector<10x64xf32>
    %5 = tpu.matmul %3, %4, %cst {dimension_numbers = #tpu.dot_dimension_numbers<[1], [0], [0], [1], [0, 0, 1, 1], [], []>} : vector<10x4xbf16>, vector<4x64xbf16>, vector<10x64xf32> -> vector<10x64xf32>
    %6 = vector.broadcast %2 : vector<1x64xf32> to vector<10x64xf32>
    %7 = arith.addf %5, %6 : vector<10x64xf32>
    %cst_5 = arith.constant 0.000000e+00 : f32
    %8 = vector.broadcast %cst_5 : f32 to vector<10x64xf32>
    %9 = arith.cmpf ogt, %7, %8 : vector<10x64xf32>
    %cst_6 = arith.constant 0.00999999977 : f32
    %10 = vector.broadcast %cst_6 : f32 to vector<10x64xf32>
    %11 = arith.mulf %10, %7 : vector<10x64xf32>
    %12 = arith.select %9, %7, %11 : vector<10x64xi1>, vector<10x64xf32>
    %c0_7 = arith.constant 0 : index
    %c0_8 = arith.constant 0 : index
    %13 = vector.load %arg4[%c0_7, %c0_8] : memref<64x64xf32, #tpu.memory_space<vmem>>, vector<64x64xf32>
    %c0_9 = arith.constant 0 : index
    %c0_10 = arith.constant 0 : index
    %14 = vector.load %arg5[%c0_9, %c0_10] : memref<1x64xf32, #tpu.memory_space<vmem>>, vector<1x64xf32>
    %15 = arith.truncf %12 : vector<10x64xf32> to vector<10x64xbf16>
    %16 = arith.truncf %13 : vector<64x64xf32> to vector<64x64xbf16>
    %cst_11 = arith.constant dense<0.000000e+00> : vector<10x64xf32>
    %17 = tpu.matmul %15, %16, %cst_11 {dimension_numbers = #tpu.dot_dimension_numbers<[1], [0], [0], [1], [0, 0, 1, 1], [], []>} : vector<10x64xbf16>, vector<64x64xbf16>, vector<10x64xf32> -> vector<10x64xf32>
    %18 = vector.broadcast %14 : vector<1x64xf32> to vector<10x64xf32>
    %19 = arith.addf %17, %18 : vector<10x64xf32>
    %cst_12 = arith.constant 0.000000e+00 : f32
    %20 = vector.broadcast %cst_12 : f32 to vector<10x64xf32>
    %21 = arith.cmpf ogt, %19, %20 : vector<10x64xf32>
    %cst_13 = arith.constant 0.00999999977 : f32
    %22 = vector.broadcast %cst_13 : f32 to vector<10x64xf32>
    %23 = arith.mulf %22, %19 : vector<10x64xf32>
    %24 = arith.select %21, %19, %23 : vector<10x64xi1>, vector<10x64xf32>
    %c0_14 = arith.constant 0 : index
    %c0_15 = arith.constant 0 : index
    %25 = vector.load %arg6[%c0_14, %c0_15] : memref<64x64xf32, #tpu.memory_space<vmem>>, vector<64x64xf32>
    %c0_16 = arith.constant 0 : index
    %c0_17 = arith.constant 0 : index
    %26 = vector.load %arg7[%c0_16, %c0_17] : memref<1x64xf32, #tpu.memory_space<vmem>>, vector<1x64xf32>
    %27 = arith.truncf %24 : vector<10x64xf32> to vector<10x64xbf16>
    %28 = arith.truncf %25 : vector<64x64xf32> to vector<64x64xbf16>
    %cst_18 = arith.constant dense<0.000000e+00> : vector<10x64xf32>
    %29 = tpu.matmul %27, %28, %cst_18 {dimension_numbers = #tpu.dot_dimension_numbers<[1], [0], [0], [1], [0, 0, 1, 1], [], []>} : vector<10x64xbf16>, vector<64x64xbf16>, vector<10x64xf32> -> vector<10x64xf32>
    %30 = vector.broadcast %26 : vector<1x64xf32> to vector<10x64xf32>
    %31 = arith.addf %29, %30 : vector<10x64xf32>
    %c0_19 = arith.constant 0 : index
    %c0_20 = arith.constant 0 : index
    %32 = vector.load %arg8[%c0_19, %c0_20] : memref<10x64xf32, #tpu.memory_space<vmem>>, vector<10x64xf32>
    tpu.vector_store %arg8[%c0_19, %c0_20], %31 {strides = array<i32>} : memref<10x64xf32, #tpu.memory_space<vmem>>, vector<10x64xf32>,
    return
  }
  func.func @transform_0(%arg0: i32) -> (i32, i32) {
    %c0_i32 = arith.constant 0 : i32
    %c0_i32_0 = arith.constant 0 : i32
    return %arg0, %c0_i32 : i32, i32
  }
  func.func @transform_1(%arg0: i32) -> (i32, i32) {
    %c0_i32 = arith.constant 0 : i32
    %c0_i32_0 = arith.constant 0 : i32
    %c0_i32_1 = arith.constant 0 : i32
    return %c0_i32, %c0_i32_0 : i32, i32
  }
  func.func @transform_2(%arg0: i32) -> (i32, i32) {
    %c0_i32 = arith.constant 0 : i32
    %c0_i32_0 = arith.constant 0 : i32
    %c0_i32_1 = arith.constant 0 : i32
    return %c0_i32, %c0_i32_0 : i32, i32
  }
  func.func @transform_3(%arg0: i32) -> (i32, i32) {
    %c0_i32 = arith.constant 0 : i32
    %c0_i32_0 = arith.constant 0 : i32
    %c0_i32_1 = arith.constant 0 : i32
    return %c0_i32, %c0_i32_0 : i32, i32
  }
  func.func @transform_4(%arg0: i32) -> (i32, i32) {
    %c0_i32 = arith.constant 0 : i32
    %c0_i32_0 = arith.constant 0 : i32
    %c0_i32_1 = arith.constant 0 : i32
    return %c0_i32, %c0_i32_0 : i32, i32
  }
  func.func @transform_5(%arg0: i32) -> (i32, i32) {
    %c0_i32 = arith.constant 0 : i32
    %c0_i32_0 = arith.constant 0 : i32
    %c0_i32_1 = arith.constant 0 : i32
    return %c0_i32, %c0_i32_0 : i32, i32
  }
  func.func @transform_6(%arg0: i32) -> (i32, i32) {
    %c0_i32 = arith.constant 0 : i32
    %c0_i32_0 = arith.constant 0 : i32
    %c0_i32_1 = arith.constant 0 : i32
    return %c0_i32, %c0_i32_0 : i32, i32
  }
  func.func @transform_7(%arg0: i32) -> (i32, i32) {
    %c0_i32 = arith.constant 0 : i32
    %c0_i32_0 = arith.constant 0 : i32
    return %arg0, %c0_i32 : i32, i32
  }
}

module attributes {stable_mosaic.version = 11 : i64} {
  func.func @_fused_mlp_kernel(%arg0: i32, %arg1: memref<7x5xf32, #tpu.memory_space<vmem>>, %arg2: memref<5x64xf32, #tpu.memory_space<vmem>>, %arg3: memref<1x64xf32, #tpu.memory_space<vmem>>, %arg4: memref<64x64xf32, #tpu.memory_space<vmem>>, %arg5: memref<1x64xf32, #tpu.memory_space<vmem>>, %arg6: memref<64x64xf32, #tpu.memory_space<vmem>>, %arg7: memref<1x64xf32, #tpu.memory_space<vmem>>, %arg8: memref<7x64xf32, #tpu.memory_space<vmem>>) attributes {dimension_semantics = [#tpu.dimension_semantics<parallel>], iteration_bounds = array<i64: 1>, scalar_prefetch = 0 : i64, scratch_operands = 0 : i64, tpu.core_type = #tpu.core_type<tc>, window_params = [{transform_indices = @transform_0, window_bounds = array<i64: 7, 5>}, {pipeline_mode = #tpu.pipeline_mode<synchronous>, transform_indices = @transform_1, window_bounds = array<i64: 5, 64>}, {pipeline_mode = #tpu.pipeline_mode<synchronous>, transform_indices = @transform_2, window_bounds = array<i64: 1, 64>}, {pipeline_mode = #tpu.pipeline_mode<synchronous>, transform_indices = @transform_3, window_bounds = array<i64: 64, 64>}, {pipeline_mode = #tpu.pipeline_mode<synchronous>, transform_indices = @transform_4, window_bounds = array<i64: 1, 64>}, {pipeline_mode = #tpu.pipeline_mode<synchronous>, transform_indices = @transform_5, window_bounds = array<i64: 64, 64>}, {pipeline_mode = #tpu.pipeline_mode<synchronous>, transform_indices = @transform_6, window_bounds = array<i64: 1, 64>}, {transform_indices = @transform_7, window_bounds = array<i64: 7, 64>}]} {
    %c0 = arith.constant 0 : index
    %c0_0 = arith.constant 0 : index
    %0 = vector.load %arg1[%c0, %c0_0] : memref<7x5xf32, #tpu.memory_space<vmem>>, vector<7x5xf32>
    %c0_1 = arith.constant 0 : index
    %c0_2 = arith.constant 0 : index
    %1 = vector.load %arg2[%c0_1, %c0_2] : memref<5x64xf32, #tpu.memory_space<vmem>>, vector<5x64xf32>
    %c0_3 = arith.constant 0 : index
    %c0_4 = arith.constant 0 : index
    %2 = vector.load %arg3[%c0_3, %c0_4] : memref<1x64xf32, #tpu.memory_space<vmem>>, vector<1x64xf32>
    %3 = arith.truncf %0 : vector<7x5xf32> to vector<7x5xbf16>
    %4 = arith.truncf %1 : vector<5x64xf32> to vector<5x64xbf16>
    %cst = arith.constant dense<0.000000e+00> : vector<7x64xf32>
    %5 = tpu.matmul %3, %4, %cst {dimension_numbers = #tpu.dot_dimension_numbers<[1], [0], [0], [1], [0, 0, 1, 1], [], []>} : vector<7x5xbf16>, vector<5x64xbf16>, vector<7x64xf32> -> vector<7x64xf32>
    %6 = vector.broadcast %2 : vector<1x64xf32> to vector<7x64xf32>
    %7 = arith.addf %5, %6 : vector<7x64xf32>
    %cst_5 = arith.constant 0.000000e+00 : f32
    %8 = vector.broadcast %cst_5 : f32 to vector<7x64xf32>
    %9 = arith.cmpf ogt, %7, %8 : vector<7x64xf32>
    %cst_6 = arith.constant 0.00999999977 : f32
    %10 = vector.broadcast %cst_6 : f32 to vector<7x64xf32>
    %11 = arith.mulf %10, %7 : vector<7x64xf32>
    %12 = arith.select %9, %7, %11 : vector<7x64xi1>, vector<7x64xf32>
    %c0_7 = arith.constant 0 : index
    %c0_8 = arith.constant 0 : index
    %13 = vector.load %arg4[%c0_7, %c0_8] : memref<64x64xf32, #tpu.memory_space<vmem>>, vector<64x64xf32>
    %c0_9 = arith.constant 0 : index
    %c0_10 = arith.constant 0 : index
    %14 = vector.load %arg5[%c0_9, %c0_10] : memref<1x64xf32, #tpu.memory_space<vmem>>, vector<1x64xf32>
    %15 = arith.truncf %12 : vector<7x64xf32> to vector<7x64xbf16>
    %16 = arith.truncf %13 : vector<64x64xf32> to vector<64x64xbf16>
    %cst_11 = arith.constant dense<0.000000e+00> : vector<7x64xf32>
    %17 = tpu.matmul %15, %16, %cst_11 {dimension_numbers = #tpu.dot_dimension_numbers<[1], [0], [0], [1], [0, 0, 1, 1], [], []>} : vector<7x64xbf16>, vector<64x64xbf16>, vector<7x64xf32> -> vector<7x64xf32>
    %18 = vector.broadcast %14 : vector<1x64xf32> to vector<7x64xf32>
    %19 = arith.addf %17, %18 : vector<7x64xf32>
    %cst_12 = arith.constant 0.000000e+00 : f32
    %20 = vector.broadcast %cst_12 : f32 to vector<7x64xf32>
    %21 = arith.cmpf ogt, %19, %20 : vector<7x64xf32>
    %cst_13 = arith.constant 0.00999999977 : f32
    %22 = vector.broadcast %cst_13 : f32 to vector<7x64xf32>
    %23 = arith.mulf %22, %19 : vector<7x64xf32>
    %24 = arith.select %21, %19, %23 : vector<7x64xi1>, vector<7x64xf32>
    %c0_14 = arith.constant 0 : index
    %c0_15 = arith.constant 0 : index
    %25 = vector.load %arg6[%c0_14, %c0_15] : memref<64x64xf32, #tpu.memory_space<vmem>>, vector<64x64xf32>
    %c0_16 = arith.constant 0 : index
    %c0_17 = arith.constant 0 : index
    %26 = vector.load %arg7[%c0_16, %c0_17] : memref<1x64xf32, #tpu.memory_space<vmem>>, vector<1x64xf32>
    %27 = arith.truncf %24 : vector<7x64xf32> to vector<7x64xbf16>
    %28 = arith.truncf %25 : vector<64x64xf32> to vector<64x64xbf16>
    %cst_18 = arith.constant dense<0.000000e+00> : vector<7x64xf32>
    %29 = tpu.matmul %27, %28, %cst_18 {dimension_numbers = #tpu.dot_dimension_numbers<[1], [0], [0], [1], [0, 0, 1, 1], [], []>} : vector<7x64xbf16>, vector<64x64xbf16>, vector<7x64xf32> -> vector<7x64xf32>
    %30 = vector.broadcast %26 : vector<1x64xf32> to vector<7x64xf32>
    %31 = arith.addf %29, %30 : vector<7x64xf32>
    %c0_19 = arith.constant 0 : index
    %c0_20 = arith.constant 0 : index
    %32 = vector.load %arg8[%c0_19, %c0_20] : memref<7x64xf32, #tpu.memory_space<vmem>>, vector<7x64xf32>
    tpu.vector_store %arg8[%c0_19, %c0_20], %31 {strides = array<i32>} : memref<7x64xf32, #tpu.memory_space<vmem>>, vector<7x64xf32>,
    return
  }
  func.func @transform_0(%arg0: i32) -> (i32, i32) {
    %c0_i32 = arith.constant 0 : i32
    %c0_i32_0 = arith.constant 0 : i32
    return %arg0, %c0_i32 : i32, i32
  }
  func.func @transform_1(%arg0: i32) -> (i32, i32) {
    %c0_i32 = arith.constant 0 : i32
    %c0_i32_0 = arith.constant 0 : i32
    %c0_i32_1 = arith.constant 0 : i32
    return %c0_i32, %c0_i32_0 : i32, i32
  }
  func.func @transform_2(%arg0: i32) -> (i32, i32) {
    %c0_i32 = arith.constant 0 : i32
    %c0_i32_0 = arith.constant 0 : i32
    %c0_i32_1 = arith.constant 0 : i32
    return %c0_i32, %c0_i32_0 : i32, i32
  }
  func.func @transform_3(%arg0: i32) -> (i32, i32) {
    %c0_i32 = arith.constant 0 : i32
    %c0_i32_0 = arith.constant 0 : i32
    %c0_i32_1 = arith.constant 0 : i32
    return %c0_i32, %c0_i32_0 : i32, i32
  }
  func.func @transform_4(%arg0: i32) -> (i32, i32) {
    %c0_i32 = arith.constant 0 : i32
    %c0_i32_0 = arith.constant 0 : i32
    %c0_i32_1 = arith.constant 0 : i32
    return %c0_i32, %c0_i32_0 : i32, i32
  }
  func.func @transform_5(%arg0: i32) -> (i32, i32) {
    %c0_i32 = arith.constant 0 : i32
    %c0_i32_0 = arith.constant 0 : i32
    %c0_i32_1 = arith.constant 0 : i32
    return %c0_i32, %c0_i32_0 : i32, i32
  }
  func.func @transform_6(%arg0: i32) -> (i32, i32) {
    %c0_i32 = arith.constant 0 : i32
    %c0_i32_0 = arith.constant 0 : i32
    %c0_i32_1 = arith.constant 0 : i32
    return %c0_i32, %c0_i32_0 : i32, i32
  }
  func.func @transform_7(%arg0: i32) -> (i32, i32) {
    %c0_i32 = arith.constant 0 : i32
    %c0_i32_0 = arith.constant 0 : i32
    return %arg0, %c0_i32 : i32, i32
  }
}

module attributes {stable_mosaic.version = 11 : i64} {
  func.func @_fused_mlp_kernel(%arg0: i32, %arg1: memref<2x6xf32, #tpu.memory_space<vmem>>, %arg2: memref<6x64xf32, #tpu.memory_space<vmem>>, %arg3: memref<1x64xf32, #tpu.memory_space<vmem>>, %arg4: memref<64x64xf32, #tpu.memory_space<vmem>>, %arg5: memref<1x64xf32, #tpu.memory_space<vmem>>, %arg6: memref<64x64xf32, #tpu.memory_space<vmem>>, %arg7: memref<1x64xf32, #tpu.memory_space<vmem>>, %arg8: memref<2x64xf32, #tpu.memory_space<vmem>>) attributes {dimension_semantics = [#tpu.dimension_semantics<parallel>], iteration_bounds = array<i64: 1>, scalar_prefetch = 0 : i64, scratch_operands = 0 : i64, tpu.core_type = #tpu.core_type<tc>, window_params = [{transform_indices = @transform_0, window_bounds = array<i64: 2, 6>}, {pipeline_mode = #tpu.pipeline_mode<synchronous>, transform_indices = @transform_1, window_bounds = array<i64: 6, 64>}, {pipeline_mode = #tpu.pipeline_mode<synchronous>, transform_indices = @transform_2, window_bounds = array<i64: 1, 64>}, {pipeline_mode = #tpu.pipeline_mode<synchronous>, transform_indices = @transform_3, window_bounds = array<i64: 64, 64>}, {pipeline_mode = #tpu.pipeline_mode<synchronous>, transform_indices = @transform_4, window_bounds = array<i64: 1, 64>}, {pipeline_mode = #tpu.pipeline_mode<synchronous>, transform_indices = @transform_5, window_bounds = array<i64: 64, 64>}, {pipeline_mode = #tpu.pipeline_mode<synchronous>, transform_indices = @transform_6, window_bounds = array<i64: 1, 64>}, {transform_indices = @transform_7, window_bounds = array<i64: 2, 64>}]} {
    %c0 = arith.constant 0 : index
    %c0_0 = arith.constant 0 : index
    %0 = vector.load %arg1[%c0, %c0_0] : memref<2x6xf32, #tpu.memory_space<vmem>>, vector<2x6xf32>
    %c0_1 = arith.constant 0 : index
    %c0_2 = arith.constant 0 : index
    %1 = vector.load %arg2[%c0_1, %c0_2] : memref<6x64xf32, #tpu.memory_space<vmem>>, vector<6x64xf32>
    %c0_3 = arith.constant 0 : index
    %c0_4 = arith.constant 0 : index
    %2 = vector.load %arg3[%c0_3, %c0_4] : memref<1x64xf32, #tpu.memory_space<vmem>>, vector<1x64xf32>
    %3 = arith.truncf %0 : vector<2x6xf32> to vector<2x6xbf16>
    %4 = arith.truncf %1 : vector<6x64xf32> to vector<6x64xbf16>
    %cst = arith.constant dense<0.000000e+00> : vector<2x64xf32>
    %5 = tpu.matmul %3, %4, %cst {dimension_numbers = #tpu.dot_dimension_numbers<[1], [0], [0], [1], [0, 0, 1, 1], [], []>} : vector<2x6xbf16>, vector<6x64xbf16>, vector<2x64xf32> -> vector<2x64xf32>
    %6 = vector.broadcast %2 : vector<1x64xf32> to vector<2x64xf32>
    %7 = arith.addf %5, %6 : vector<2x64xf32>
    %cst_5 = arith.constant 0.000000e+00 : f32
    %8 = vector.broadcast %cst_5 : f32 to vector<2x64xf32>
    %9 = arith.cmpf ogt, %7, %8 : vector<2x64xf32>
    %cst_6 = arith.constant 0.00999999977 : f32
    %10 = vector.broadcast %cst_6 : f32 to vector<2x64xf32>
    %11 = arith.mulf %10, %7 : vector<2x64xf32>
    %12 = arith.select %9, %7, %11 : vector<2x64xi1>, vector<2x64xf32>
    %c0_7 = arith.constant 0 : index
    %c0_8 = arith.constant 0 : index
    %13 = vector.load %arg4[%c0_7, %c0_8] : memref<64x64xf32, #tpu.memory_space<vmem>>, vector<64x64xf32>
    %c0_9 = arith.constant 0 : index
    %c0_10 = arith.constant 0 : index
    %14 = vector.load %arg5[%c0_9, %c0_10] : memref<1x64xf32, #tpu.memory_space<vmem>>, vector<1x64xf32>
    %15 = arith.truncf %12 : vector<2x64xf32> to vector<2x64xbf16>
    %16 = arith.truncf %13 : vector<64x64xf32> to vector<64x64xbf16>
    %cst_11 = arith.constant dense<0.000000e+00> : vector<2x64xf32>
    %17 = tpu.matmul %15, %16, %cst_11 {dimension_numbers = #tpu.dot_dimension_numbers<[1], [0], [0], [1], [0, 0, 1, 1], [], []>} : vector<2x64xbf16>, vector<64x64xbf16>, vector<2x64xf32> -> vector<2x64xf32>
    %18 = vector.broadcast %14 : vector<1x64xf32> to vector<2x64xf32>
    %19 = arith.addf %17, %18 : vector<2x64xf32>
    %cst_12 = arith.constant 0.000000e+00 : f32
    %20 = vector.broadcast %cst_12 : f32 to vector<2x64xf32>
    %21 = arith.cmpf ogt, %19, %20 : vector<2x64xf32>
    %cst_13 = arith.constant 0.00999999977 : f32
    %22 = vector.broadcast %cst_13 : f32 to vector<2x64xf32>
    %23 = arith.mulf %22, %19 : vector<2x64xf32>
    %24 = arith.select %21, %19, %23 : vector<2x64xi1>, vector<2x64xf32>
    %c0_14 = arith.constant 0 : index
    %c0_15 = arith.constant 0 : index
    %25 = vector.load %arg6[%c0_14, %c0_15] : memref<64x64xf32, #tpu.memory_space<vmem>>, vector<64x64xf32>
    %c0_16 = arith.constant 0 : index
    %c0_17 = arith.constant 0 : index
    %26 = vector.load %arg7[%c0_16, %c0_17] : memref<1x64xf32, #tpu.memory_space<vmem>>, vector<1x64xf32>
    %27 = arith.truncf %24 : vector<2x64xf32> to vector<2x64xbf16>
    %28 = arith.truncf %25 : vector<64x64xf32> to vector<64x64xbf16>
    %cst_18 = arith.constant dense<0.000000e+00> : vector<2x64xf32>
    %29 = tpu.matmul %27, %28, %cst_18 {dimension_numbers = #tpu.dot_dimension_numbers<[1], [0], [0], [1], [0, 0, 1, 1], [], []>} : vector<2x64xbf16>, vector<64x64xbf16>, vector<2x64xf32> -> vector<2x64xf32>
    %30 = vector.broadcast %26 : vector<1x64xf32> to vector<2x64xf32>
    %31 = arith.addf %29, %30 : vector<2x64xf32>
    %c0_19 = arith.constant 0 : index
    %c0_20 = arith.constant 0 : index
    %32 = vector.load %arg8[%c0_19, %c0_20] : memref<2x64xf32, #tpu.memory_space<vmem>>, vector<2x64xf32>
    tpu.vector_store %arg8[%c0_19, %c0_20], %31 {strides = array<i32>} : memref<2x64xf32, #tpu.memory_space<vmem>>, vector<2x64xf32>,
    return
  }
  func.func @transform_0(%arg0: i32) -> (i32, i32) {
    %c0_i32 = arith.constant 0 : i32
    %c0_i32_0 = arith.constant 0 : i32
    return %arg0, %c0_i32 : i32, i32
  }
  func.func @transform_1(%arg0: i32) -> (i32, i32) {
    %c0_i32 = arith.constant 0 : i32
    %c0_i32_0 = arith.constant 0 : i32
    %c0_i32_1 = arith.constant 0 : i32
    return %c0_i32, %c0_i32_0 : i32, i32
  }
  func.func @transform_2(%arg0: i32) -> (i32, i32) {
    %c0_i32 = arith.constant 0 : i32
    %c0_i32_0 = arith.constant 0 : i32
    %c0_i32_1 = arith.constant 0 : i32
    return %c0_i32, %c0_i32_0 : i32, i32
  }
  func.func @transform_3(%arg0: i32) -> (i32, i32) {
    %c0_i32 = arith.constant 0 : i32
    %c0_i32_0 = arith.constant 0 : i32
    %c0_i32_1 = arith.constant 0 : i32
    return %c0_i32, %c0_i32_0 : i32, i32
  }
  func.func @transform_4(%arg0: i32) -> (i32, i32) {
    %c0_i32 = arith.constant 0 : i32
    %c0_i32_0 = arith.constant 0 : i32
    %c0_i32_1 = arith.constant 0 : i32
    return %c0_i32, %c0_i32_0 : i32, i32
  }
  func.func @transform_5(%arg0: i32) -> (i32, i32) {
    %c0_i32 = arith.constant 0 : i32
    %c0_i32_0 = arith.constant 0 : i32
    %c0_i32_1 = arith.constant 0 : i32
    return %c0_i32, %c0_i32_0 : i32, i32
  }
  func.func @transform_6(%arg0: i32) -> (i32, i32) {
    %c0_i32 = arith.constant 0 : i32
    %c0_i32_0 = arith.constant 0 : i32
    %c0_i32_1 = arith.constant 0 : i32
    return %c0_i32, %c0_i32_0 : i32, i32
  }
  func.func @transform_7(%arg0: i32) -> (i32, i32) {
    %c0_i32 = arith.constant 0 : i32
    %c0_i32_0 = arith.constant 0 : i32
    return %arg0, %c0_i32 : i32, i32
  }
}

module attributes {stable_mosaic.version = 11 : i64} {
  func.func @_fused_mlp_kernel(%arg0: i32, %arg1: memref<9x64xf32, #tpu.memory_space<vmem>>, %arg2: memref<64x64xf32, #tpu.memory_space<vmem>>, %arg3: memref<1x64xf32, #tpu.memory_space<vmem>>, %arg4: memref<9x64xf32, #tpu.memory_space<vmem>>) attributes {dimension_semantics = [#tpu.dimension_semantics<parallel>], iteration_bounds = array<i64: 1>, scalar_prefetch = 0 : i64, scratch_operands = 0 : i64, tpu.core_type = #tpu.core_type<tc>, window_params = [{transform_indices = @transform_0, window_bounds = array<i64: 9, 64>}, {pipeline_mode = #tpu.pipeline_mode<synchronous>, transform_indices = @transform_1, window_bounds = array<i64: 64, 64>}, {pipeline_mode = #tpu.pipeline_mode<synchronous>, transform_indices = @transform_2, window_bounds = array<i64: 1, 64>}, {transform_indices = @transform_3, window_bounds = array<i64: 9, 64>}]} {
    %c0 = arith.constant 0 : index
    %c0_0 = arith.constant 0 : index
    %0 = vector.load %arg1[%c0, %c0_0] : memref<9x64xf32, #tpu.memory_space<vmem>>, vector<9x64xf32>
    %c0_1 = arith.constant 0 : index
    %c0_2 = arith.constant 0 : index
    %1 = vector.load %arg2[%c0_1, %c0_2] : memref<64x64xf32, #tpu.memory_space<vmem>>, vector<64x64xf32>
    %c0_3 = arith.constant 0 : index
    %c0_4 = arith.constant 0 : index
    %2 = vector.load %arg3[%c0_3, %c0_4] : memref<1x64xf32, #tpu.memory_space<vmem>>, vector<1x64xf32>
    %3 = arith.truncf %0 : vector<9x64xf32> to vector<9x64xbf16>
    %4 = arith.truncf %1 : vector<64x64xf32> to vector<64x64xbf16>
    %cst = arith.constant dense<0.000000e+00> : vector<9x64xf32>
    %5 = tpu.matmul %3, %4, %cst {dimension_numbers = #tpu.dot_dimension_numbers<[1], [0], [0], [1], [0, 0, 1, 1], [], []>} : vector<9x64xbf16>, vector<64x64xbf16>, vector<9x64xf32> -> vector<9x64xf32>
    %6 = vector.broadcast %2 : vector<1x64xf32> to vector<9x64xf32>
    %7 = arith.addf %5, %6 : vector<9x64xf32>
    %c0_5 = arith.constant 0 : index
    %c0_6 = arith.constant 0 : index
    %8 = vector.load %arg4[%c0_5, %c0_6] : memref<9x64xf32, #tpu.memory_space<vmem>>, vector<9x64xf32>
    tpu.vector_store %arg4[%c0_5, %c0_6], %7 {strides = array<i32>} : memref<9x64xf32, #tpu.memory_space<vmem>>, vector<9x64xf32>,
    return
  }
  func.func @transform_0(%arg0: i32) -> (i32, i32) {
    %c0_i32 = arith.constant 0 : i32
    %c0_i32_0 = arith.constant 0 : i32
    return %arg0, %c0_i32 : i32, i32
  }
  func.func @transform_1(%arg0: i32) -> (i32, i32) {
    %c0_i32 = arith.constant 0 : i32
    %c0_i32_0 = arith.constant 0 : i32
    %c0_i32_1 = arith.constant 0 : i32
    return %c0_i32, %c0_i32_0 : i32, i32
  }
  func.func @transform_2(%arg0: i32) -> (i32, i32) {
    %c0_i32 = arith.constant 0 : i32
    %c0_i32_0 = arith.constant 0 : i32
    %c0_i32_1 = arith.constant 0 : i32
    return %c0_i32, %c0_i32_0 : i32, i32
  }
  func.func @transform_3(%arg0: i32) -> (i32, i32) {
    %c0_i32 = arith.constant 0 : i32
    %c0_i32_0 = arith.constant 0 : i32
    return %arg0, %c0_i32 : i32, i32
  }
}

module attributes {stable_mosaic.version = 11 : i64} {
  func.func @_fused_mlp_kernel(%arg0: i32, %arg1: memref<9x128xf32, #tpu.memory_space<vmem>>, %arg2: memref<128x512xf32, #tpu.memory_space<vmem>>, %arg3: memref<1x512xf32, #tpu.memory_space<vmem>>, %arg4: memref<9x512xf32, #tpu.memory_space<vmem>>) attributes {dimension_semantics = [#tpu.dimension_semantics<parallel>], iteration_bounds = array<i64: 1>, scalar_prefetch = 0 : i64, scratch_operands = 0 : i64, tpu.core_type = #tpu.core_type<tc>, window_params = [{transform_indices = @transform_0, window_bounds = array<i64: 9, 128>}, {pipeline_mode = #tpu.pipeline_mode<synchronous>, transform_indices = @transform_1, window_bounds = array<i64: 128, 512>}, {pipeline_mode = #tpu.pipeline_mode<synchronous>, transform_indices = @transform_2, window_bounds = array<i64: 1, 512>}, {transform_indices = @transform_3, window_bounds = array<i64: 9, 512>}]} {
    %c0 = arith.constant 0 : index
    %c0_0 = arith.constant 0 : index
    %0 = vector.load %arg1[%c0, %c0_0] : memref<9x128xf32, #tpu.memory_space<vmem>>, vector<9x128xf32>
    %c0_1 = arith.constant 0 : index
    %c0_2 = arith.constant 0 : index
    %1 = vector.load %arg2[%c0_1, %c0_2] : memref<128x512xf32, #tpu.memory_space<vmem>>, vector<128x512xf32>
    %c0_3 = arith.constant 0 : index
    %c0_4 = arith.constant 0 : index
    %2 = vector.load %arg3[%c0_3, %c0_4] : memref<1x512xf32, #tpu.memory_space<vmem>>, vector<1x512xf32>
    %3 = arith.truncf %0 : vector<9x128xf32> to vector<9x128xbf16>
    %4 = arith.truncf %1 : vector<128x512xf32> to vector<128x512xbf16>
    %cst = arith.constant dense<0.000000e+00> : vector<9x512xf32>
    %5 = tpu.matmul %3, %4, %cst {dimension_numbers = #tpu.dot_dimension_numbers<[1], [0], [0], [1], [0, 0, 1, 1], [], []>} : vector<9x128xbf16>, vector<128x512xbf16>, vector<9x512xf32> -> vector<9x512xf32>
    %6 = vector.broadcast %2 : vector<1x512xf32> to vector<9x512xf32>
    %7 = arith.addf %5, %6 : vector<9x512xf32>
    %c0_5 = arith.constant 0 : index
    %c0_6 = arith.constant 0 : index
    %8 = vector.load %arg4[%c0_5, %c0_6] : memref<9x512xf32, #tpu.memory_space<vmem>>, vector<9x512xf32>
    tpu.vector_store %arg4[%c0_5, %c0_6], %7 {strides = array<i32>} : memref<9x512xf32, #tpu.memory_space<vmem>>, vector<9x512xf32>,
    return
  }
  func.func @transform_0(%arg0: i32) -> (i32, i32) {
    %c0_i32 = arith.constant 0 : i32
    %c0_i32_0 = arith.constant 0 : i32
    return %arg0, %c0_i32 : i32, i32
  }
  func.func @transform_1(%arg0: i32) -> (i32, i32) {
    %c0_i32 = arith.constant 0 : i32
    %c0_i32_0 = arith.constant 0 : i32
    %c0_i32_1 = arith.constant 0 : i32
    return %c0_i32, %c0_i32_0 : i32, i32
  }
  func.func @transform_2(%arg0: i32) -> (i32, i32) {
    %c0_i32 = arith.constant 0 : i32
    %c0_i32_0 = arith.constant 0 : i32
    %c0_i32_1 = arith.constant 0 : i32
    return %c0_i32, %c0_i32_0 : i32, i32
  }
  func.func @transform_3(%arg0: i32) -> (i32, i32) {
    %c0_i32 = arith.constant 0 : i32
    %c0_i32_0 = arith.constant 0 : i32
    return %arg0, %c0_i32 : i32, i32
  }
}

module attributes {stable_mosaic.version = 11 : i64} {
  func.func @_fused_mlp_kernel(%arg0: i32, %arg1: memref<33x64xf32, #tpu.memory_space<vmem>>, %arg2: memref<64x128xf32, #tpu.memory_space<vmem>>, %arg3: memref<1x128xf32, #tpu.memory_space<vmem>>, %arg4: memref<33x128xf32, #tpu.memory_space<vmem>>) attributes {dimension_semantics = [#tpu.dimension_semantics<parallel>], iteration_bounds = array<i64: 1>, scalar_prefetch = 0 : i64, scratch_operands = 0 : i64, tpu.core_type = #tpu.core_type<tc>, window_params = [{transform_indices = @transform_0, window_bounds = array<i64: 33, 64>}, {pipeline_mode = #tpu.pipeline_mode<synchronous>, transform_indices = @transform_1, window_bounds = array<i64: 64, 128>}, {pipeline_mode = #tpu.pipeline_mode<synchronous>, transform_indices = @transform_2, window_bounds = array<i64: 1, 128>}, {transform_indices = @transform_3, window_bounds = array<i64: 33, 128>}]} {
    %c0 = arith.constant 0 : index
    %c0_0 = arith.constant 0 : index
    %0 = vector.load %arg1[%c0, %c0_0] : memref<33x64xf32, #tpu.memory_space<vmem>>, vector<33x64xf32>
    %c0_1 = arith.constant 0 : index
    %c0_2 = arith.constant 0 : index
    %1 = vector.load %arg2[%c0_1, %c0_2] : memref<64x128xf32, #tpu.memory_space<vmem>>, vector<64x128xf32>
    %c0_3 = arith.constant 0 : index
    %c0_4 = arith.constant 0 : index
    %2 = vector.load %arg3[%c0_3, %c0_4] : memref<1x128xf32, #tpu.memory_space<vmem>>, vector<1x128xf32>
    %3 = arith.truncf %0 : vector<33x64xf32> to vector<33x64xbf16>
    %4 = arith.truncf %1 : vector<64x128xf32> to vector<64x128xbf16>
    %cst = arith.constant dense<0.000000e+00> : vector<33x128xf32>
    %5 = tpu.matmul %3, %4, %cst {dimension_numbers = #tpu.dot_dimension_numbers<[1], [0], [0], [1], [0, 0, 1, 1], [], []>} : vector<33x64xbf16>, vector<64x128xbf16>, vector<33x128xf32> -> vector<33x128xf32>
    %6 = vector.broadcast %2 : vector<1x128xf32> to vector<33x128xf32>
    %7 = arith.addf %5, %6 : vector<33x128xf32>
    %c0_5 = arith.constant 0 : index
    %c0_6 = arith.constant 0 : index
    %8 = vector.load %arg4[%c0_5, %c0_6] : memref<33x128xf32, #tpu.memory_space<vmem>>, vector<33x128xf32>
    tpu.vector_store %arg4[%c0_5, %c0_6], %7 {strides = array<i32>} : memref<33x128xf32, #tpu.memory_space<vmem>>, vector<33x128xf32>,
    return
  }
  func.func @transform_0(%arg0: i32) -> (i32, i32) {
    %c0_i32 = arith.constant 0 : i32
    %c0_i32_0 = arith.constant 0 : i32
    return %arg0, %c0_i32 : i32, i32
  }
  func.func @transform_1(%arg0: i32) -> (i32, i32) {
    %c0_i32 = arith.constant 0 : i32
    %c0_i32_0 = arith.constant 0 : i32
    %c0_i32_1 = arith.constant 0 : i32
    return %c0_i32, %c0_i32_0 : i32, i32
  }
  func.func @transform_2(%arg0: i32) -> (i32, i32) {
    %c0_i32 = arith.constant 0 : i32
    %c0_i32_0 = arith.constant 0 : i32
    %c0_i32_1 = arith.constant 0 : i32
    return %c0_i32, %c0_i32_0 : i32, i32
  }
  func.func @transform_3(%arg0: i32) -> (i32, i32) {
    %c0_i32 = arith.constant 0 : i32
    %c0_i32_0 = arith.constant 0 : i32
    return %arg0, %c0_i32 : i32, i32
  }
}

module attributes {stable_mosaic.version = 11 : i64} {
  func.func @_fused_mlp_kernel(%arg0: i32, %arg1: memref<9x128xf32, #tpu.memory_space<vmem>>, %arg2: memref<128x64xf32, #tpu.memory_space<vmem>>, %arg3: memref<1x64xf32, #tpu.memory_space<vmem>>, %arg4: memref<9x64xf32, #tpu.memory_space<vmem>>) attributes {dimension_semantics = [#tpu.dimension_semantics<parallel>], iteration_bounds = array<i64: 1>, scalar_prefetch = 0 : i64, scratch_operands = 0 : i64, tpu.core_type = #tpu.core_type<tc>, window_params = [{transform_indices = @transform_0, window_bounds = array<i64: 9, 128>}, {pipeline_mode = #tpu.pipeline_mode<synchronous>, transform_indices = @transform_1, window_bounds = array<i64: 128, 64>}, {pipeline_mode = #tpu.pipeline_mode<synchronous>, transform_indices = @transform_2, window_bounds = array<i64: 1, 64>}, {transform_indices = @transform_3, window_bounds = array<i64: 9, 64>}]} {
    %c0 = arith.constant 0 : index
    %c0_0 = arith.constant 0 : index
    %0 = vector.load %arg1[%c0, %c0_0] : memref<9x128xf32, #tpu.memory_space<vmem>>, vector<9x128xf32>
    %c0_1 = arith.constant 0 : index
    %c0_2 = arith.constant 0 : index
    %1 = vector.load %arg2[%c0_1, %c0_2] : memref<128x64xf32, #tpu.memory_space<vmem>>, vector<128x64xf32>
    %c0_3 = arith.constant 0 : index
    %c0_4 = arith.constant 0 : index
    %2 = vector.load %arg3[%c0_3, %c0_4] : memref<1x64xf32, #tpu.memory_space<vmem>>, vector<1x64xf32>
    %3 = arith.truncf %0 : vector<9x128xf32> to vector<9x128xbf16>
    %4 = arith.truncf %1 : vector<128x64xf32> to vector<128x64xbf16>
    %cst = arith.constant dense<0.000000e+00> : vector<9x64xf32>
    %5 = tpu.matmul %3, %4, %cst {dimension_numbers = #tpu.dot_dimension_numbers<[1], [0], [0], [1], [0, 0, 1, 1], [], []>} : vector<9x128xbf16>, vector<128x64xbf16>, vector<9x64xf32> -> vector<9x64xf32>
    %6 = vector.broadcast %2 : vector<1x64xf32> to vector<9x64xf32>
    %7 = arith.addf %5, %6 : vector<9x64xf32>
    %c0_5 = arith.constant 0 : index
    %c0_6 = arith.constant 0 : index
    %8 = vector.load %arg4[%c0_5, %c0_6] : memref<9x64xf32, #tpu.memory_space<vmem>>, vector<9x64xf32>
    tpu.vector_store %arg4[%c0_5, %c0_6], %7 {strides = array<i32>} : memref<9x64xf32, #tpu.memory_space<vmem>>, vector<9x64xf32>,
    return
  }
  func.func @transform_0(%arg0: i32) -> (i32, i32) {
    %c0_i32 = arith.constant 0 : i32
    %c0_i32_0 = arith.constant 0 : i32
    return %arg0, %c0_i32 : i32, i32
  }
  func.func @transform_1(%arg0: i32) -> (i32, i32) {
    %c0_i32 = arith.constant 0 : i32
    %c0_i32_0 = arith.constant 0 : i32
    %c0_i32_1 = arith.constant 0 : i32
    return %c0_i32, %c0_i32_0 : i32, i32
  }
  func.func @transform_2(%arg0: i32) -> (i32, i32) {
    %c0_i32 = arith.constant 0 : i32
    %c0_i32_0 = arith.constant 0 : i32
    %c0_i32_1 = arith.constant 0 : i32
    return %c0_i32, %c0_i32_0 : i32, i32
  }
  func.func @transform_3(%arg0: i32) -> (i32, i32) {
    %c0_i32 = arith.constant 0 : i32
    %c0_i32_0 = arith.constant 0 : i32
    return %arg0, %c0_i32 : i32, i32
  }
}

module attributes {stable_mosaic.version = 11 : i64} {
  func.func @_fused_mlp_kernel(%arg0: i32, %arg1: memref<9x64xf32, #tpu.memory_space<vmem>>, %arg2: memref<64x256xf32, #tpu.memory_space<vmem>>, %arg3: memref<1x256xf32, #tpu.memory_space<vmem>>, %arg4: memref<256x64xf32, #tpu.memory_space<vmem>>, %arg5: memref<1x64xf32, #tpu.memory_space<vmem>>, %arg6: memref<9x64xf32, #tpu.memory_space<vmem>>) attributes {dimension_semantics = [#tpu.dimension_semantics<parallel>], iteration_bounds = array<i64: 1>, scalar_prefetch = 0 : i64, scratch_operands = 0 : i64, tpu.core_type = #tpu.core_type<tc>, window_params = [{transform_indices = @transform_0, window_bounds = array<i64: 9, 64>}, {pipeline_mode = #tpu.pipeline_mode<synchronous>, transform_indices = @transform_1, window_bounds = array<i64: 64, 256>}, {pipeline_mode = #tpu.pipeline_mode<synchronous>, transform_indices = @transform_2, window_bounds = array<i64: 1, 256>}, {pipeline_mode = #tpu.pipeline_mode<synchronous>, transform_indices = @transform_3, window_bounds = array<i64: 256, 64>}, {pipeline_mode = #tpu.pipeline_mode<synchronous>, transform_indices = @transform_4, window_bounds = array<i64: 1, 64>}, {transform_indices = @transform_5, window_bounds = array<i64: 9, 64>}]} {
    %c0 = arith.constant 0 : index
    %c0_0 = arith.constant 0 : index
    %0 = vector.load %arg1[%c0, %c0_0] : memref<9x64xf32, #tpu.memory_space<vmem>>, vector<9x64xf32>
    %c0_1 = arith.constant 0 : index
    %c0_2 = arith.constant 0 : index
    %1 = vector.load %arg2[%c0_1, %c0_2] : memref<64x256xf32, #tpu.memory_space<vmem>>, vector<64x256xf32>
    %c0_3 = arith.constant 0 : index
    %c0_4 = arith.constant 0 : index
    %2 = vector.load %arg3[%c0_3, %c0_4] : memref<1x256xf32, #tpu.memory_space<vmem>>, vector<1x256xf32>
    %3 = arith.truncf %0 : vector<9x64xf32> to vector<9x64xbf16>
    %4 = arith.truncf %1 : vector<64x256xf32> to vector<64x256xbf16>
    %cst = arith.constant dense<0.000000e+00> : vector<9x256xf32>
    %5 = tpu.matmul %3, %4, %cst {dimension_numbers = #tpu.dot_dimension_numbers<[1], [0], [0], [1], [0, 0, 1, 1], [], []>} : vector<9x64xbf16>, vector<64x256xbf16>, vector<9x256xf32> -> vector<9x256xf32>
    %6 = vector.broadcast %2 : vector<1x256xf32> to vector<9x256xf32>
    %7 = arith.addf %5, %6 : vector<9x256xf32>
    %cst_5 = arith.constant 0.000000e+00 : f32
    %8 = vector.broadcast %cst_5 : f32 to vector<9x256xf32>
    %9 = arith.cmpf ogt, %7, %8 : vector<9x256xf32>
    %cst_6 = arith.constant 0.00999999977 : f32
    %10 = vector.broadcast %cst_6 : f32 to vector<9x256xf32>
    %11 = arith.mulf %10, %7 : vector<9x256xf32>
    %12 = arith.select %9, %7, %11 : vector<9x256xi1>, vector<9x256xf32>
    %c0_7 = arith.constant 0 : index
    %c0_8 = arith.constant 0 : index
    %13 = vector.load %arg4[%c0_7, %c0_8] : memref<256x64xf32, #tpu.memory_space<vmem>>, vector<256x64xf32>
    %c0_9 = arith.constant 0 : index
    %c0_10 = arith.constant 0 : index
    %14 = vector.load %arg5[%c0_9, %c0_10] : memref<1x64xf32, #tpu.memory_space<vmem>>, vector<1x64xf32>
    %15 = arith.truncf %12 : vector<9x256xf32> to vector<9x256xbf16>
    %16 = arith.truncf %13 : vector<256x64xf32> to vector<256x64xbf16>
    %cst_11 = arith.constant dense<0.000000e+00> : vector<9x64xf32>
    %17 = tpu.matmul %15, %16, %cst_11 {dimension_numbers = #tpu.dot_dimension_numbers<[1], [0], [0], [1], [0, 0, 1, 1], [], []>} : vector<9x256xbf16>, vector<256x64xbf16>, vector<9x64xf32> -> vector<9x64xf32>
    %18 = vector.broadcast %14 : vector<1x64xf32> to vector<9x64xf32>
    %19 = arith.addf %17, %18 : vector<9x64xf32>
    %c0_12 = arith.constant 0 : index
    %c0_13 = arith.constant 0 : index
    %20 = vector.load %arg6[%c0_12, %c0_13] : memref<9x64xf32, #tpu.memory_space<vmem>>, vector<9x64xf32>
    tpu.vector_store %arg6[%c0_12, %c0_13], %19 {strides = array<i32>} : memref<9x64xf32, #tpu.memory_space<vmem>>, vector<9x64xf32>,
    return
  }
  func.func @transform_0(%arg0: i32) -> (i32, i32) {
    %c0_i32 = arith.constant 0 : i32
    %c0_i32_0 = arith.constant 0 : i32
    return %arg0, %c0_i32 : i32, i32
  }
  func.func @transform_1(%arg0: i32) -> (i32, i32) {
    %c0_i32 = arith.constant 0 : i32
    %c0_i32_0 = arith.constant 0 : i32
    %c0_i32_1 = arith.constant 0 : i32
    return %c0_i32, %c0_i32_0 : i32, i32
  }
  func.func @transform_2(%arg0: i32) -> (i32, i32) {
    %c0_i32 = arith.constant 0 : i32
    %c0_i32_0 = arith.constant 0 : i32
    %c0_i32_1 = arith.constant 0 : i32
    return %c0_i32, %c0_i32_0 : i32, i32
  }
  func.func @transform_3(%arg0: i32) -> (i32, i32) {
    %c0_i32 = arith.constant 0 : i32
    %c0_i32_0 = arith.constant 0 : i32
    %c0_i32_1 = arith.constant 0 : i32
    return %c0_i32, %c0_i32_0 : i32, i32
  }
  func.func @transform_4(%arg0: i32) -> (i32, i32) {
    %c0_i32 = arith.constant 0 : i32
    %c0_i32_0 = arith.constant 0 : i32
    %c0_i32_1 = arith.constant 0 : i32
    return %c0_i32, %c0_i32_0 : i32, i32
  }
  func.func @transform_5(%arg0: i32) -> (i32, i32) {
    %c0_i32 = arith.constant 0 : i32
    %c0_i32_0 = arith.constant 0 : i32
    return %arg0, %c0_i32 : i32, i32
  }
}

module attributes {stable_mosaic.version = 11 : i64} {
  func.func @_fused_mlp_kernel(%arg0: i32, %arg1: memref<9x64xf32, #tpu.memory_space<vmem>>, %arg2: memref<64x64xf32, #tpu.memory_space<vmem>>, %arg3: memref<1x64xf32, #tpu.memory_space<vmem>>, %arg4: memref<9x64xf32, #tpu.memory_space<vmem>>) attributes {dimension_semantics = [#tpu.dimension_semantics<parallel>], iteration_bounds = array<i64: 1>, scalar_prefetch = 0 : i64, scratch_operands = 0 : i64, tpu.core_type = #tpu.core_type<tc>, window_params = [{transform_indices = @transform_0, window_bounds = array<i64: 9, 64>}, {pipeline_mode = #tpu.pipeline_mode<synchronous>, transform_indices = @transform_1, window_bounds = array<i64: 64, 64>}, {pipeline_mode = #tpu.pipeline_mode<synchronous>, transform_indices = @transform_2, window_bounds = array<i64: 1, 64>}, {transform_indices = @transform_3, window_bounds = array<i64: 9, 64>}]} {
    %c0 = arith.constant 0 : index
    %c0_0 = arith.constant 0 : index
    %0 = vector.load %arg1[%c0, %c0_0] : memref<9x64xf32, #tpu.memory_space<vmem>>, vector<9x64xf32>
    %c0_1 = arith.constant 0 : index
    %c0_2 = arith.constant 0 : index
    %1 = vector.load %arg2[%c0_1, %c0_2] : memref<64x64xf32, #tpu.memory_space<vmem>>, vector<64x64xf32>
    %c0_3 = arith.constant 0 : index
    %c0_4 = arith.constant 0 : index
    %2 = vector.load %arg3[%c0_3, %c0_4] : memref<1x64xf32, #tpu.memory_space<vmem>>, vector<1x64xf32>
    %3 = arith.truncf %0 : vector<9x64xf32> to vector<9x64xbf16>
    %4 = arith.truncf %1 : vector<64x64xf32> to vector<64x64xbf16>
    %cst = arith.constant dense<0.000000e+00> : vector<9x64xf32>
    %5 = tpu.matmul %3, %4, %cst {dimension_numbers = #tpu.dot_dimension_numbers<[1], [0], [0], [1], [0, 0, 1, 1], [], []>} : vector<9x64xbf16>, vector<64x64xbf16>, vector<9x64xf32> -> vector<9x64xf32>
    %6 = vector.broadcast %2 : vector<1x64xf32> to vector<9x64xf32>
    %7 = arith.addf %5, %6 : vector<9x64xf32>
    %c0_5 = arith.constant 0 : index
    %c0_6 = arith.constant 0 : index
    %8 = vector.load %arg4[%c0_5, %c0_6] : memref<9x64xf32, #tpu.memory_space<vmem>>, vector<9x64xf32>
    tpu.vector_store %arg4[%c0_5, %c0_6], %7 {strides = array<i32>} : memref<9x64xf32, #tpu.memory_space<vmem>>, vector<9x64xf32>,
    return
  }
  func.func @transform_0(%arg0: i32) -> (i32, i32) {
    %c0_i32 = arith.constant 0 : i32
    %c0_i32_0 = arith.constant 0 : i32
    return %arg0, %c0_i32 : i32, i32
  }
  func.func @transform_1(%arg0: i32) -> (i32, i32) {
    %c0_i32 = arith.constant 0 : i32
    %c0_i32_0 = arith.constant 0 : i32
    %c0_i32_1 = arith.constant 0 : i32
    return %c0_i32, %c0_i32_0 : i32, i32
  }
  func.func @transform_2(%arg0: i32) -> (i32, i32) {
    %c0_i32 = arith.constant 0 : i32
    %c0_i32_0 = arith.constant 0 : i32
    %c0_i32_1 = arith.constant 0 : i32
    return %c0_i32, %c0_i32_0 : i32, i32
  }
  func.func @transform_3(%arg0: i32) -> (i32, i32) {
    %c0_i32 = arith.constant 0 : i32
    %c0_i32_0 = arith.constant 0 : i32
    return %arg0, %c0_i32 : i32, i32
  }
}

module attributes {stable_mosaic.version = 11 : i64} {
  func.func @_envelope_head_kernel(%arg0: i32, %arg1: memref<5x128xf32, #tpu.memory_space<vmem>>, %arg2: memref<128x10xf32, #tpu.memory_space<vmem>>, %arg3: memref<1x10xf32, #tpu.memory_space<vmem>>, %arg4: memref<5x2xf32, #tpu.memory_space<vmem>>, %arg5: memref<10x5xf32, #tpu.memory_space<vmem>>, %arg6: memref<5x5xf32, #tpu.memory_space<vmem>>) attributes {dimension_semantics = [#tpu.dimension_semantics<parallel>], iteration_bounds = array<i64: 1>, scalar_prefetch = 0 : i64, scratch_operands = 0 : i64, tpu.core_type = #tpu.core_type<tc>, window_params = [{transform_indices = @transform_0, window_bounds = array<i64: 5, 128>}, {pipeline_mode = #tpu.pipeline_mode<synchronous>, transform_indices = @transform_1, window_bounds = array<i64: 128, 10>}, {pipeline_mode = #tpu.pipeline_mode<synchronous>, transform_indices = @transform_2, window_bounds = array<i64: 1, 10>}, {transform_indices = @transform_3, window_bounds = array<i64: 5, 2>}, {pipeline_mode = #tpu.pipeline_mode<synchronous>, transform_indices = @transform_4, window_bounds = array<i64: 10, 5>}, {transform_indices = @transform_5, window_bounds = array<i64: 5, 5>}]} {
    %c0 = arith.constant 0 : index
    %c0_0 = arith.constant 0 : index
    %0 = vector.load %arg1[%c0, %c0_0] : memref<5x128xf32, #tpu.memory_space<vmem>>, vector<5x128xf32>
    %1 = arith.truncf %0 : vector<5x128xf32> to vector<5x128xbf16>
    %c0_1 = arith.constant 0 : index
    %c0_2 = arith.constant 0 : index
    %2 = vector.load %arg2[%c0_1, %c0_2] : memref<128x10xf32, #tpu.memory_space<vmem>>, vector<128x10xf32>
    %3 = arith.truncf %2 : vector<128x10xf32> to vector<128x10xbf16>
    %cst = arith.constant dense<0.000000e+00> : vector<5x10xf32>
    %4 = tpu.matmul %1, %3, %cst {dimension_numbers = #tpu.dot_dimension_numbers<[1], [0], [0], [1], [0, 0, 1, 1], [], []>} : vector<5x128xbf16>, vector<128x10xbf16>, vector<5x10xf32> -> vector<5x10xf32>
    %c0_3 = arith.constant 0 : index
    %c0_4 = arith.constant 0 : index
    %5 = vector.load %arg3[%c0_3, %c0_4] : memref<1x10xf32, #tpu.memory_space<vmem>>, vector<1x10xf32>
    %6 = vector.broadcast %5 : vector<1x10xf32> to vector<5x10xf32>
    %7 = arith.addf %4, %6 : vector<5x10xf32>
    %c0_5 = arith.constant 0 : index
    %c0_6 = arith.constant 0 : index
    %8 = vector.load %arg4[%c0_5, %c0_6] : memref<5x2xf32, #tpu.memory_space<vmem>>, vector<5x2xf32>
    %9 = tpu.concatenate %8, %8, %8, %8, %8 in 1 : vector<5x2xf32>, vector<5x2xf32>, vector<5x2xf32>, vector<5x2xf32>, vector<5x2xf32> -> vector<5x10xf32>
    %10 = arith.mulf %7, %9 : vector<5x10xf32>
    %c0_7 = arith.constant 0 : index
    %c0_8 = arith.constant 0 : index
    %11 = vector.load %arg5[%c0_7, %c0_8] : memref<10x5xf32, #tpu.memory_space<vmem>>, vector<10x5xf32>
    %cst_9 = arith.constant dense<0.000000e+00> : vector<5x5xf32>
    %12 = tpu.matmul %10, %11, %cst_9 {dimension_numbers = #tpu.dot_dimension_numbers<[1], [0], [0], [1], [0, 0, 1, 1], [], []>} : vector<5x10xf32>, vector<10x5xf32>, vector<5x5xf32> -> vector<5x5xf32>
    %cst_10 = arith.constant 1.000000e+02 : f32
    %13 = vector.broadcast %cst_10 : f32 to vector<5x5xf32>
    %14 = arith.mulf %12, %13 : vector<5x5xf32>
    %c0_11 = arith.constant 0 : index
    %c0_12 = arith.constant 0 : index
    %15 = vector.load %arg6[%c0_11, %c0_12] : memref<5x5xf32, #tpu.memory_space<vmem>>, vector<5x5xf32>
    tpu.vector_store %arg6[%c0_11, %c0_12], %14 {strides = array<i32>} : memref<5x5xf32, #tpu.memory_space<vmem>>, vector<5x5xf32>,
    return
  }
  func.func @transform_0(%arg0: i32) -> (i32, i32) {
    %c0_i32 = arith.constant 0 : i32
    %c0_i32_0 = arith.constant 0 : i32
    return %arg0, %c0_i32 : i32, i32
  }
  func.func @transform_1(%arg0: i32) -> (i32, i32) {
    %c0_i32 = arith.constant 0 : i32
    %c0_i32_0 = arith.constant 0 : i32
    %c0_i32_1 = arith.constant 0 : i32
    return %c0_i32, %c0_i32_0 : i32, i32
  }
  func.func @transform_2(%arg0: i32) -> (i32, i32) {
    %c0_i32 = arith.constant 0 : i32
    %c0_i32_0 = arith.constant 0 : i32
    %c0_i32_1 = arith.constant 0 : i32
    return %c0_i32, %c0_i32_0 : i32, i32
  }
  func.func @transform_3(%arg0: i32) -> (i32, i32) {
    %c0_i32 = arith.constant 0 : i32
    %c0_i32_0 = arith.constant 0 : i32
    return %arg0, %c0_i32 : i32, i32
  }
  func.func @transform_4(%arg0: i32) -> (i32, i32) {
    %c0_i32 = arith.constant 0 : i32
    %c0_i32_0 = arith.constant 0 : i32
    %c0_i32_1 = arith.constant 0 : i32
    return %c0_i32, %c0_i32_0 : i32, i32
  }
  func.func @transform_5(%arg0: i32) -> (i32, i32) {
    %c0_i32 = arith.constant 0 : i32
    %c0_i32_0 = arith.constant 0 : i32
    return %arg0, %c0_i32 : i32, i32
  }
}

module attributes {stable_mosaic.version = 11 : i64} {
  func.func @_envelope_head_kernel(%arg0: i32, %arg1: memref<4x128xf32, #tpu.memory_space<vmem>>, %arg2: memref<128x2xf32, #tpu.memory_space<vmem>>, %arg3: memref<1x2xf32, #tpu.memory_space<vmem>>, %arg4: memref<4x2xf32, #tpu.memory_space<vmem>>, %arg5: memref<2x1xf32, #tpu.memory_space<vmem>>, %arg6: memref<4x1xf32, #tpu.memory_space<vmem>>) attributes {dimension_semantics = [#tpu.dimension_semantics<parallel>], iteration_bounds = array<i64: 1>, scalar_prefetch = 0 : i64, scratch_operands = 0 : i64, tpu.core_type = #tpu.core_type<tc>, window_params = [{transform_indices = @transform_0, window_bounds = array<i64: 4, 128>}, {pipeline_mode = #tpu.pipeline_mode<synchronous>, transform_indices = @transform_1, window_bounds = array<i64: 128, 2>}, {pipeline_mode = #tpu.pipeline_mode<synchronous>, transform_indices = @transform_2, window_bounds = array<i64: 1, 2>}, {transform_indices = @transform_3, window_bounds = array<i64: 4, 2>}, {pipeline_mode = #tpu.pipeline_mode<synchronous>, transform_indices = @transform_4, window_bounds = array<i64: 2, 1>}, {transform_indices = @transform_5, window_bounds = array<i64: 4, 1>}]} {
    %c0 = arith.constant 0 : index
    %c0_0 = arith.constant 0 : index
    %0 = vector.load %arg1[%c0, %c0_0] : memref<4x128xf32, #tpu.memory_space<vmem>>, vector<4x128xf32>
    %1 = arith.truncf %0 : vector<4x128xf32> to vector<4x128xbf16>
    %c0_1 = arith.constant 0 : index
    %c0_2 = arith.constant 0 : index
    %2 = vector.load %arg2[%c0_1, %c0_2] : memref<128x2xf32, #tpu.memory_space<vmem>>, vector<128x2xf32>
    %3 = arith.truncf %2 : vector<128x2xf32> to vector<128x2xbf16>
    %cst = arith.constant dense<0.000000e+00> : vector<4x2xf32>
    %4 = tpu.matmul %1, %3, %cst {dimension_numbers = #tpu.dot_dimension_numbers<[1], [0], [0], [1], [0, 0, 1, 1], [], []>} : vector<4x128xbf16>, vector<128x2xbf16>, vector<4x2xf32> -> vector<4x2xf32>
    %c0_3 = arith.constant 0 : index
    %c0_4 = arith.constant 0 : index
    %5 = vector.load %arg3[%c0_3, %c0_4] : memref<1x2xf32, #tpu.memory_space<vmem>>, vector<1x2xf32>
    %6 = vector.broadcast %5 : vector<1x2xf32> to vector<4x2xf32>
    %7 = arith.addf %4, %6 : vector<4x2xf32>
    %c0_5 = arith.constant 0 : index
    %c0_6 = arith.constant 0 : index
    %8 = vector.load %arg4[%c0_5, %c0_6] : memref<4x2xf32, #tpu.memory_space<vmem>>, vector<4x2xf32>
    %9 = arith.mulf %7, %8 : vector<4x2xf32>
    %c0_7 = arith.constant 0 : index
    %c0_8 = arith.constant 0 : index
    %10 = vector.load %arg5[%c0_7, %c0_8] : memref<2x1xf32, #tpu.memory_space<vmem>>, vector<2x1xf32>
    %cst_9 = arith.constant dense<0.000000e+00> : vector<4x1xf32>
    %11 = tpu.matmul %9, %10, %cst_9 {dimension_numbers = #tpu.dot_dimension_numbers<[1], [0], [0], [1], [0, 0, 1, 1], [], []>} : vector<4x2xf32>, vector<2x1xf32>, vector<4x1xf32> -> vector<4x1xf32>
    %cst_10 = arith.constant 1.000000e+02 : f32
    %12 = vector.broadcast %cst_10 : f32 to vector<4x1xf32>
    %13 = arith.mulf %11, %12 : vector<4x1xf32>
    %c0_11 = arith.constant 0 : index
    %c0_12 = arith.constant 0 : index
    %14 = vector.load %arg6[%c0_11, %c0_12] : memref<4x1xf32, #tpu.memory_space<vmem>>, vector<4x1xf32>
    tpu.vector_store %arg6[%c0_11, %c0_12], %13 {strides = array<i32>} : memref<4x1xf32, #tpu.memory_space<vmem>>, vector<4x1xf32>,
    return
  }
  func.func @transform_0(%arg0: i32) -> (i32, i32) {
    %c0_i32 = arith.constant 0 : i32
    %c0_i32_0 = arith.constant 0 : i32
    return %arg0, %c0_i32 : i32, i32
  }
  func.func @transform_1(%arg0: i32) -> (i32, i32) {
    %c0_i32 = arith.constant 0 : i32
    %c0_i32_0 = arith.constant 0 : i32
    %c0_i32_1 = arith.constant 0 : i32
    return %c0_i32, %c0_i32_0 : i32, i32
  }
  func.func @transform_2(%arg0: i32) -> (i32, i32) {
    %c0_i32 = arith.constant 0 : i32
    %c0_i32_0 = arith.constant 0 : i32
    %c0_i32_1 = arith.constant 0 : i32
    return %c0_i32, %c0_i32_0 : i32, i32
  }
  func.func @transform_3(%arg0: i32) -> (i32, i32) {
    %c0_i32 = arith.constant 0 : i32
    %c0_i32_0 = arith.constant 0 : i32
    return %arg0, %c0_i32 : i32, i32
  }
  func.func @transform_4(%arg0: i32) -> (i32, i32) {
    %c0_i32 = arith.constant 0 : i32
    %c0_i32_0 = arith.constant 0 : i32
    %c0_i32_1 = arith.constant 0 : i32
    return %c0_i32, %c0_i32_0 : i32, i32
  }
  func.func @transform_5(%arg0: i32) -> (i32, i32) {
    %c0_i32 = arith.constant 0 : i32
    %c0_i32_0 = arith.constant 0 : i32
    return %arg0, %c0_i32 : i32, i32
  }
}

module attributes {stable_mosaic.version = 11 : i64} {
  func.func @_envelope_head_kernel(%arg0: i32, %arg1: memref<7x128xf32, #tpu.memory_space<vmem>>, %arg2: memref<128x14xf32, #tpu.memory_space<vmem>>, %arg3: memref<1x14xf32, #tpu.memory_space<vmem>>, %arg4: memref<7x2xf32, #tpu.memory_space<vmem>>, %arg5: memref<14x7xf32, #tpu.memory_space<vmem>>, %arg6: memref<7x7xf32, #tpu.memory_space<vmem>>) attributes {dimension_semantics = [#tpu.dimension_semantics<parallel>], iteration_bounds = array<i64: 1>, scalar_prefetch = 0 : i64, scratch_operands = 0 : i64, tpu.core_type = #tpu.core_type<tc>, window_params = [{transform_indices = @transform_0, window_bounds = array<i64: 7, 128>}, {pipeline_mode = #tpu.pipeline_mode<synchronous>, transform_indices = @transform_1, window_bounds = array<i64: 128, 14>}, {pipeline_mode = #tpu.pipeline_mode<synchronous>, transform_indices = @transform_2, window_bounds = array<i64: 1, 14>}, {transform_indices = @transform_3, window_bounds = array<i64: 7, 2>}, {pipeline_mode = #tpu.pipeline_mode<synchronous>, transform_indices = @transform_4, window_bounds = array<i64: 14, 7>}, {transform_indices = @transform_5, window_bounds = array<i64: 7, 7>}]} {
    %c0 = arith.constant 0 : index
    %c0_0 = arith.constant 0 : index
    %0 = vector.load %arg1[%c0, %c0_0] : memref<7x128xf32, #tpu.memory_space<vmem>>, vector<7x128xf32>
    %1 = arith.truncf %0 : vector<7x128xf32> to vector<7x128xbf16>
    %c0_1 = arith.constant 0 : index
    %c0_2 = arith.constant 0 : index
    %2 = vector.load %arg2[%c0_1, %c0_2] : memref<128x14xf32, #tpu.memory_space<vmem>>, vector<128x14xf32>
    %3 = arith.truncf %2 : vector<128x14xf32> to vector<128x14xbf16>
    %cst = arith.constant dense<0.000000e+00> : vector<7x14xf32>
    %4 = tpu.matmul %1, %3, %cst {dimension_numbers = #tpu.dot_dimension_numbers<[1], [0], [0], [1], [0, 0, 1, 1], [], []>} : vector<7x128xbf16>, vector<128x14xbf16>, vector<7x14xf32> -> vector<7x14xf32>
    %c0_3 = arith.constant 0 : index
    %c0_4 = arith.constant 0 : index
    %5 = vector.load %arg3[%c0_3, %c0_4] : memref<1x14xf32, #tpu.memory_space<vmem>>, vector<1x14xf32>
    %6 = vector.broadcast %5 : vector<1x14xf32> to vector<7x14xf32>
    %7 = arith.addf %4, %6 : vector<7x14xf32>
    %c0_5 = arith.constant 0 : index
    %c0_6 = arith.constant 0 : index
    %8 = vector.load %arg4[%c0_5, %c0_6] : memref<7x2xf32, #tpu.memory_space<vmem>>, vector<7x2xf32>
    %9 = tpu.concatenate %8, %8, %8, %8, %8, %8, %8 in 1 : vector<7x2xf32>, vector<7x2xf32>, vector<7x2xf32>, vector<7x2xf32>, vector<7x2xf32>, vector<7x2xf32>, vector<7x2xf32> -> vector<7x14xf32>
    %10 = arith.mulf %7, %9 : vector<7x14xf32>
    %c0_7 = arith.constant 0 : index
    %c0_8 = arith.constant 0 : index
    %11 = vector.load %arg5[%c0_7, %c0_8] : memref<14x7xf32, #tpu.memory_space<vmem>>, vector<14x7xf32>
    %cst_9 = arith.constant dense<0.000000e+00> : vector<7x7xf32>
    %12 = tpu.matmul %10, %11, %cst_9 {dimension_numbers = #tpu.dot_dimension_numbers<[1], [0], [0], [1], [0, 0, 1, 1], [], []>} : vector<7x14xf32>, vector<14x7xf32>, vector<7x7xf32> -> vector<7x7xf32>
    %cst_10 = arith.constant 1.000000e+02 : f32
    %13 = vector.broadcast %cst_10 : f32 to vector<7x7xf32>
    %14 = arith.mulf %12, %13 : vector<7x7xf32>
    %c0_11 = arith.constant 0 : index
    %c0_12 = arith.constant 0 : index
    %15 = vector.load %arg6[%c0_11, %c0_12] : memref<7x7xf32, #tpu.memory_space<vmem>>, vector<7x7xf32>
    tpu.vector_store %arg6[%c0_11, %c0_12], %14 {strides = array<i32>} : memref<7x7xf32, #tpu.memory_space<vmem>>, vector<7x7xf32>,
    return
  }
  func.func @transform_0(%arg0: i32) -> (i32, i32) {
    %c0_i32 = arith.constant 0 : i32
    %c0_i32_0 = arith.constant 0 : i32
    return %arg0, %c0_i32 : i32, i32
  }
  func.func @transform_1(%arg0: i32) -> (i32, i32) {
    %c0_i32 = arith.constant 0 : i32
    %c0_i32_0 = arith.constant 0 : i32
    %c0_i32_1 = arith.constant 0 : i32
    return %c0_i32, %c0_i32_0 : i32, i32
  }
  func.func @transform_2(%arg0: i32) -> (i32, i32) {
    %c0_i32 = arith.constant 0 : i32
    %c0_i32_0 = arith.constant 0 : i32
    %c0_i32_1 = arith.constant 0 : i32
    return %c0_i32, %c0_i32_0 : i32, i32
  }
  func.func @transform_3(%arg0: i32) -> (i32, i32) {
    %c0_i32 = arith.constant 0 : i32
    %c0_i32_0 = arith.constant 0 : i32
    return %arg0, %c0_i32 : i32, i32
  }
  func.func @transform_4(%arg0: i32) -> (i32, i32) {
    %c0_i32 = arith.constant 0 : i32
    %c0_i32_0 = arith.constant 0 : i32
    %c0_i32_1 = arith.constant 0 : i32
    return %c0_i32, %c0_i32_0 : i32, i32
  }
  func.func @transform_5(%arg0: i32) -> (i32, i32) {
    %c0_i32 = arith.constant 0 : i32
    %c0_i32_0 = arith.constant 0 : i32
    return %arg0, %c0_i32 : i32, i32
  }
}

module attributes {stable_mosaic.version = 11 : i64} {
  func.func @_envelope_head_kernel(%arg0: i32, %arg1: memref<2x192xf32, #tpu.memory_space<vmem>>, %arg2: memref<192x2xf32, #tpu.memory_space<vmem>>, %arg3: memref<1x2xf32, #tpu.memory_space<vmem>>, %arg4: memref<2x2xf32, #tpu.memory_space<vmem>>, %arg5: memref<2x1xf32, #tpu.memory_space<vmem>>, %arg6: memref<2x1xf32, #tpu.memory_space<vmem>>) attributes {dimension_semantics = [#tpu.dimension_semantics<parallel>], iteration_bounds = array<i64: 1>, scalar_prefetch = 0 : i64, scratch_operands = 0 : i64, tpu.core_type = #tpu.core_type<tc>, window_params = [{transform_indices = @transform_0, window_bounds = array<i64: 2, 192>}, {pipeline_mode = #tpu.pipeline_mode<synchronous>, transform_indices = @transform_1, window_bounds = array<i64: 192, 2>}, {pipeline_mode = #tpu.pipeline_mode<synchronous>, transform_indices = @transform_2, window_bounds = array<i64: 1, 2>}, {transform_indices = @transform_3, window_bounds = array<i64: 2, 2>}, {pipeline_mode = #tpu.pipeline_mode<synchronous>, transform_indices = @transform_4, window_bounds = array<i64: 2, 1>}, {transform_indices = @transform_5, window_bounds = array<i64: 2, 1>}]} {
    %c0 = arith.constant 0 : index
    %c0_0 = arith.constant 0 : index
    %0 = vector.load %arg1[%c0, %c0_0] : memref<2x192xf32, #tpu.memory_space<vmem>>, vector<2x192xf32>
    %1 = arith.truncf %0 : vector<2x192xf32> to vector<2x192xbf16>
    %c0_1 = arith.constant 0 : index
    %c0_2 = arith.constant 0 : index
    %2 = vector.load %arg2[%c0_1, %c0_2] : memref<192x2xf32, #tpu.memory_space<vmem>>, vector<192x2xf32>
    %3 = arith.truncf %2 : vector<192x2xf32> to vector<192x2xbf16>
    %cst = arith.constant dense<0.000000e+00> : vector<2x2xf32>
    %4 = tpu.matmul %1, %3, %cst {dimension_numbers = #tpu.dot_dimension_numbers<[1], [0], [0], [1], [0, 0, 1, 1], [], []>} : vector<2x192xbf16>, vector<192x2xbf16>, vector<2x2xf32> -> vector<2x2xf32>
    %c0_3 = arith.constant 0 : index
    %c0_4 = arith.constant 0 : index
    %5 = vector.load %arg3[%c0_3, %c0_4] : memref<1x2xf32, #tpu.memory_space<vmem>>, vector<1x2xf32>
    %6 = vector.broadcast %5 : vector<1x2xf32> to vector<2x2xf32>
    %7 = arith.addf %4, %6 : vector<2x2xf32>
    %c0_5 = arith.constant 0 : index
    %c0_6 = arith.constant 0 : index
    %8 = vector.load %arg4[%c0_5, %c0_6] : memref<2x2xf32, #tpu.memory_space<vmem>>, vector<2x2xf32>
    %9 = arith.mulf %7, %8 : vector<2x2xf32>
    %c0_7 = arith.constant 0 : index
    %c0_8 = arith.constant 0 : index
    %10 = vector.load %arg5[%c0_7, %c0_8] : memref<2x1xf32, #tpu.memory_space<vmem>>, vector<2x1xf32>
    %cst_9 = arith.constant dense<0.000000e+00> : vector<2x1xf32>
    %11 = tpu.matmul %9, %10, %cst_9 {dimension_numbers = #tpu.dot_dimension_numbers<[1], [0], [0], [1], [0, 0, 1, 1], [], []>} : vector<2x2xf32>, vector<2x1xf32>, vector<2x1xf32> -> vector<2x1xf32>
    %cst_10 = arith.constant 1.000000e+02 : f32
    %12 = vector.broadcast %cst_10 : f32 to vector<2x1xf32>
    %13 = arith.mulf %11, %12 : vector<2x1xf32>
    %c0_11 = arith.constant 0 : index
    %c0_12 = arith.constant 0 : index
    %14 = vector.load %arg6[%c0_11, %c0_12] : memref<2x1xf32, #tpu.memory_space<vmem>>, vector<2x1xf32>
    tpu.vector_store %arg6[%c0_11, %c0_12], %13 {strides = array<i32>} : memref<2x1xf32, #tpu.memory_space<vmem>>, vector<2x1xf32>,
    return
  }
  func.func @transform_0(%arg0: i32) -> (i32, i32) {
    %c0_i32 = arith.constant 0 : i32
    %c0_i32_0 = arith.constant 0 : i32
    return %arg0, %c0_i32 : i32, i32
  }
  func.func @transform_1(%arg0: i32) -> (i32, i32) {
    %c0_i32 = arith.constant 0 : i32
    %c0_i32_0 = arith.constant 0 : i32
    %c0_i32_1 = arith.constant 0 : i32
    return %c0_i32, %c0_i32_0 : i32, i32
  }
  func.func @transform_2(%arg0: i32) -> (i32, i32) {
    %c0_i32 = arith.constant 0 : i32
    %c0_i32_0 = arith.constant 0 : i32
    %c0_i32_1 = arith.constant 0 : i32
    return %c0_i32, %c0_i32_0 : i32, i32
  }
  func.func @transform_3(%arg0: i32) -> (i32, i32) {
    %c0_i32 = arith.constant 0 : i32
    %c0_i32_0 = arith.constant 0 : i32
    return %arg0, %c0_i32 : i32, i32
  }
  func.func @transform_4(%arg0: i32) -> (i32, i32) {
    %c0_i32 = arith.constant 0 : i32
    %c0_i32_0 = arith.constant 0 : i32
    %c0_i32_1 = arith.constant 0 : i32
    return %c0_i32, %c0_i32_0 : i32, i32
  }
  func.func @transform_5(%arg0: i32) -> (i32, i32) {
    %c0_i32 = arith.constant 0 : i32
    %c0_i32_0 = arith.constant 0 : i32
    return %arg0, %c0_i32 : i32, i32
  }
}

module attributes {stable_mosaic.version = 11 : i64} {
  func.func @_fused_mlp_kernel(%arg0: i32, %arg1: memref<2x192xf32, #tpu.memory_space<vmem>>, %arg2: memref<192x1xf32, #tpu.memory_space<vmem>>, %arg3: memref<1x1xf32, #tpu.memory_space<vmem>>, %arg4: memref<2x1xf32, #tpu.memory_space<vmem>>) attributes {dimension_semantics = [#tpu.dimension_semantics<parallel>], iteration_bounds = array<i64: 1>, scalar_prefetch = 0 : i64, scratch_operands = 0 : i64, tpu.core_type = #tpu.core_type<tc>, window_params = [{transform_indices = @transform_0, window_bounds = array<i64: 2, 192>}, {pipeline_mode = #tpu.pipeline_mode<synchronous>, transform_indices = @transform_1, window_bounds = array<i64: 192, 1>}, {pipeline_mode = #tpu.pipeline_mode<synchronous>, transform_indices = @transform_2, window_bounds = array<i64: 1, 1>}, {transform_indices = @transform_3, window_bounds = array<i64: 2, 1>}]} {
    %c0 = arith.constant 0 : index
    %c0_0 = arith.constant 0 : index
    %0 = vector.load %arg1[%c0, %c0_0] : memref<2x192xf32, #tpu.memory_space<vmem>>, vector<2x192xf32>
    %c0_1 = arith.constant 0 : index
    %c0_2 = arith.constant 0 : index
    %1 = vector.load %arg2[%c0_1, %c0_2] : memref<192x1xf32, #tpu.memory_space<vmem>>, vector<192x1xf32>
    %c0_3 = arith.constant 0 : index
    %c0_4 = arith.constant 0 : index
    %2 = vector.load %arg3[%c0_3, %c0_4] : memref<1x1xf32, #tpu.memory_space<vmem>>, vector<1x1xf32>
    %3 = arith.truncf %0 : vector<2x192xf32> to vector<2x192xbf16>
    %4 = arith.truncf %1 : vector<192x1xf32> to vector<192x1xbf16>
    %cst = arith.constant dense<0.000000e+00> : vector<2x1xf32>
    %5 = tpu.matmul %3, %4, %cst {dimension_numbers = #tpu.dot_dimension_numbers<[1], [0], [0], [1], [0, 0, 1, 1], [], []>} : vector<2x192xbf16>, vector<192x1xbf16>, vector<2x1xf32> -> vector<2x1xf32>
    %6 = vector.broadcast %2 : vector<1x1xf32> to vector<2x1xf32>
    %7 = arith.addf %5, %6 : vector<2x1xf32>
    %c0_5 = arith.constant 0 : index
    %c0_6 = arith.constant 0 : index
    %8 = vector.load %arg4[%c0_5, %c0_6] : memref<2x1xf32, #tpu.memory_space<vmem>>, vector<2x1xf32>
    tpu.vector_store %arg4[%c0_5, %c0_6], %7 {strides = array<i32>} : memref<2x1xf32, #tpu.memory_space<vmem>>, vector<2x1xf32>,
    return
  }
  func.func @transform_0(%arg0: i32) -> (i32, i32) {
    %c0_i32 = arith.constant 0 : i32
    %c0_i32_0 = arith.constant 0 : i32
    return %arg0, %c0_i32 : i32, i32
  }
  func.func @transform_1(%arg0: i32) -> (i32, i32) {
    %c0_i32 = arith.constant 0 : i32
    %c0_i32_0 = arith.constant 0 : i32
    %c0_i32_1 = arith.constant 0 : i32
    return %c0_i32, %c0_i32_0 : i32, i32
  }
  func.func @transform_2(%arg0: i32) -> (i32, i32) {
    %c0_i32 = arith.constant 0 : i32
    %c0_i32_0 = arith.constant 0 : i32
    %c0_i32_1 = arith.constant 0 : i32
    return %c0_i32, %c0_i32_0 : i32, i32
  }
  func.func @transform_3(%arg0: i32) -> (i32, i32) {
    %c0_i32 = arith.constant 0 : i32
    %c0_i32_0 = arith.constant 0 : i32
    return %arg0, %c0_i32 : i32, i32
  }
}

</mosaic_0001>

<bundles_post_ra>
// kernel: envelope_ql_forward.19
= control target key start
LH: loop header
LB: loop body
LE: loop exit
PB: predicated region body
PF: predicated region fallthrough
CT: control target
= control target key end

     0   :  { %12 = vsyncpa [#allocation3], 0  ;;  %s319_s0 = inlined_call_operand.vmem [shape: f32[10,4], index: 0, kind: input, shape index: {}]   ;;  %s320_s1 = inlined_call_operand.vmem [shape: f32[4,64], index: 1, kind: input, shape index: {}]   ;;  %s321_s2 = inlined_call_operand.vmem [shape: f32[1,64], index: 2, kind: input, shape index: {}]   ;;  %s322_s3 = inlined_call_operand.hbm [shape: f32[64,64], index: 3, kind: input, shape index: {}]   ;;  %s323_s4 = inlined_call_operand.vmem [shape: f32[1,64], index: 4, kind: input, shape index: {}]   ;;  %s324_s5 = inlined_call_operand.hbm [shape: f32[64,64], index: 5, kind: input, shape index: {}]   ;;  %s325_s6 = inlined_call_operand.vmem [shape: f32[1,64], index: 6, kind: input, shape index: {}]   ;;  %s326_s7 = inlined_call_operand.vmem [shape: f32[10,64], index: 7, kind: output, shape index: {}]  }
   0x1   :  { %s24_s26 = sshll.u32 %s322_s3, 4  ;;  %s25_s26 = int_to_ptr.hbm [resolvable:$true] %s24_s26 }
   0x2   :  { %13 = vsyncpa [#allocation5], 0  ;;  %s242_s27 = smov [#allocation2]   ;;  %s39_s8 = sshll.u32 %s324_s5, 4  ;;  %s40_s8 = int_to_ptr.hbm [resolvable:$true] %s39_s8 }
   0x3   :  { %s26_s28 = sshll.u32 %s242_s27, 4  ;;  %s243_s9 = smov 128   ;;  %s27_s28 = int_to_ptr.vmem [resolvable:$true] %s26_s28 }
   0x4   :  { %s244_s10 = smov 8   ;;  %s245_s11 = smov [#allocation4]  }
   0x5   :  { %32 = dma.hbm_to_vmem [thread:$0]  %s25_s26, 1024, %s27_s28, [#allocation3], %s243_s9, %s243_s9, %s244_s10  }
   0x6   :  { %s41_s12 = sshll.u32 %s245_s11, 4  ;;  %s42_s12 = int_to_ptr.vmem [resolvable:$true] %s41_s12 }
   0x7   :  { %47 = dma.hbm_to_vmem [thread:$0]  %s40_s8, 1024, %s42_s12, [#allocation5], %s243_s9, %s243_s9, %s244_s10  }
   0x8   :  { %238 = dma.done.wait [#allocation3], 1024  }
   0x9   :  { %239 = vsyncadd [#allocation3], 4294966272 }
   0xa   :  { %240 = dma.done.wait [#allocation5], 1024  }
   0xb   :  { %241 = vsyncadd [#allocation5], 4294966272  ;;  %v61_v0 = vld [vmem:[%s320_s1] sm:$0xf]  ;;  %vm72_vm0 = vcmask 1041408   ;;  %vm68_vm1 = vcmask 31744  }
   0xc   :  { %v59_v1 = vld [vmem:[%s319_s0] sm:$0xff]  ;;  %v60_v2 = vld [vmem:[%s319_s0 + $0x8] sm:$0x3]  ;;  %v64_v3 = vpack.c.bf16 %v61_v0, %v61_v0  ;;  %v102_v6 = vld [vmem:[#allocation2 + $0x30] sm:$0xff]  ;;  %vm113_vm4 = vcmask 523264   ;;  %vm172_vm7 = vcmask 517120  }
   0xd   :  { %v63_v5 = vpack.c.bf16 %v60_v2, %v59_v1  ;;  %v103_v7 = vld [vmem:[#allocation2 + $0x38] sm:$0xff]  ;;  %v100_v9 = vld [vmem:[#allocation2 + $0x20] sm:$0xff]  ;;  %v101_v10 = vld [vmem:[#allocation2 + $0x28] sm:$0xff] }
   0xe   :  { %v74_v4 = vsel %vm72_vm0, %v64_v3, 0  ;;  %v109_v8 = vpack.c.bf16 %v103_v7, %v102_v6  ;;  %v108_v11 = vpack.c.bf16 %v101_v10, %v100_v9  ;;  %v98_v12 = vld [vmem:[#allocation2 + $0x10] sm:$0xff]  ;;  %v99_v13 = vld [vmem:[#allocation2 + $0x18] sm:$0xff]  ;;  %v96_v15 = vld [vmem:[#allocation2] sm:$0xff] }
   0xf   :  { %83 = vmatpush.bf16.msra.mxu0 %v74_v4  ;;  %v107_v14 = vpack.c.bf16 %v99_v13, %v98_v12  ;;  %v97_v16 = vld [vmem:[#allocation2 + $0x8] sm:$0xff]  ;;  %v187_v19 = vld [vmem:[%s321_s2] ss:$0 sm:$0xff]  ;;  %v143_v28 = vld [vmem:[#allocation4 + $0x30] sm:$0xff] }
  0x10   :  { %121 = vmatpush.bf16.msra.mxu1 %v109_v8  ;;  %v106_v17 = vpack.c.bf16 %v97_v16, %v96_v15  ;;  %v144_v29 = vld [vmem:[#allocation4 + $0x38] sm:$0xff]  ;;  %v141_v31 = vld [vmem:[#allocation4 + $0x20] sm:$0xff]  ;;  %v142_v32 = vld [vmem:[#allocation4 + $0x28] sm:$0xff] }
  0x11   :  { %v150_v30 = vpack.c.bf16 %v144_v29, %v143_v28  ;;  %v149_v33 = vpack.c.bf16 %v142_v32, %v141_v31  ;;  %v139_v34 = vld [vmem:[#allocation4 + $0x10] sm:$0xff]  ;;  %v140_v35 = vld [vmem:[#allocation4 + $0x18] sm:$0xff]  ;;  %v137_v37 = vld [vmem:[#allocation4] sm:$0xff] }
  0x12   :  { %180 = vmatmul.msk.bf16.vlgmr.msra.gmra.mxu0 %vm68_vm1, %v63_v5  ;;  %v148_v36 = vpack.c.bf16 %v140_v35, %v139_v34  ;;  %v138_v38 = vld [vmem:[#allocation4 + $0x8] sm:$0xff]  ;;  %v188_v41 = vld [vmem:[%s323_s4] ss:$0 sm:$0xff] }
  0x13   :  { %161 = vmatpush.bf16.msra.mxu2 %v150_v30  ;;  %v147_v39 = vpack.c.bf16 %v138_v38, %v137_v37  ;;  %v189_v50 = vld [vmem:[%s325_s6] ss:$0 sm:$0xff] }
  0x14   :  { %122 = vmatpush.bf16.msra.mxu1 %v108_v11 }
  0x17   :  { %162 = vmatpush.bf16.msra.mxu2 %v149_v33 }
  0x18   :  { %123 = vmatpush.bf16.msra.mxu1 %v107_v14 }
  0x1b   :  { %163 = vmatpush.bf16.msra.mxu2 %v148_v36 }
  0x1c   :  { %124 = vmatpush.bf16.msra.mxu1 %v106_v17 }
  0x1f   :  { %164 = vmatpush.bf16.msra.mxu2 %v147_v39 }
  0x8f   :  { %v85_v18 = vpop.f32.mrf.mxu0 }
  0x90   :  { %v86_v20 = vadd.f32 %v187_v19, %v85_v18 }
  0x92   :  { %v92_v22 = vmul.f32 0.01, %v86_v20  ;;  %vm90_vm2 = vcmp.gt.f32.partialorder %v86_v20, 0.0 }
  0x94   :  { %v94_v25 = vsel %vm90_vm2, %v86_v20, %v92_v22 }
  0x97   :  { %v87_v21 = vpop.f32.mrf.mxu0 }
  0x98   :  { %v88_v23 = vadd.f32 %v187_v19, %v87_v21 }
  0x9a   :  { %vm91_vm3 = vcmp.gt.f32.partialorder %v88_v23, 0.0  ;;  %v93_v24 = vmul.f32 0.01, %v88_v23 }
  0x9c   :  { %v95_v26 = vsel %vm91_vm3, %v88_v23, %v93_v24 }
  0x9d   :  { %v105_v27 = vpack.c.bf16 %v95_v26, %v94_v25 }
  0x9f   :  { %181 = vmatmul.msk.bf16.vlgmr.msra.gmra.mxu1 %vm113_vm4, %v105_v27 }
 0x11c   :  { %v126_v40 = vpop.f32.mrf.mxu1 }
 0x11d   :  { %v127_v42 = vadd.f32 %v188_v41, %v126_v40 }
 0x11f   :  { %v133_v44 = vmul.f32 0.01, %v127_v42  ;;  %vm131_vm5 = vcmp.gt.f32.partialorder %v127_v42, 0.0 }
 0x121   :  { %v135_v47 = vsel %vm131_vm5, %v127_v42, %v133_v44 }
 0x124   :  { %v128_v43 = vpop.f32.mrf.mxu1 }
 0x125   :  { %v129_v45 = vadd.f32 %v188_v41, %v128_v43 }
 0x127   :  { %vm132_vm6 = vcmp.gt.f32.partialorder %v129_v45, 0.0  ;;  %v134_v46 = vmul.f32 0.01, %v129_v45 }
 0x129   :  { %v136_v48 = vsel %vm132_vm6, %v129_v45, %v134_v46 }
 0x12a   :  { %v146_v49 = vpack.c.bf16 %v136_v48, %v135_v47 }
 0x12c   :  { %182 = vmatmul.msk.bf16.vlgmr.msra.gmra.mxu2 %vm113_vm4, %v146_v49 }
 0x1af   :  { %v166_v51 = vpop.f32.mrf.mxu2 }
 0x1b0   :  { %v167_v52 = vadd.f32 %v189_v50, %v166_v51 }
 0x1b2   :  { %171 = vst.msk [vmem:[%s326_s7] sm:$0xff] %vm113_vm4, %v167_v52 }
 0x1b7   :  { %v168_v53 = vpop.f32.mrf.mxu2 }
 0x1b8   :  { %v169_v54 = vadd.f32 %v189_v50, %v168_v53 }
 0x1ba   :  { %173 = vst.msk [vmem:[%s326_s7 + $0x8] sm:$0x3] %vm172_vm7, %v169_v54 }
 0x1bb   :  { %178 = vsyncpa [#allocation3], 1 }
 0x1bc   :  { %179 = vsyncpa [#allocation5], 1 }

// kernel: envelope_ql_forward.20
= control target key start
LH: loop header
LB: loop body
LE: loop exit
PB: predicated region body
PF: predicated region fallthrough
CT: control target
= control target key end

     0   :  { %12 = vsyncpa [#allocation3], 0  ;;  %s301_s0 = inlined_call_operand.vmem [shape: f32[2,6], index: 0, kind: input, shape index: {}]   ;;  %s302_s1 = inlined_call_operand.vmem [shape: f32[6,64], index: 1, kind: input, shape index: {}]   ;;  %s303_s2 = inlined_call_operand.vmem [shape: f32[1,64], index: 2, kind: input, shape index: {}]   ;;  %s304_s3 = inlined_call_operand.hbm [shape: f32[64,64], index: 3, kind: input, shape index: {}]   ;;  %s305_s4 = inlined_call_operand.vmem [shape: f32[1,64], index: 4, kind: input, shape index: {}]   ;;  %s306_s5 = inlined_call_operand.hbm [shape: f32[64,64], index: 5, kind: input, shape index: {}]   ;;  %s307_s6 = inlined_call_operand.vmem [shape: f32[1,64], index: 6, kind: input, shape index: {}]   ;;  %s308_s7 = inlined_call_operand.vmem [shape: f32[2,64], index: 7, kind: output, shape index: {}]  }
   0x1   :  { %s24_s26 = sshll.u32 %s304_s3, 4  ;;  %s25_s26 = int_to_ptr.hbm [resolvable:$true] %s24_s26 }
   0x2   :  { %13 = vsyncpa [#allocation5], 0  ;;  %s231_s27 = smov [#allocation2]   ;;  %s39_s8 = sshll.u32 %s306_s5, 4  ;;  %s40_s8 = int_to_ptr.hbm [resolvable:$true] %s39_s8 }
   0x3   :  { %s26_s28 = sshll.u32 %s231_s27, 4  ;;  %s232_s9 = smov 128   ;;  %s27_s28 = int_to_ptr.vmem [resolvable:$true] %s26_s28 }
   0x4   :  { %s233_s10 = smov 8   ;;  %s234_s11 = smov [#allocation4]  }
   0x5   :  { %32 = dma.hbm_to_vmem [thread:$0]  %s25_s26, 1024, %s27_s28, [#allocation3], %s232_s9, %s232_s9, %s233_s10  }
   0x6   :  { %s41_s12 = sshll.u32 %s234_s11, 4  ;;  %s42_s12 = int_to_ptr.vmem [resolvable:$true] %s41_s12 }
   0x7   :  { %47 = dma.hbm_to_vmem [thread:$0]  %s40_s8, 1024, %s42_s12, [#allocation5], %s232_s9, %s232_s9, %s233_s10  }
   0x8   :  { %227 = dma.done.wait [#allocation3], 1024  }
   0x9   :  { %228 = vsyncadd [#allocation3], 4294966272 }
   0xa   :  { %229 = dma.done.wait [#allocation5], 1024  }
   0xb   :  { %230 = vsyncadd [#allocation5], 4294966272  ;;  %v60_v0 = vld [vmem:[%s302_s1] sm:$0x3f]  ;;  %vm71_vm0 = vcmask 1042432   ;;  %v97_v2 = vld [vmem:[#allocation2 + $0x30] sm:$0xff] }
   0xc   :  { %v59_v1 = vld [vmem:[%s301_s0] sm:$0x3]  ;;  %v63_v3 = vpack.c.bf16 %v60_v0, %v60_v0  ;;  %v98_v4 = vld [vmem:[#allocation2 + $0x38] sm:$0xff]  ;;  %v96_v6 = vld [vmem:[#allocation2 + $0x28] sm:$0xff]  ;;  %vm67_vm1 = vcmask 48128   ;;  %vm108_vm3 = vcmask 523264  }
   0xd   :  { %v95_v5 = vld [vmem:[#allocation2 + $0x20] sm:$0xff]  ;;  %v104_v7 = vpack.c.bf16 %v98_v4, %v97_v2  ;;  %v62_v9 = vpack.c.bf16 %v59_v1, %v59_v1  ;;  %v93_v11 = vld [vmem:[#allocation2 + $0x10] sm:$0xff]  ;;  %v94_v12 = vld [vmem:[#allocation2 + $0x18] sm:$0xff]  ;;  %vm161_vm5 = vcmask 517120  }
   0xe   :  { %v73_v8 = vsel %vm71_vm0, %v63_v3, 0  ;;  %v103_v10 = vpack.c.bf16 %v96_v6, %v95_v5  ;;  %v102_v13 = vpack.c.bf16 %v94_v12, %v93_v11  ;;  %v91_v14 = vld [vmem:[#allocation2] sm:$0xff]  ;;  %v92_v15 = vld [vmem:[#allocation2 + $0x8] sm:$0xff]  ;;  %v134_v17 = vld [vmem:[#allocation4 + $0x30] sm:$0xff] }
   0xf   :  { %82 = vmatpush.bf16.msra.mxu0 %v73_v8  ;;  %116 = vmatpush.bf16.msra.mxu1 %v104_v7  ;;  %v101_v16 = vpack.c.bf16 %v92_v15, %v91_v14  ;;  %v135_v18 = vld [vmem:[#allocation4 + $0x38] sm:$0xff]  ;;  %v132_v19 = vld [vmem:[#allocation4 + $0x20] sm:$0xff]  ;;  %v133_v21 = vld [vmem:[#allocation4 + $0x28] sm:$0xff] }
  0x10   :  { %v141_v20 = vpack.c.bf16 %v135_v18, %v134_v17  ;;  %v140_v22 = vpack.c.bf16 %v133_v21, %v132_v19  ;;  %v176_v23 = vld [vmem:[%s303_s2] ss:$0 sm:$0xff]  ;;  %v130_v30 = vld [vmem:[#allocation4 + $0x10] sm:$0xff]  ;;  %v131_v31 = vld [vmem:[#allocation4 + $0x18] sm:$0xff] }
  0x11   :  { %v139_v32 = vpack.c.bf16 %v131_v31, %v130_v30  ;;  %v128_v33 = vld [vmem:[#allocation4] sm:$0xff]  ;;  %v129_v34 = vld [vmem:[#allocation4 + $0x8] sm:$0xff] }
  0x12   :  { %169 = vmatmul.msk.bf16.vlgmr.msra.gmra.mxu0 %vm67_vm1, %v62_v9  ;;  %152 = vmatpush.bf16.msra.mxu2 %v141_v20  ;;  %v138_v35 = vpack.c.bf16 %v129_v34, %v128_v33  ;;  %v177_v36 = vld [vmem:[%s305_s4] ss:$0 sm:$0xff] }
  0x13   :  { %117 = vmatpush.bf16.msra.mxu1 %v103_v10  ;;  %v178_v43 = vld [vmem:[%s307_s6] ss:$0 sm:$0xff] }
  0x16   :  { %153 = vmatpush.bf16.msra.mxu2 %v140_v22 }
  0x17   :  { %118 = vmatpush.bf16.msra.mxu1 %v102_v13 }
  0x1a   :  { %154 = vmatpush.bf16.msra.mxu2 %v139_v32 }
  0x1b   :  { %119 = vmatpush.bf16.msra.mxu1 %v101_v16 }
  0x1e   :  { %155 = vmatpush.bf16.msra.mxu2 %v138_v35 }
  0x8f   :  { %v84_v24 = vpop.f32.mrf.mxu0 }
  0x90   :  { %v85_v25 = vadd.f32 %v176_v23, %v84_v24 }
  0x92   :  { %vm88_vm2 = vcmp.gt.f32.partialorder %v85_v25, 0.0  ;;  %v89_v26 = vmul.f32 0.01, %v85_v25 }
  0x94   :  { %v90_v27 = vsel %vm88_vm2, %v85_v25, %v89_v26 }
  0x95   :  { %v100_v28 = vpack.c.bf16 %v90_v27, %v90_v27 }
  0x97   :  { %v86_v29 = vpop.f32.mrf.mxu0  ;;  %170 = vmatmul.msk.bf16.vlgmr.msra.gmra.mxu1 %vm108_vm3, %v100_v28 }
 0x114   :  { %v121_v37 = vpop.f32.mrf.mxu1 }
 0x115   :  { %v122_v38 = vadd.f32 %v177_v36, %v121_v37 }
 0x117   :  { %vm125_vm4 = vcmp.gt.f32.partialorder %v122_v38, 0.0  ;;  %v126_v39 = vmul.f32 0.01, %v122_v38 }
 0x119   :  { %v127_v40 = vsel %vm125_vm4, %v122_v38, %v126_v39 }
 0x11a   :  { %v137_v41 = vpack.c.bf16 %v127_v40, %v127_v40 }
 0x11c   :  { %v123_v42 = vpop.f32.mrf.mxu1  ;;  %171 = vmatmul.msk.bf16.vlgmr.msra.gmra.mxu2 %vm108_vm3, %v137_v41 }
 0x19f   :  { %v157_v44 = vpop.f32.mrf.mxu2 }
 0x1a0   :  { %v158_v45 = vadd.f32 %v178_v43, %v157_v44 }
 0x1a2   :  { %162 = vst.msk [vmem:[%s308_s7] sm:$0x3] %vm161_vm5, %v158_v45 }
 0x1a7   :  { %v159_v46 = vpop.f32.mrf.mxu2 }
 0x1a8   :  { %167 = vsyncpa [#allocation3], 1 }
 0x1a9   :  { %168 = vsyncpa [#allocation5], 1 }

// kernel: envelope_ql_forward.18
= control target key start
LH: loop header
LB: loop body
LE: loop exit
PB: predicated region body
PF: predicated region fallthrough
CT: control target
= control target key end

     0   :  { %12 = vsyncpa [#allocation3], 0  ;;  %s388_s0 = inlined_call_operand.vmem [shape: f32[7,5], index: 0, kind: input, shape index: {}]   ;;  %s389_s1 = inlined_call_operand.vmem [shape: f32[5,64], index: 1, kind: input, shape index: {}]   ;;  %s390_s2 = inlined_call_operand.vmem [shape: f32[1,64], index: 2, kind: input, shape index: {}]   ;;  %s391_s3 = inlined_call_operand.hbm [shape: f32[64,64], index: 3, kind: input, shape index: {}]   ;;  %s392_s4 = inlined_call_operand.hbm [shape: f32[1,64], index: 4, kind: input, shape index: {}]   ;;  %s393_s5 = inlined_call_operand.hbm [shape: f32[64,64], index: 5, kind: input, shape index: {}]   ;;  %s394_s6 = inlined_call_operand.hbm [shape: f32[1,64], index: 6, kind: input, shape index: {}]   ;;  %s395_s7 = inlined_call_operand.vmem [shape: f32[7,64], index: 7, kind: output, shape index: {}]  }
   0x1   :  { %13 = vsyncpa [#allocation5], 0  ;;  %s39_s26 = sshll.u32 %s392_s4, 4  ;;  %s40_s26 = int_to_ptr.hbm [resolvable:$true] %s39_s26 }
   0x2   :  { %14 = vsyncpa [#allocation8], 0  ;;  %s315_s27 = smov [#allocation4]   ;;  %s25_s8 = sshll.u32 %s391_s3, 4  ;;  %s26_s8 = int_to_ptr.hbm [resolvable:$true] %s25_s8 }
   0x3   :  { %s41_s28 = sshll.u32 %s315_s27, 4  ;;  %s316_s9 = smov [#allocation2]   ;;  %s42_s28 = int_to_ptr.vmem [resolvable:$true] %s41_s28 }
   0x4   :  { %44 = dma.hbm_to_vmem [thread:$0]  %s40_s26, 16, %s42_s28, [#allocation5]  }
   0x5   :  { %s27_s10 = sshll.u32 %s316_s9, 4  ;;  %s317_s11 = smov 128   ;;  %s28_s10 = int_to_ptr.vmem [resolvable:$true] %s27_s10 }
   0x6   :  { %s318_s12 = smov 8   ;;  %s49_s4 = sshll.u32 %s393_s5, 4  ;;  %s50_s4 = int_to_ptr.hbm [resolvable:$true] %s49_s4 }
   0x7   :  { %33 = dma.hbm_to_vmem [thread:$0]  %s26_s8, 1024, %s28_s10, [#allocation3], %s317_s11, %s317_s11, %s318_s12  }
   0x8   :  { %s319_s15 = smov [#allocation6]   ;;  %s63_s3 = sshll.u32 %s394_s6, 4  ;;  %s64_s3 = int_to_ptr.hbm [resolvable:$true] %s63_s3 }
   0x9   :  { %s51_s16 = sshll.u32 %s319_s15, 4  ;;  %s320_s19 = smov [#allocation7]   ;;  %s52_s16 = int_to_ptr.vmem [resolvable:$true] %s51_s16 }
   0xa   :  { %57 = dma.hbm_to_vmem [thread:$0]  %s50_s4, 1024, %s52_s16, [#allocation5], %s317_s11, %s317_s11, %s318_s12  }
   0xb   :  { %s65_s20 = sshll.u32 %s320_s19, 4  ;;  %s66_s20 = int_to_ptr.vmem [resolvable:$true] %s65_s20 }
   0xc   :  { %68 = dma.hbm_to_vmem [thread:$0]  %s64_s3, 16, %s66_s20, [#allocation8]  }
   0xd   :  { %309 = dma.done.wait [#allocation3], 1024  }
   0xe   :  { %310 = vsyncadd [#allocation3], 4294966272 }
   0xf   :  { %311 = dma.done.wait [#allocation5], 1040  }
  0x10   :  { %312 = vsyncadd [#allocation5], 4294966256 }
  0x11   :  { %313 = dma.done.wait [#allocation8], 16  }
  0x12   :  { %314 = vsyncadd [#allocation8], 4294967280  ;;  %vm98_vm0 = vcmask 1041408   ;;  %vm99_vm1 = vcmask 1042432   ;;  %v321_v0 = vmov 65535   ;;  %v127_v5 = vld [vmem:[#allocation2 + $0x30] sm:$0xff] }
  0x13   :  { %v100_v1 = vsel %vm98_vm0, 4294967295, %v321_v0  ;;  %v87_v2 = vld [vmem:[%s389_s1] sm:$0x1f]  ;;  %v128_v7 = vld [vmem:[#allocation2 + $0x38] sm:$0xff]  ;;  %v126_v9 = vld [vmem:[#allocation2 + $0x28] sm:$0xff]  ;;  %vm94_vm2 = vcmask 39936  }
  0x14   :  { %v101_v3 = vsel %vm99_vm1, %v100_v1, 0  ;;  %v86_v4 = vld [vmem:[%s388_s0] sm:$0x7f]  ;;  %v90_v6 = vpack.c.bf16 %v87_v2, %v87_v2  ;;  %v134_v10 = vpack.c.bf16 %v128_v7, %v127_v5  ;;  %v123_v14 = vld [vmem:[#allocation2 + $0x10] sm:$0xff]  ;;  %v124_v15 = vld [vmem:[#allocation2 + $0x18] sm:$0xff]  ;;  %vm138_vm4 = vcmask 523264  }
  0x15   :  { %v125_v8 = vld [vmem:[#allocation2 + $0x20] sm:$0xff]  ;;  %v89_v12 = vpack.c.bf16 %v86_v4, %v86_v4  ;;  %v132_v16 = vpack.c.bf16 %v124_v15, %v123_v14  ;;  %v122_v18 = vld [vmem:[#allocation2 + $0x8] sm:$0xff]  ;;  %v164_v20 = vld [vmem:[#allocation6 + $0x30] sm:$0xff]  ;;  %vm191_vm6 = vcmask 522240  }
  0x16   :  { %v103_v11 = vand.u32 %v101_v3, %v90_v6  ;;  %146 = vmatpush.bf16.msra.mxu1 %v134_v10  ;;  %v133_v13 = vpack.c.bf16 %v126_v9, %v125_v8  ;;  %v121_v17 = vld [vmem:[#allocation2] sm:$0xff]  ;;  %v163_v24 = vld [vmem:[#allocation6 + $0x28] sm:$0xff]  ;;  %v160_v33 = vld [vmem:[#allocation6 + $0x10] sm:$0xff] }
  0x17   :  { %v131_v19 = vpack.c.bf16 %v122_v18, %v121_v17  ;;  %v165_v21 = vld [vmem:[#allocation6 + $0x38] sm:$0xff]  ;;  %v162_v22 = vld [vmem:[#allocation6 + $0x20] sm:$0xff]  ;;  %v159_v37 = vld [vmem:[#allocation6 + $0x8] sm:$0xff] }
  0x18   :  { %112 = vmatpush.bf16.msra.mxu0 %v103_v11  ;;  %v171_v23 = vpack.c.bf16 %v165_v21, %v164_v20  ;;  %v170_v25 = vpack.c.bf16 %v163_v24, %v162_v22  ;;  %v210_v26 = vld [vmem:[%s390_s2] ss:$0 sm:$0xff]  ;;  %v158_v36 = vld [vmem:[#allocation6] sm:$0xff] }
  0x19   :  { %v161_v34 = vld [vmem:[#allocation6 + $0x18] sm:$0xff]  ;;  %v168_v38 = vpack.c.bf16 %v159_v37, %v158_v36  ;;  %v212_v46 = vld [vmem:[#allocation7] ss:$0 sm:$0xff] }
  0x1a   :  { %147 = vmatpush.bf16.msra.mxu1 %v133_v13  ;;  %182 = vmatpush.bf16.msra.mxu2 %v171_v23  ;;  %v169_v35 = vpack.c.bf16 %v161_v34, %v160_v33  ;;  %v211_v39 = vld [vmem:[#allocation4] ss:$0 sm:$0xff] }
  0x1b   :  { %200 = vmatmul.msk.bf16.vlgmr.msra.gmra.mxu0 %vm94_vm2, %v89_v12 }
  0x1e   :  { %148 = vmatpush.bf16.msra.mxu1 %v132_v16  ;;  %183 = vmatpush.bf16.msra.mxu2 %v170_v25 }
  0x22   :  { %149 = vmatpush.bf16.msra.mxu1 %v131_v19  ;;  %184 = vmatpush.bf16.msra.mxu2 %v169_v35 }
  0x26   :  { %185 = vmatpush.bf16.msra.mxu2 %v168_v38 }
  0x98   :  { %v114_v27 = vpop.f32.mrf.mxu0 }
  0x99   :  { %v115_v28 = vadd.f32 %v210_v26, %v114_v27 }
  0x9b   :  { %vm118_vm3 = vcmp.gt.f32.partialorder %v115_v28, 0.0  ;;  %v119_v29 = vmul.f32 0.01, %v115_v28 }
  0x9d   :  { %v120_v30 = vsel %vm118_vm3, %v115_v28, %v119_v29 }
  0x9e   :  { %v130_v31 = vpack.c.bf16 %v120_v30, %v120_v30 }
  0xa0   :  { %v116_v32 = vpop.f32.mrf.mxu0  ;;  %201 = vmatmul.msk.bf16.vlgmr.msra.gmra.mxu1 %vm138_vm4, %v130_v31 }
 0x11d   :  { %v151_v40 = vpop.f32.mrf.mxu1 }
 0x11e   :  { %v152_v41 = vadd.f32 %v211_v39, %v151_v40 }
 0x120   :  { %vm155_vm5 = vcmp.gt.f32.partialorder %v152_v41, 0.0  ;;  %v156_v42 = vmul.f32 0.01, %v152_v41 }
 0x122   :  { %v157_v43 = vsel %vm155_vm5, %v152_v41, %v156_v42 }
 0x123   :  { %v167_v44 = vpack.c.bf16 %v157_v43, %v157_v43 }
 0x125   :  { %v153_v45 = vpop.f32.mrf.mxu1  ;;  %202 = vmatmul.msk.bf16.vlgmr.msra.gmra.mxu2 %vm138_vm4, %v167_v44 }
 0x1a8   :  { %v187_v47 = vpop.f32.mrf.mxu2 }
 0x1a9   :  { %v188_v48 = vadd.f32 %v212_v46, %v187_v47 }
 0x1ab   :  { %192 = vst.msk [vmem:[%s395_s7] sm:$0x7f] %vm191_vm6, %v188_v48 }
 0x1b0   :  { %v189_v49 = vpop.f32.mrf.mxu2 }
 0x1b1   :  { %197 = vsyncpa [#allocation3], 1 }
 0x1b2   :  { %198 = vsyncpa [#allocation5], 1 }
 0x1b3   :  { %199 = vsyncpa [#allocation8], 1 }

// kernel: envelope_ql_forward.21
= control target key start
LH: loop header
LB: loop body
LE: loop exit
PB: predicated region body
PF: predicated region fallthrough
CT: control target
= control target key end

     0   :  { %8 = vsyncpa [#allocation3], 0  ;;  %s107_s15 = smov [#allocation2]   ;;  %s108_s17 = smov 128   ;;  %s148_s0 = inlined_call_operand.vmem [shape: f32[9,64], index: 0, kind: input, shape index: {}]   ;;  %s149_s1 = inlined_call_operand.hbm [shape: f32[64,64], index: 1, kind: input, shape index: {}]   ;;  %s150_s2 = inlined_call_operand.vmem [shape: f32[1,64], index: 2, kind: input, shape index: {}]   ;;  %s151_s3 = inlined_call_operand.vmem [shape: f32[9,64], index: 3, kind: output, shape index: {}]  }
   0x1   :  { %s15_s14 = sshll.u32 %s149_s1, 4  ;;  %s17_s16 = sshll.u32 %s107_s15, 4  ;;  %s16_s14 = int_to_ptr.hbm [resolvable:$true] %s15_s14  ;;  %s18_s16 = int_to_ptr.vmem [resolvable:$true] %s17_s16 }
   0x2   :  { %s109_s18 = smov 8  }
   0x3   :  { %23 = dma.hbm_to_vmem [thread:$0]  %s16_s14, 1024, %s18_s16, [#allocation3], %s108_s17, %s108_s17, %s109_s18  }
   0x4   :  { %105 = dma.done.wait [#allocation3], 1024  }
   0x5   :  { %106 = vsyncadd [#allocation3], 4294966272  ;;  %v39_v0 = vld [vmem:[#allocation2 + $0x30] sm:$0xff]  ;;  %v40_v1 = vld [vmem:[#allocation2 + $0x38] sm:$0xff]  ;;  %vm50_vm0 = vcmask 523264   ;;  %vm69_vm1 = vcmask 516096  }
   0x6   :  { %v37_v2 = vld [vmem:[#allocation2 + $0x20] sm:$0xff]  ;;  %v46_v3 = vpack.c.bf16 %v40_v1, %v39_v0  ;;  %v38_v4 = vld [vmem:[#allocation2 + $0x28] sm:$0xff]  ;;  %v35_v6 = vld [vmem:[#allocation2 + $0x10] sm:$0xff] }
   0x7   :  { %v45_v5 = vpack.c.bf16 %v38_v4, %v37_v2  ;;  %v36_v7 = vld [vmem:[#allocation2 + $0x18] sm:$0xff]  ;;  %v33_v9 = vld [vmem:[#allocation2] sm:$0xff]  ;;  %v34_v10 = vld [vmem:[#allocation2 + $0x8] sm:$0xff] }
   0x8   :  { %58 = vmatpush.bf16.msra.mxu0 %v46_v3  ;;  %v44_v8 = vpack.c.bf16 %v36_v7, %v35_v6  ;;  %v43_v11 = vpack.c.bf16 %v34_v10, %v33_v9  ;;  %v31_v12 = vld [vmem:[%s148_s0] sm:$0xff]  ;;  %v32_v13 = vld [vmem:[%s148_s0 + $0x8] sm:$0x1] }
   0x9   :  { %v42_v14 = vpack.c.bf16 %v32_v13, %v31_v12  ;;  %v80_v15 = vld [vmem:[%s150_s2] ss:$0 sm:$0xff] }
   0xc   :  { %59 = vmatpush.bf16.msra.mxu0 %v45_v5 }
  0x10   :  { %60 = vmatpush.bf16.msra.mxu0 %v44_v8 }
  0x14   :  { %61 = vmatpush.bf16.msra.mxu0 %v43_v11 }
  0x17   :  { %76 = vmatmul.msk.bf16.vlgmr.msra.gmra.mxu0 %vm50_vm0, %v42_v14 }
  0x94   :  { %v63_v16 = vpop.f32.mrf.mxu0 }
  0x95   :  { %v64_v17 = vadd.f32 %v80_v15, %v63_v16 }
  0x97   :  { %68 = vst.msk [vmem:[%s151_s3] sm:$0xff] %vm50_vm0, %v64_v17 }
  0x9c   :  { %v65_v18 = vpop.f32.mrf.mxu0 }
  0x9d   :  { %v66_v19 = vadd.f32 %v80_v15, %v65_v18 }
  0x9f   :  { %70 = vst.msk [vmem:[%s151_s3 + $0x8] sm:$0x1] %vm69_vm1, %v66_v19 }
  0xa0   :  { %75 = vsyncpa [#allocation3], 1 }

// kernel: envelope_ql_forward.22
= control target key start
LH: loop header
LB: loop body
LE: loop exit
PB: predicated region body
PF: predicated region fallthrough
CT: control target
= control target key end

     0   :  { %s436_s1 = inlined_call_operand.vmem [shape: f32[128,512], index: 1, kind: input, shape index: {}]   ;;  %s437_s0 = inlined_call_operand.vmem [shape: f32[9,128], index: 0, kind: input, shape index: {}]   ;;  %s438_s2 = inlined_call_operand.vmem [shape: f32[1,512], index: 2, kind: input, shape index: {}]   ;;  %s439_s3 = inlined_call_operand.vmem [shape: f32[9,512], index: 3, kind: output, shape index: {}]  }
   0x1   :  { %v72_v0 = vld [vmem:[%s436_s1 + $0x1c0] sm:$0xff]  ;;  %v73_v2 = vld [vmem:[%s436_s1 + $0x1c8] sm:$0xff]  ;;  %v74_v5 = vld [vmem:[%s436_s1 + $0x1d0] sm:$0xff] }
   0x2   :  { %v76_v1 = vld [vmem:[%s436_s1 + $0x1e0] sm:$0xff]  ;;  %v77_v4 = vld [vmem:[%s436_s1 + $0x1e8] sm:$0xff]  ;;  %v78_v6 = vld [vmem:[%s436_s1 + $0x1f0] sm:$0xff] }
   0x3   :  { %v110_v3 = vpack.c.bf16 %v76_v1, %v72_v0  ;;  %v111_v7 = vpack.c.bf16 %v77_v4, %v73_v2  ;;  %v112_v8 = vpack.c.bf16 %v78_v6, %v74_v5  ;;  %v75_v9 = vld [vmem:[%s436_s1 + $0x1d8] sm:$0xff]  ;;  %v64_v11 = vld [vmem:[%s436_s1 + $0x180] sm:$0xff]  ;;  %v65_v14 = vld [vmem:[%s436_s1 + $0x188] sm:$0xff] }
   0x4   :  { %v79_v10 = vld [vmem:[%s436_s1 + $0x1f8] sm:$0xff]  ;;  %v68_v13 = vld [vmem:[%s436_s1 + $0x1a0] sm:$0xff]  ;;  %v69_v15 = vld [vmem:[%s436_s1 + $0x1a8] sm:$0xff] }
   0x5   :  { %123 = vmatpush.bf16.msra.mxu0 %v110_v3  ;;  %v113_v12 = vpack.c.bf16 %v79_v10, %v75_v9  ;;  %137 = vmatpush.bf16.msra.mxu1 %v111_v7  ;;  %v106_v16 = vpack.c.bf16 %v68_v13, %v64_v11  ;;  %v107_v17 = vpack.c.bf16 %v69_v15, %v65_v14  ;;  %v66_v18 = vld [vmem:[%s436_s1 + $0x190] sm:$0xff]  ;;  %v67_v20 = vld [vmem:[%s436_s1 + $0x198] sm:$0xff]  ;;  %v56_v23 = vld [vmem:[%s436_s1 + $0x140] sm:$0xff] }
   0x6   :  { %151 = vmatpush.bf16.msra.mxu2 %v112_v8  ;;  %v70_v19 = vld [vmem:[%s436_s1 + $0x1b0] sm:$0xff]  ;;  %v71_v22 = vld [vmem:[%s436_s1 + $0x1b8] sm:$0xff]  ;;  %v60_v24 = vld [vmem:[%s436_s1 + $0x160] sm:$0xff] }
   0x7   :  { %165 = vmatpush.bf16.msra.mxu3 %v113_v12  ;;  %v108_v21 = vpack.c.bf16 %v70_v19, %v66_v18  ;;  %v109_v25 = vpack.c.bf16 %v71_v22, %v67_v20  ;;  %v57_v26 = vld [vmem:[%s436_s1 + $0x148] sm:$0xff]  ;;  %v58_v28 = vld [vmem:[%s436_s1 + $0x150] sm:$0xff]  ;;  %v102_v29 = vpack.c.bf16 %v60_v24, %v56_v23  ;;  %v59_v31 = vld [vmem:[%s436_s1 + $0x158] sm:$0xff] }
   0x8   :  { %v61_v27 = vld [vmem:[%s436_s1 + $0x168] sm:$0xff]  ;;  %v62_v30 = vld [vmem:[%s436_s1 + $0x170] sm:$0xff]  ;;  %v63_v32 = vld [vmem:[%s436_s1 + $0x178] sm:$0xff] }
   0x9   :  { %124 = vmatpush.bf16.msra.mxu0 %v106_v16  ;;  %138 = vmatpush.bf16.msra.mxu1 %v107_v17  ;;  %v103_v33 = vpack.c.bf16 %v61_v27, %v57_v26  ;;  %v104_v34 = vpack.c.bf16 %v62_v30, %v58_v28  ;;  %v48_v35 = vld [vmem:[%s436_s1 + $0x100] sm:$0xff]  ;;  %v49_v37 = vld [vmem:[%s436_s1 + $0x108] sm:$0xff]  ;;  %v105_v38 = vpack.c.bf16 %v63_v32, %v59_v31  ;;  %v50_v40 = vld [vmem:[%s436_s1 + $0x110] sm:$0xff] }
   0xa   :  { %152 = vmatpush.bf16.msra.mxu2 %v108_v21  ;;  %v52_v36 = vld [vmem:[%s436_s1 + $0x120] sm:$0xff]  ;;  %v53_v39 = vld [vmem:[%s436_s1 + $0x128] sm:$0xff]  ;;  %v54_v41 = vld [vmem:[%s436_s1 + $0x130] sm:$0xff] }
   0xb   :  { %166 = vmatpush.bf16.msra.mxu3 %v109_v25  ;;  %v51_v42 = vld [vmem:[%s436_s1 + $0x118] sm:$0xff]  ;;  %v98_v44 = vpack.c.bf16 %v52_v36, %v48_v35  ;;  %v99_v45 = vpack.c.bf16 %v53_v39, %v49_v37  ;;  %v100_v46 = vpack.c.bf16 %v54_v41, %v50_v40  ;;  %v40_v47 = vld [vmem:[%s436_s1 + $0xc0] sm:$0xff]  ;;  %v41_v49 = vld [vmem:[%s436_s1 + $0xc8] sm:$0xff] }
   0xc   :  { %v55_v43 = vld [vmem:[%s436_s1 + $0x138] sm:$0xff]  ;;  %v44_v48 = vld [vmem:[%s436_s1 + $0xe0] sm:$0xff]  ;;  %v45_v51 = vld [vmem:[%s436_s1 + $0xe8] sm:$0xff] }
   0xd   :  { %125 = vmatpush.bf16.msra.mxu0 %v102_v29  ;;  %139 = vmatpush.bf16.msra.mxu1 %v103_v33  ;;  %v101_v50 = vpack.c.bf16 %v55_v43, %v51_v42  ;;  %v42_v52 = vld [vmem:[%s436_s1 + $0xd0] sm:$0xff]  ;;  %v43_v54 = vld [vmem:[%s436_s1 + $0xd8] sm:$0xff]  ;;  %v94_v56 = vpack.c.bf16 %v44_v48, %v40_v47  ;;  %v95_v57 = vpack.c.bf16 %v45_v51, %v41_v49  ;;  %v32_v59 = vld [vmem:[%s436_s1 + $0x80] sm:$0xff] }
   0xe   :  { %153 = vmatpush.bf16.msra.mxu2 %v104_v34  ;;  %v46_v53 = vld [vmem:[%s436_s1 + $0xf0] sm:$0xff]  ;;  %v47_v55 = vld [vmem:[%s436_s1 + $0xf8] sm:$0xff]  ;;  %v36_v60 = vld [vmem:[%s436_s1 + $0xa0] sm:$0xff] }
   0xf   :  { %167 = vmatpush.bf16.msra.mxu3 %v105_v38  ;;  %v96_v58 = vpack.c.bf16 %v46_v53, %v42_v52  ;;  %v33_v61 = vld [vmem:[%s436_s1 + $0x88] sm:$0xff]  ;;  %v97_v62 = vpack.c.bf16 %v47_v55, %v43_v54  ;;  %v34_v0 = vld [vmem:[%s436_s1 + $0x90] sm:$0xff]  ;;  %v35_v2 = vld [vmem:[%s436_s1 + $0x98] sm:$0xff]  ;;  %v90_v4 = vpack.c.bf16 %v36_v60, %v32_v59 }
  0x10   :  { %v37_v63 = vld [vmem:[%s436_s1 + $0xa8] sm:$0xff]  ;;  %v38_v1 = vld [vmem:[%s436_s1 + $0xb0] sm:$0xff]  ;;  %v39_v3 = vld [vmem:[%s436_s1 + $0xb8] sm:$0xff] }
  0x11   :  { %126 = vmatpush.bf16.msra.mxu0 %v98_v44  ;;  %140 = vmatpush.bf16.msra.mxu1 %v99_v45  ;;  %v91_v5 = vpack.c.bf16 %v37_v63, %v33_v61  ;;  %v92_v6 = vpack.c.bf16 %v38_v1, %v34_v0  ;;  %v24_v7 = vld [vmem:[%s436_s1 + $0x40] sm:$0xff]  ;;  %v25_v9 = vld [vmem:[%s436_s1 + $0x48] sm:$0xff]  ;;  %v93_v10 = vpack.c.bf16 %v39_v3, %v35_v2  ;;  %v26_v12 = vld [vmem:[%s436_s1 + $0x50] sm:$0xff] }
  0x12   :  { %154 = vmatpush.bf16.msra.mxu2 %v100_v46  ;;  %v28_v8 = vld [vmem:[%s436_s1 + $0x60] sm:$0xff]  ;;  %v29_v11 = vld [vmem:[%s436_s1 + $0x68] sm:$0xff]  ;;  %v30_v13 = vld [vmem:[%s436_s1 + $0x70] sm:$0xff] }
  0x13   :  { %168 = vmatpush.bf16.msra.mxu3 %v101_v50  ;;  %v27_v14 = vld [vmem:[%s436_s1 + $0x58] sm:$0xff]  ;;  %v86_v16 = vpack.c.bf16 %v28_v8, %v24_v7  ;;  %v87_v17 = vpack.c.bf16 %v29_v11, %v25_v9  ;;  %v88_v18 = vpack.c.bf16 %v30_v13, %v26_v12  ;;  %v16_v19 = vld [vmem:[%s436_s1] sm:$0xff]  ;;  %v17_v21 = vld [vmem:[%s436_s1 + $0x8] sm:$0xff] }
  0x14   :  { %v31_v15 = vld [vmem:[%s436_s1 + $0x78] sm:$0xff]  ;;  %v20_v20 = vld [vmem:[%s436_s1 + $0x20] sm:$0xff]  ;;  %v21_v23 = vld [vmem:[%s436_s1 + $0x28] sm:$0xff] }
  0x15   :  { %127 = vmatpush.bf16.msra.mxu0 %v94_v56  ;;  %141 = vmatpush.bf16.msra.mxu1 %v95_v57  ;;  %v89_v22 = vpack.c.bf16 %v31_v15, %v27_v14  ;;  %v18_v24 = vld [vmem:[%s436_s1 + $0x10] sm:$0xff]  ;;  %v19_v26 = vld [vmem:[%s436_s1 + $0x18] sm:$0xff]  ;;  %v82_v28 = vpack.c.bf16 %v20_v20, %v16_v19  ;;  %v14_v29 = vld [vmem:[%s437_s0] sm:$0xff]  ;;  %v83_v31 = vpack.c.bf16 %v21_v23, %v17_v21 }
  0x16   :  { %155 = vmatpush.bf16.msra.mxu2 %v96_v58  ;;  %v22_v25 = vld [vmem:[%s436_s1 + $0x30] sm:$0xff]  ;;  %v23_v27 = vld [vmem:[%s436_s1 + $0x38] sm:$0xff]  ;;  %v15_v30 = vld [vmem:[%s437_s0 + $0x8] sm:$0x1] }
  0x17   :  { %169 = vmatpush.bf16.msra.mxu3 %v97_v62  ;;  %v84_v32 = vpack.c.bf16 %v22_v25, %v18_v24  ;;  %v85_v33 = vpack.c.bf16 %v23_v27, %v19_v26  ;;  %v81_v34 = vpack.c.bf16 %v15_v30, %v14_v29  ;;  %v80_v35 = vld [vmem:[%s438_s2] sm:$0xf] }
  0x18   :  { %v115_v36 = vperm.slane %v80_v35, 0  ;;  %v116_v37 = vperm.slane %v80_v35, 1  ;;  %v117_v42 = vperm.slane %v80_v35, 2  ;;  %v118_v43 = vperm.slane %v80_v35, 3 }
  0x19   :  { %128 = vmatpush.bf16.msra.mxu0 %v90_v4  ;;  %142 = vmatpush.bf16.msra.mxu1 %v91_v5 }
  0x1a   :  { %156 = vmatpush.bf16.msra.mxu2 %v92_v6 }
  0x1b   :  { %170 = vmatpush.bf16.msra.mxu3 %v93_v10 }
  0x1d   :  { %129 = vmatpush.bf16.msra.mxu0 %v86_v16  ;;  %143 = vmatpush.bf16.msra.mxu1 %v87_v17 }
  0x1e   :  { %157 = vmatpush.bf16.msra.mxu2 %v88_v18 }
  0x1f   :  { %171 = vmatpush.bf16.msra.mxu3 %v89_v22 }
  0x21   :  { %130 = vmatpush.bf16.msra.mxu0 %v82_v28  ;;  %144 = vmatpush.bf16.msra.mxu1 %v83_v31 }
  0x22   :  { %158 = vmatpush.bf16.msra.mxu2 %v84_v32 }
  0x23   :  { %172 = vmatpush.bf16.msra.mxu3 %v85_v33 }
  0x24   :  { %131 = vmatmul.bf16.vlgmr.msra.gmra.mxu0 %v81_v34  ;;  %145 = vmatmul.bf16.vlgmr.msra.gmra.mxu1 %v81_v34 }
  0x25   :  { %159 = vmatmul.bf16.vlgmr.msra.gmra.mxu2 %v81_v34 }
  0x26   :  { %173 = vmatmul.bf16.vlgmr.msra.gmra.mxu3 %v81_v34 }
  0xa1   :  { %v132_v38 = vpop.f32.mrf.mxu0  ;;  %v146_v40 = vpop.f32.mrf.mxu1 }
  0xa2   :  { %v133_v39 = vadd.f32 %v132_v38, %v115_v36  ;;  %v147_v41 = vadd.f32 %v146_v40, %v116_v37 }
  0xa4   :  { %179 = vst [vmem:[%s439_s3] sm:$0xff] %v133_v39 }
  0xa5   :  { %180 = vst [vmem:[%s439_s3 + $0x8] sm:$0xff] %v147_v41 }
  0xa8   :  { %v160_v44 = vpop.f32.mrf.mxu2 }
  0xa9   :  { %v161_v45 = vadd.f32 %v160_v44, %v117_v42  ;;  %v174_v46 = vpop.f32.mrf.mxu3  ;;  %v134_v47 = vpop.f32.mrf.mxu0 }
  0xaa   :  { %v175_v48 = vadd.f32 %v174_v46, %v118_v43  ;;  %v135_v49 = vadd.f32 %v134_v47, %v115_v36  ;;  %v148_v50 = vpop.f32.mrf.mxu1 }
  0xab   :  { %181 = vst [vmem:[%s439_s3 + $0x10] sm:$0xff] %v161_v45  ;;  %v149_v51 = vadd.f32 %v148_v50, %v116_v37 }
  0xac   :  { %182 = vst [vmem:[%s439_s3 + $0x18] sm:$0xff] %v175_v48 }
  0xad   :  { %183 = vst [vmem:[%s439_s3 + $0x20] sm:$0x1] %v135_v49 }
  0xae   :  { %184 = vst [vmem:[%s439_s3 + $0x28] sm:$0x1] %v149_v51 }
  0xb0   :  { %v162_v52 = vpop.f32.mrf.mxu2 }
  0xb1   :  { %v163_v53 = vadd.f32 %v162_v52, %v117_v42  ;;  %v176_v54 = vpop.f32.mrf.mxu3 }
  0xb2   :  { %v177_v55 = vadd.f32 %v176_v54, %v118_v43 }
  0xb3   :  { %185 = vst [vmem:[%s439_s3 + $0x30] sm:$0x1] %v163_v53 }
  0xb4   :  { %186 = vst [vmem:[%s439_s3 + $0x38] sm:$0x1] %v177_v55 }

// kernel: envelope_ql_forward.23
= control target key start
LH: loop header
LB: loop body
LE: loop exit
PB: predicated region body
PF: predicated region fallthrough
CT: control target
= control target key end

     0   :  { %vm39_vm0 = vcmask 523264   ;;  %s170_s1 = inlined_call_operand.vmem [shape: f32[64,128], index: 1, kind: input, shape index: {}]   ;;  %s171_s2 = inlined_call_operand.vmem [shape: f32[1,128], index: 2, kind: input, shape index: {}]   ;;  %s172_s0 = inlined_call_operand.vmem [shape: f32[33,64], index: 0, kind: input, shape index: {}]   ;;  %s173_s3 = inlined_call_operand.vmem [shape: f32[33,128], index: 3, kind: output, shape index: {}]  }
   0x1   :  { %v26_v0 = vld [vmem:[%s170_s1 + $0x30] sm:$0xff]  ;;  %v27_v1 = vld [vmem:[%s170_s1 + $0x38] sm:$0xff]  ;;  %v24_v2 = vld [vmem:[%s170_s1 + $0x20] sm:$0xff] }
   0x2   :  { %v35_v3 = vpack.c.bf16 %v27_v1, %v26_v0  ;;  %v25_v4 = vld [vmem:[%s170_s1 + $0x28] sm:$0xff]  ;;  %v22_v6 = vld [vmem:[%s170_s1 + $0x10] sm:$0xff]  ;;  %v23_v7 = vld [vmem:[%s170_s1 + $0x18] sm:$0xff] }
   0x3   :  { %v34_v5 = vpack.c.bf16 %v25_v4, %v24_v2  ;;  %v33_v8 = vpack.c.bf16 %v23_v7, %v22_v6  ;;  %v20_v9 = vld [vmem:[%s170_s1] sm:$0xff]  ;;  %v21_v10 = vld [vmem:[%s170_s1 + $0x8] sm:$0xff]  ;;  %v17_v14 = vld [vmem:[%s172_s0 + $0x10] sm:$0xff] }
   0x4   :  { %53 = vmatpush.bf16.msra.mxu0 %v35_v3  ;;  %84 = vmatpush.bf16.msra.mxu1 %v35_v3  ;;  %v15_v11 = vld [vmem:[%s172_s0] sm:$0xff]  ;;  %v32_v12 = vpack.c.bf16 %v21_v10, %v20_v9  ;;  %v16_v13 = vld [vmem:[%s172_s0 + $0x8] sm:$0xff]  ;;  %v18_v15 = vld [vmem:[%s172_s0 + $0x18] sm:$0xff] }
   0x5   :  { %85 = vmatpush.bf16.msra.mxu2 %v35_v3  ;;  %v19_v16 = vld [vmem:[%s172_s0 + $0x20] sm:$0x1]  ;;  %v29_v17 = vpack.c.bf16 %v16_v13, %v15_v11  ;;  %v30_v18 = vpack.c.bf16 %v18_v15, %v17_v14 }
   0x6   :  { %v31_v19 = vpack.c.bf16 %v19_v16, %v19_v16  ;;  %v92_v20 = vld [vmem:[%s171_s2] ss:$0 sm:$0xff] }
   0x8   :  { %54 = vmatpush.bf16.msra.mxu0 %v34_v5  ;;  %86 = vmatpush.bf16.msra.mxu1 %v34_v5 }
   0x9   :  { %87 = vmatpush.bf16.msra.mxu2 %v34_v5 }
   0xc   :  { %55 = vmatpush.bf16.msra.mxu0 %v33_v8  ;;  %88 = vmatpush.bf16.msra.mxu1 %v33_v8 }
   0xd   :  { %89 = vmatpush.bf16.msra.mxu2 %v33_v8 }
  0x10   :  { %56 = vmatpush.bf16.msra.mxu0 %v32_v12  ;;  %90 = vmatpush.bf16.msra.mxu1 %v32_v12 }
  0x11   :  { %91 = vmatpush.bf16.msra.mxu2 %v32_v12 }
  0x13   :  { %81 = vmatmul.msk.bf16.vlgmr.msra.gmra.mxu0 %vm39_vm0, %v29_v17  ;;  %82 = vmatmul.msk.bf16.vlgmr.msra.gmra.mxu1 %vm39_vm0, %v30_v18 }
  0x14   :  { %83 = vmatmul.msk.bf16.vlgmr.msra.gmra.mxu2 %vm39_vm0, %v31_v19 }
  0x90   :  { %v58_v21 = vpop.f32.mrf.mxu0  ;;  %v63_v22 = vpop.f32.mrf.mxu1 }
  0x91   :  { %v59_v23 = vadd.f32 %v92_v20, %v58_v21  ;;  %v64_v24 = vadd.f32 %v92_v20, %v63_v22 }
  0x93   :  { %72 = vst [vmem:[%s173_s3] sm:$0xff] %v59_v23 }
  0x94   :  { %74 = vst [vmem:[%s173_s3 + $0x10] sm:$0xff] %v64_v24 }
  0x97   :  { %v68_v25 = vpop.f32.mrf.mxu2 }
  0x98   :  { %v69_v26 = vadd.f32 %v92_v20, %v68_v25  ;;  %v60_v27 = vpop.f32.mrf.mxu0  ;;  %v65_v28 = vpop.f32.mrf.mxu1 }
  0x99   :  { %v61_v29 = vadd.f32 %v92_v20, %v60_v27  ;;  %v66_v30 = vadd.f32 %v92_v20, %v65_v28 }
  0x9a   :  { %76 = vst [vmem:[%s173_s3 + $0x20] sm:$0x1] %v69_v26 }
  0x9b   :  { %73 = vst [vmem:[%s173_s3 + $0x8] sm:$0xff] %v61_v29 }
  0x9c   :  { %75 = vst [vmem:[%s173_s3 + $0x18] sm:$0xff] %v66_v30 }
  0x9f   :  { %v70_v31 = vpop.f32.mrf.mxu2 }

// kernel: envelope_ql_forward.24
= control target key start
LH: loop header
LB: loop body
LE: loop exit
PB: predicated region body
PF: predicated region fallthrough
CT: control target
= control target key end

     0   :  { %vm59_vm0 = vcmask 523264   ;;  %vm61_vm1 = vcmask 516096   ;;  %s151_s1 = inlined_call_operand.vmem [shape: f32[128,64], index: 1, kind: input, shape index: {}]   ;;  %s152_s2 = inlined_call_operand.vmem [shape: f32[1,64], index: 2, kind: input, shape index: {}]   ;;  %s153_s0 = inlined_call_operand.vmem [shape: f32[9,128], index: 0, kind: input, shape index: {}]   ;;  %s154_s3 = inlined_call_operand.vmem [shape: f32[9,64], index: 3, kind: output, shape index: {}]  }
   0x1   :  { %v30_v0 = vld [vmem:[%s151_s1 + $0x70] sm:$0xff]  ;;  %v31_v1 = vld [vmem:[%s151_s1 + $0x78] sm:$0xff]  ;;  %v28_v2 = vld [vmem:[%s151_s1 + $0x60] sm:$0xff] }
   0x2   :  { %v41_v3 = vpack.c.bf16 %v31_v1, %v30_v0  ;;  %v29_v4 = vld [vmem:[%s151_s1 + $0x68] sm:$0xff]  ;;  %v26_v6 = vld [vmem:[%s151_s1 + $0x50] sm:$0xff]  ;;  %v27_v7 = vld [vmem:[%s151_s1 + $0x58] sm:$0xff] }
   0x3   :  { %v40_v5 = vpack.c.bf16 %v29_v4, %v28_v2  ;;  %v39_v8 = vpack.c.bf16 %v27_v7, %v26_v6  ;;  %v24_v9 = vld [vmem:[%s151_s1 + $0x40] sm:$0xff]  ;;  %v25_v10 = vld [vmem:[%s151_s1 + $0x48] sm:$0xff]  ;;  %v22_v12 = vld [vmem:[%s151_s1 + $0x30] sm:$0xff] }
   0x4   :  { %45 = vmatpush.bf16.msra.mxu0 %v41_v3  ;;  %v38_v11 = vpack.c.bf16 %v25_v10, %v24_v9  ;;  %v23_v13 = vld [vmem:[%s151_s1 + $0x38] sm:$0xff]  ;;  %v20_v15 = vld [vmem:[%s151_s1 + $0x20] sm:$0xff]  ;;  %v21_v16 = vld [vmem:[%s151_s1 + $0x28] sm:$0xff] }
   0x5   :  { %v37_v14 = vpack.c.bf16 %v23_v13, %v22_v12  ;;  %v36_v17 = vpack.c.bf16 %v21_v16, %v20_v15  ;;  %v18_v18 = vld [vmem:[%s151_s1 + $0x10] sm:$0xff]  ;;  %v19_v19 = vld [vmem:[%s151_s1 + $0x18] sm:$0xff]  ;;  %v16_v21 = vld [vmem:[%s151_s1] sm:$0xff] }
   0x6   :  { %v35_v20 = vpack.c.bf16 %v19_v19, %v18_v18  ;;  %v17_v22 = vld [vmem:[%s151_s1 + $0x8] sm:$0xff]  ;;  %v14_v24 = vld [vmem:[%s153_s0] sm:$0xff] }
   0x7   :  { %v34_v23 = vpack.c.bf16 %v17_v22, %v16_v21  ;;  %v15_v25 = vld [vmem:[%s153_s0 + $0x8] sm:$0x1]  ;;  %v67_v27 = vld [vmem:[%s152_s2] ss:$0 sm:$0xff] }
   0x8   :  { %46 = vmatpush.bf16.msra.mxu0 %v40_v5  ;;  %v33_v26 = vpack.c.bf16 %v15_v25, %v14_v24 }
   0xc   :  { %47 = vmatpush.bf16.msra.mxu0 %v39_v8 }
  0x10   :  { %48 = vmatpush.bf16.msra.mxu0 %v38_v11 }
  0x14   :  { %49 = vmatpush.bf16.msra.mxu0 %v37_v14 }
  0x18   :  { %50 = vmatpush.bf16.msra.mxu0 %v36_v17 }
  0x1c   :  { %51 = vmatpush.bf16.msra.mxu0 %v35_v20 }
  0x20   :  { %52 = vmatpush.bf16.msra.mxu0 %v34_v23 }
  0x23   :  { %53 = vmatmul.bf16.vlgmr.msra.gmra.mxu0 %v33_v26 }
  0xa0   :  { %v54_v28 = vpop.f32.mrf.mxu0 }
  0xa1   :  { %v55_v29 = vadd.f32 %v67_v27, %v54_v28 }
  0xa3   :  { %60 = vst.msk [vmem:[%s154_s3] sm:$0xff] %vm59_vm0, %v55_v29 }
  0xa8   :  { %v56_v30 = vpop.f32.mrf.mxu0 }
  0xa9   :  { %v57_v31 = vadd.f32 %v67_v27, %v56_v30 }
  0xab   :  { %62 = vst.msk [vmem:[%s154_s3 + $0x8] sm:$0x1] %vm61_vm1, %v57_v31 }

// kernel: envelope_ql_forward.25
= control target key start
LH: loop header
LB: loop body
LE: loop exit
PB: predicated region body
PF: predicated region fallthrough
CT: control target
= control target key end

     0   :  { %vm54_vm0 = vcmask 523264   ;;  %vm181_vm5 = vcmask 516096   ;;  %s385_s1 = inlined_call_operand.vmem [shape: f32[64,256], index: 1, kind: input, shape index: {}]   ;;  %s386_s3 = inlined_call_operand.vmem [shape: f32[256,64], index: 3, kind: input, shape index: {}]   ;;  %s387_s0 = inlined_call_operand.vmem [shape: f32[9,64], index: 0, kind: input, shape index: {}]   ;;  %s388_s4 = inlined_call_operand.vmem [shape: f32[1,64], index: 4, kind: input, shape index: {}]   ;;  %s389_s2 = inlined_call_operand.vmem [shape: f32[1,256], index: 2, kind: input, shape index: {}]   ;;  %s390_s5 = inlined_call_operand.vmem [shape: f32[9,64], index: 5, kind: output, shape index: {}]  }
   0x1   :  { %v35_v0 = vld [vmem:[%s385_s1 + $0x60] sm:$0xff]  ;;  %v37_v1 = vld [vmem:[%s385_s1 + $0x70] sm:$0xff]  ;;  %v36_v2 = vld [vmem:[%s385_s1 + $0x68] sm:$0xff] }
   0x2   :  { %v47_v3 = vpack.c.bf16 %v37_v1, %v35_v0  ;;  %v38_v4 = vld [vmem:[%s385_s1 + $0x78] sm:$0xff]  ;;  %v31_v5 = vld [vmem:[%s385_s1 + $0x40] sm:$0xff]  ;;  %v33_v6 = vld [vmem:[%s385_s1 + $0x50] sm:$0xff] }
   0x3   :  { %v48_v7 = vpack.c.bf16 %v38_v4, %v36_v2  ;;  %v32_v8 = vld [vmem:[%s385_s1 + $0x48] sm:$0xff]  ;;  %v34_v9 = vld [vmem:[%s385_s1 + $0x58] sm:$0xff]  ;;  %v45_v10 = vpack.c.bf16 %v33_v6, %v31_v5  ;;  %v27_v12 = vld [vmem:[%s385_s1 + $0x20] sm:$0xff] }
   0x4   :  { %62 = vmatpush.bf16.msra.mxu0 %v47_v3  ;;  %v46_v11 = vpack.c.bf16 %v34_v9, %v32_v8  ;;  %v29_v13 = vld [vmem:[%s385_s1 + $0x30] sm:$0xff]  ;;  %v28_v14 = vld [vmem:[%s385_s1 + $0x28] sm:$0xff]  ;;  %v30_v15 = vld [vmem:[%s385_s1 + $0x38] sm:$0xff] }
   0x5   :  { %76 = vmatpush.bf16.msra.mxu1 %v48_v7  ;;  %v23_v16 = vld [vmem:[%s385_s1] sm:$0xff]  ;;  %v112_v17 = vld [vmem:[%s386_s3 + $0x70] sm:$0xff]  ;;  %v113_v18 = vld [vmem:[%s386_s3 + $0x78] sm:$0xff]  ;;  %v43_v20 = vpack.c.bf16 %v29_v13, %v27_v12  ;;  %v44_v25 = vpack.c.bf16 %v30_v15, %v28_v14 }
   0x6   :  { %v128_v19 = vld [vmem:[%s386_s3 + $0xf0] sm:$0xff]  ;;  %v140_v21 = vpack.c.bf16 %v113_v18, %v112_v17  ;;  %v129_v22 = vld [vmem:[%s386_s3 + $0xf8] sm:$0xff]  ;;  %v110_v23 = vld [vmem:[%s386_s3 + $0x60] sm:$0xff] }
   0x7   :  { %v111_v24 = vld [vmem:[%s386_s3 + $0x68] sm:$0xff]  ;;  %v25_v26 = vld [vmem:[%s385_s1 + $0x10] sm:$0xff]  ;;  %v148_v27 = vpack.c.bf16 %v129_v22, %v128_v19  ;;  %v126_v28 = vld [vmem:[%s386_s3 + $0xe0] sm:$0xff] }
   0x8   :  { %63 = vmatpush.bf16.msra.mxu0 %v45_v10  ;;  %v127_v29 = vld [vmem:[%s386_s3 + $0xe8] sm:$0xff]  ;;  %v26_v31 = vld [vmem:[%s385_s1 + $0x18] sm:$0xff]  ;;  %152 = vmatpush.bf16.msra.mxu2 %v140_v21  ;;  %v139_v32 = vpack.c.bf16 %v111_v24, %v110_v23  ;;  %v21_v33 = vld [vmem:[%s387_s0] sm:$0xff]  ;;  %v41_v37 = vpack.c.bf16 %v25_v26, %v23_v16 }
   0x9   :  { %77 = vmatpush.bf16.msra.mxu1 %v46_v11  ;;  %v24_v30 = vld [vmem:[%s385_s1 + $0x8] sm:$0xff]  ;;  %166 = vmatpush.bf16.msra.mxu3 %v148_v27  ;;  %v147_v34 = vpack.c.bf16 %v127_v29, %v126_v28  ;;  %v108_v35 = vld [vmem:[%s386_s3 + $0x50] sm:$0xff]  ;;  %v109_v36 = vld [vmem:[%s386_s3 + $0x58] sm:$0xff] }
   0xa   :  { %v22_v38 = vld [vmem:[%s387_s0 + $0x8] sm:$0x1]  ;;  %v124_v39 = vld [vmem:[%s386_s3 + $0xd0] sm:$0xff]  ;;  %v125_v40 = vld [vmem:[%s386_s3 + $0xd8] sm:$0xff]  ;;  %v42_v41 = vpack.c.bf16 %v26_v31, %v24_v30  ;;  %v138_v42 = vpack.c.bf16 %v109_v36, %v108_v35 }
   0xb   :  { %v40_v43 = vpack.c.bf16 %v22_v38, %v21_v33  ;;  %v146_v44 = vpack.c.bf16 %v125_v40, %v124_v39  ;;  %v106_v45 = vld [vmem:[%s386_s3 + $0x40] sm:$0xff]  ;;  %v107_v46 = vld [vmem:[%s386_s3 + $0x48] sm:$0xff]  ;;  %v104_v51 = vld [vmem:[%s386_s3 + $0x30] sm:$0xff] }
   0xc   :  { %64 = vmatpush.bf16.msra.mxu0 %v43_v20  ;;  %153 = vmatpush.bf16.msra.mxu2 %v139_v32  ;;  %v122_v47 = vld [vmem:[%s386_s3 + $0xc0] sm:$0xff]  ;;  %v123_v48 = vld [vmem:[%s386_s3 + $0xc8] sm:$0xff]  ;;  %v137_v49 = vpack.c.bf16 %v107_v46, %v106_v45  ;;  %v105_v52 = vld [vmem:[%s386_s3 + $0x38] sm:$0xff] }
   0xd   :  { %78 = vmatpush.bf16.msra.mxu1 %v44_v25  ;;  %167 = vmatpush.bf16.msra.mxu3 %v147_v34  ;;  %v145_v50 = vpack.c.bf16 %v123_v48, %v122_v47  ;;  %v120_v53 = vld [vmem:[%s386_s3 + $0xb0] sm:$0xff]  ;;  %v136_v54 = vpack.c.bf16 %v105_v52, %v104_v51  ;;  %v121_v55 = vld [vmem:[%s386_s3 + $0xb8] sm:$0xff]  ;;  %v102_v57 = vld [vmem:[%s386_s3 + $0x20] sm:$0xff] }
   0xe   :  { %v144_v56 = vpack.c.bf16 %v121_v55, %v120_v53  ;;  %v103_v58 = vld [vmem:[%s386_s3 + $0x28] sm:$0xff]  ;;  %v118_v59 = vld [vmem:[%s386_s3 + $0xa0] sm:$0xff]  ;;  %v100_v63 = vld [vmem:[%s386_s3 + $0x10] sm:$0xff] }
   0xf   :  { %v135_v60 = vpack.c.bf16 %v103_v58, %v102_v57  ;;  %v119_v61 = vld [vmem:[%s386_s3 + $0xa8] sm:$0xff]  ;;  %v101_v0 = vld [vmem:[%s386_s3 + $0x18] sm:$0xff]  ;;  %v116_v1 = vld [vmem:[%s386_s3 + $0x90] sm:$0xff] }
  0x10   :  { %65 = vmatpush.bf16.msra.mxu0 %v41_v37  ;;  %154 = vmatpush.bf16.msra.mxu2 %v138_v42  ;;  %v143_v62 = vpack.c.bf16 %v119_v61, %v118_v59  ;;  %v134_v2 = vpack.c.bf16 %v101_v0, %v100_v63  ;;  %v117_v3 = vld [vmem:[%s386_s3 + $0x98] sm:$0xff]  ;;  %v98_v5 = vld [vmem:[%s386_s3] sm:$0xff]  ;;  %v99_v6 = vld [vmem:[%s386_s3 + $0x8] sm:$0xff] }
  0x11   :  { %79 = vmatpush.bf16.msra.mxu1 %v42_v41  ;;  %168 = vmatpush.bf16.msra.mxu3 %v146_v44  ;;  %v142_v4 = vpack.c.bf16 %v117_v3, %v116_v1  ;;  %v114_v7 = vld [vmem:[%s386_s3 + $0x80] sm:$0xff]  ;;  %v133_v8 = vpack.c.bf16 %v99_v6, %v98_v5  ;;  %v115_v9 = vld [vmem:[%s386_s3 + $0x88] sm:$0xff] }
  0x12   :  { %v141_v10 = vpack.c.bf16 %v115_v9, %v114_v7  ;;  %v39_v11 = vld [vmem:[%s389_s2] sm:$0x3] }
  0x13   :  { %187 = vmatmul.msk.bf16.vlgmr.msra.gmra.mxu0 %vm54_vm0, %v40_v43  ;;  %v50_v13 = vperm.slane %v39_v11, 0  ;;  %v51_v15 = vperm.slane %v39_v11, 1  ;;  %v189_v32 = vld [vmem:[%s388_s4] ss:$0 sm:$0xff] }
  0x14   :  { %188 = vmatmul.msk.bf16.vlgmr.msra.gmra.mxu1 %vm54_vm0, %v40_v43  ;;  %155 = vmatpush.bf16.msra.mxu2 %v137_v49 }
  0x15   :  { %169 = vmatpush.bf16.msra.mxu3 %v145_v50 }
  0x18   :  { %156 = vmatpush.bf16.msra.mxu2 %v136_v54 }
  0x19   :  { %170 = vmatpush.bf16.msra.mxu3 %v144_v56 }
  0x1c   :  { %157 = vmatpush.bf16.msra.mxu2 %v135_v60 }
  0x1d   :  { %171 = vmatpush.bf16.msra.mxu3 %v143_v62 }
  0x20   :  { %158 = vmatpush.bf16.msra.mxu2 %v134_v2 }
  0x21   :  { %172 = vmatpush.bf16.msra.mxu3 %v142_v4 }
  0x24   :  { %159 = vmatpush.bf16.msra.mxu2 %v133_v8 }
  0x25   :  { %173 = vmatpush.bf16.msra.mxu3 %v141_v10 }
  0x90   :  { %v67_v12 = vpop.f32.mrf.mxu0 }
  0x91   :  { %v81_v14 = vpop.f32.mrf.mxu1  ;;  %v68_v16 = vadd.f32 %v67_v12, %v50_v13 }
  0x92   :  { %v82_v17 = vadd.f32 %v81_v14, %v51_v15 }
  0x93   :  { %v90_v19 = vmul.f32 0.01, %v68_v16  ;;  %vm86_vm1 = vcmp.gt.f32.partialorder %v68_v16, 0.0 }
  0x94   :  { %v91_v22 = vmul.f32 0.01, %v82_v17  ;;  %vm87_vm3 = vcmp.gt.f32.partialorder %v82_v17, 0.0 }
  0x95   :  { %v94_v26 = vsel %vm86_vm1, %v68_v16, %v90_v19 }
  0x96   :  { %v95_v29 = vsel %vm87_vm3, %v82_v17, %v91_v22 }
  0x98   :  { %v69_v18 = vpop.f32.mrf.mxu0 }
  0x99   :  { %v70_v20 = vadd.f32 %v69_v18, %v50_v13  ;;  %v83_v21 = vpop.f32.mrf.mxu1 }
  0x9a   :  { %v84_v23 = vadd.f32 %v83_v21, %v51_v15 }
  0x9b   :  { %v92_v24 = vmul.f32 0.01, %v70_v20  ;;  %vm88_vm2 = vcmp.gt.f32.partialorder %v70_v20, 0.0 }
  0x9c   :  { %v93_v25 = vmul.f32 0.01, %v84_v23  ;;  %vm89_vm4 = vcmp.gt.f32.partialorder %v84_v23, 0.0 }
  0x9d   :  { %v96_v27 = vsel %vm88_vm2, %v70_v20, %v92_v24 }
  0x9e   :  { %v131_v28 = vpack.c.bf16 %v96_v27, %v94_v26  ;;  %v97_v30 = vsel %vm89_vm4, %v84_v23, %v93_v25 }
  0x9f   :  { %v132_v31 = vpack.c.bf16 %v97_v30, %v95_v29 }
  0xa0   :  { %160 = vmatmul.bf16.vlgmr.msra.gmra.mxu2 %v131_v28 }
  0xa1   :  { %174 = vmatmul.bf16.vlgmr.msra.gmra.mxu3 %v132_v31 }
 0x123   :  { %v161_v33 = vpop.f32.mrf.mxu2 }
 0x124   :  { %v162_v34 = vadd.f32 %v189_v32, %v161_v33  ;;  %v175_v35 = vpop.f32.mrf.mxu3 }
 0x126   :  { %v176_v36 = vadd.f32 %v175_v35, %v162_v34 }
 0x128   :  { %180 = vst.msk [vmem:[%s390_s5] sm:$0xff] %vm54_vm0, %v176_v36 }
 0x12b   :  { %v163_v37 = vpop.f32.mrf.mxu2 }
 0x12c   :  { %v164_v38 = vadd.f32 %v189_v32, %v163_v37  ;;  %v177_v39 = vpop.f32.mrf.mxu3 }
 0x12e   :  { %v178_v40 = vadd.f32 %v177_v39, %v164_v38 }
 0x130   :  { %182 = vst.msk [vmem:[%s390_s5 + $0x8] sm:$0x1] %vm181_vm5, %v178_v40 }

// kernel: envelope_ql_forward.26
= control target key start
LH: loop header
LB: loop body
LE: loop exit
PB: predicated region body
PF: predicated region fallthrough
CT: control target
= control target key end

     0   :  { %vm34_vm0 = vcmask 523264   ;;  %vm53_vm1 = vcmask 516096   ;;  %s120_s1 = inlined_call_operand.vmem [shape: f32[64,64], index: 1, kind: input, shape index: {}]   ;;  %s121_s2 = inlined_call_operand.vmem [shape: f32[1,64], index: 2, kind: input, shape index: {}]   ;;  %s122_s0 = inlined_call_operand.vmem [shape: f32[9,64], index: 0, kind: input, shape index: {}]   ;;  %s123_s3 = inlined_call_operand.vmem [shape: f32[9,64], index: 3, kind: output, shape index: {}]  }
   0x1   :  { %v23_v0 = vld [vmem:[%s120_s1 + $0x30] sm:$0xff]  ;;  %v24_v1 = vld [vmem:[%s120_s1 + $0x38] sm:$0xff]  ;;  %v21_v2 = vld [vmem:[%s120_s1 + $0x20] sm:$0xff] }
   0x2   :  { %v30_v3 = vpack.c.bf16 %v24_v1, %v23_v0  ;;  %v22_v4 = vld [vmem:[%s120_s1 + $0x28] sm:$0xff]  ;;  %v19_v6 = vld [vmem:[%s120_s1 + $0x10] sm:$0xff]  ;;  %v20_v7 = vld [vmem:[%s120_s1 + $0x18] sm:$0xff] }
   0x3   :  { %v29_v5 = vpack.c.bf16 %v22_v4, %v21_v2  ;;  %v28_v8 = vpack.c.bf16 %v20_v7, %v19_v6  ;;  %v17_v9 = vld [vmem:[%s120_s1] sm:$0xff]  ;;  %v18_v10 = vld [vmem:[%s120_s1 + $0x8] sm:$0xff] }
   0x4   :  { %42 = vmatpush.bf16.msra.mxu0 %v30_v3  ;;  %v27_v11 = vpack.c.bf16 %v18_v10, %v17_v9  ;;  %v15_v12 = vld [vmem:[%s122_s0] sm:$0xff]  ;;  %v16_v13 = vld [vmem:[%s122_s0 + $0x8] sm:$0x1] }
   0x5   :  { %v26_v14 = vpack.c.bf16 %v16_v13, %v15_v12  ;;  %v60_v15 = vld [vmem:[%s121_s2] ss:$0 sm:$0xff] }
   0x8   :  { %43 = vmatpush.bf16.msra.mxu0 %v29_v5 }
   0xc   :  { %44 = vmatpush.bf16.msra.mxu0 %v28_v8 }
  0x10   :  { %45 = vmatpush.bf16.msra.mxu0 %v27_v11 }
  0x13   :  { %59 = vmatmul.msk.bf16.vlgmr.msra.gmra.mxu0 %vm34_vm0, %v26_v14 }
  0x90   :  { %v47_v16 = vpop.f32.mrf.mxu0 }
  0x91   :  { %v48_v17 = vadd.f32 %v60_v15, %v47_v16 }
  0x93   :  { %52 = vst.msk [vmem:[%s123_s3] sm:$0xff] %vm34_vm0, %v48_v17 }
  0x98   :  { %v49_v18 = vpop.f32.mrf.mxu0 }
  0x99   :  { %v50_v19 = vadd.f32 %v60_v15, %v49_v18 }
  0x9b   :  { %54 = vst.msk [vmem:[%s123_s3 + $0x8] sm:$0x1] %vm53_vm1, %v50_v19 }

// kernel: envelope_ql_forward.35
= control target key start
LH: loop header
LB: loop body
LE: loop exit
PB: predicated region body
PF: predicated region fallthrough
CT: control target
= control target key end

     0   :  { %s170_s7 = smov 2   ;;  %s171_s8 = smov 6   ;;  %s271_s0 = inlined_call_operand.vmem [shape: f32[5,128], index: 0, kind: input, shape index: {}]   ;;  %s272_s1 = inlined_call_operand.vmem [shape: f32[128,10], index: 1, kind: input, shape index: {}]   ;;  %s273_s2 = inlined_call_operand.vmem [shape: f32[1,10], index: 2, kind: input, shape index: {}]   ;;  %s274_s3 = inlined_call_operand.vmem [shape: f32[5,2], index: 3, kind: input, shape index: {}]   ;;  %s275_s4 = inlined_call_operand.vmem [shape: f32[10,5], index: 4, kind: input, shape index: {}]   ;;  %s276_s5 = inlined_call_operand.hbm [shape: f32[5,5], index: 5, kind: output, shape index: {}]  }
   0x1   :  { %v37_v0 = vld [vmem:[%s272_s1 + $0x70] sm:$0xff]  ;;  %v38_v1 = vld [vmem:[%s272_s1 + $0x78] sm:$0xff]  ;;  %v35_v2 = vld [vmem:[%s272_s1 + $0x60] sm:$0xff] }
   0x2   :  { %v46_v3 = vpack.c.bf16 %v38_v1, %v37_v0  ;;  %v36_v4 = vld [vmem:[%s272_s1 + $0x68] sm:$0xff]  ;;  %v33_v6 = vld [vmem:[%s272_s1 + $0x50] sm:$0xff]  ;;  %v34_v7 = vld [vmem:[%s272_s1 + $0x58] sm:$0xff] }
   0x3   :  { %v45_v5 = vpack.c.bf16 %v36_v4, %v35_v2  ;;  %v64_v8 = vld [vmem:[%s274_s3] sm:$0x1f] }
   0x4   :  { %51 = vmatpush.bf16.msra.mxu0 %v46_v3  ;;  %66 = vrot.lane.b32.xlu0 %v64_v8, %s170_s7 }
   0x5   :  { %72 = vrot.lane.b32.xlu1 %v64_v8, %s171_s8 }
   0x6   :  { %10 = vsyncpa [#allocation3], 0  ;;  %v44_v9 = vpack.c.bf16 %v34_v7, %v33_v6  ;;  %v31_v10 = vld [vmem:[%s272_s1 + $0x40] sm:$0xff]  ;;  %v32_v11 = vld [vmem:[%s272_s1 + $0x48] sm:$0xff]  ;;  %s172_s16 = smov 4   ;;  %s173_s17 = smov 8  }
   0x7   :  { %v43_v12 = vpack.c.bf16 %v32_v11, %v31_v10  ;;  %v29_v13 = vld [vmem:[%s272_s1 + $0x30] sm:$0xff]  ;;  %v30_v14 = vld [vmem:[%s272_s1 + $0x38] sm:$0xff]  ;;  %v27_v16 = vld [vmem:[%s272_s1 + $0x20] sm:$0xff]  ;;  %vm93_vm0 = vcmask 1041408   ;;  %vm78_vm1 = vcmask 15360   ;;  %vm80_vm2 = vcmask 31744  }
   0x8   :  { %52 = vmatpush.bf16.msra.mxu0 %v45_v5  ;;  %v42_v15 = vpack.c.bf16 %v30_v14, %v29_v13  ;;  %v28_v17 = vld [vmem:[%s272_s1 + $0x28] sm:$0xff]  ;;  %v25_v19 = vld [vmem:[%s272_s1 + $0x10] sm:$0xff]  ;;  %v26_v20 = vld [vmem:[%s272_s1 + $0x18] sm:$0xff]  ;;  %vm82_vm3 = vcmask 48128   ;;  %vm84_vm4 = vcmask 64512   ;;  %vm89_vm5 = vcmask 80896  }
   0x9   :  { %v41_v18 = vpack.c.bf16 %v28_v17, %v27_v16  ;;  %v40_v21 = vpack.c.bf16 %v26_v20, %v25_v19  ;;  %v23_v22 = vld [vmem:[%s272_s1] sm:$0xff]  ;;  %v24_v23 = vld [vmem:[%s272_s1 + $0x8] sm:$0xff]  ;;  %s127_s14 = sshll.u32 %s276_s5, 4  ;;  %vm118_vm6 = vcmask 36864   ;;  %s128_s14 = int_to_ptr.hbm [resolvable:$true] %s127_s14 }
   0xa   :  { %v39_v24 = vpack.c.bf16 %v24_v23, %v23_v22  ;;  %v21_v25 = vld [vmem:[%s271_s0] sm:$0x1f]  ;;  %v88_v27 = vld [vmem:[%s275_s4 + $0x8] sm:$0x3] }
   0xb   :  { %v22_v26 = vpack.c.bf16 %v21_v25, %v21_v25  ;;  %136 = vmatpush.msk.msra.mxu1 %vm93_vm0, %v88_v27  ;;  %v87_v28 = vld [vmem:[%s275_s4] sm:$0xff]  ;;  %s174_s4 = smov [#allocation2]  }
   0xc   :  { %53 = vmatpush.bf16.msra.mxu0 %v44_v9  ;;  %69 = vrot.lane.b32.xlu0 %v64_v8, %s172_s16  ;;  %v143_v34 = vld [vmem:[%s273_s2] ss:$0 sm:$0xff]  ;;  %s125_s11 = sshll.u32 %s174_s4, 4  ;;  %s126_s11 = int_to_ptr.vmem [resolvable:$true] %s125_s11 }
   0xd   :  { %75 = vrot.lane.b32.xlu1 %v64_v8, %s173_s17  ;;  %112 = vmatpush.msra.mxu1 %v87_v28 }
  0x10   :  { %54 = vmatpush.bf16.msra.mxu0 %v43_v12 }
  0x14   :  { %55 = vmatpush.bf16.msra.mxu0 %v42_v15 }
  0x18   :  { %56 = vmatpush.bf16.msra.mxu0 %v41_v18 }
  0x1c   :  { %57 = vmatpush.bf16.msra.mxu0 %v40_v21 }
  0x20   :  { %58 = vmatpush.bf16.msra.mxu0 %v39_v24 }
  0x23   :  { %59 = vmatmul.bf16.vlgmr.msra.gmra.mxu0 %v22_v26 }
  0x76   :  { %v67_v29 = vpop.permute.xlu0 %66 }
  0x77   :  { %v73_v30 = vpop.permute.xlu1 %72  ;;  %v79_v31 = vsel %vm78_vm1, %v64_v8, %v67_v29 }
  0x7e   :  { %v70_v32 = vpop.permute.xlu0 %69 }
  0x7f   :  { %v81_v33 = vsel %vm80_vm2, %v79_v31, %v70_v32  ;;  %v76_v35 = vpop.permute.xlu1 %75 }
  0x80   :  { %v83_v36 = vsel %vm82_vm3, %v81_v33, %v73_v30 }
  0x81   :  { %v85_v39 = vsel %vm84_vm4, %v83_v36, %v76_v35 }
  0xa0   :  { %v60_v37 = vpop.f32.mrf.mxu0 }
  0xa1   :  { %v61_v38 = vadd.f32 %v143_v34, %v60_v37 }
  0xa3   :  { %v86_v40 = vmul.f32 %v85_v39, %v61_v38 }
  0xa5   :  { %137 = vmatmul.msk.f32.vlgmr.msra.gmra.mxu1 %vm89_vm5, %v86_v40 }
  0xa8   :  { %v62_v41 = vpop.f32.mrf.mxu0 }
 0x122   :  { %v114_v42 = vpop.f32.mrf.mxu1 }
 0x123   :  { %v117_v43 = vmul.f32 100.0, %v114_v42 }
 0x125   :  { %119 = vst.msk [vmem:[#allocation2] sm:$0x1f] %vm118_vm6, %v117_v43 }
 0x126   :  { %130 = dma.vmem_to_hbm [thread:$0]  %s126_s11, 128, %s128_s14, [#allocation3]  }
 0x127   :  { %168 = dma.done.wait [#allocation3], 128  }
 0x128   :  { %169 = vsyncadd [#allocation3], 4294967168 }
 0x129   :  { %135 = vsyncpa [#allocation3], 1 }

// kernel: envelope_ql_forward.34
= control target key start
LH: loop header
LB: loop body
LE: loop exit
PB: predicated region body
PF: predicated region fallthrough
CT: control target
= control target key end

     0   :  { %vm70_vm0 = vcmask 1041408   ;;  %vm66_vm1 = vcmask 15360   ;;  %vm95_vm2 = vcmask 3072   ;;  %s197_s1 = inlined_call_operand.vmem [shape: f32[128,2], index: 1, kind: input, shape index: {}]   ;;  %s198_s2 = inlined_call_operand.vmem [shape: f32[1,2], index: 2, kind: input, shape index: {}]   ;;  %s199_s0 = inlined_call_operand.vmem [shape: f32[4,128], index: 0, kind: input, shape index: {}]   ;;  %s200_s4 = inlined_call_operand.vmem [shape: f32[2,1], index: 4, kind: input, shape index: {}]   ;;  %s201_s3 = inlined_call_operand.vmem [shape: f32[4,2], index: 3, kind: input, shape index: {}]   ;;  %s202_s5 = inlined_call_operand.vmem [shape: f32[4,1], index: 5, kind: output, shape index: {}]  }
   0x1   :  { %v36_v0 = vld [vmem:[%s197_s1 + $0x70] sm:$0xff]  ;;  %v37_v1 = vld [vmem:[%s197_s1 + $0x78] sm:$0xff]  ;;  %v34_v2 = vld [vmem:[%s197_s1 + $0x60] sm:$0xff] }
   0x2   :  { %v45_v3 = vpack.c.bf16 %v37_v1, %v36_v0  ;;  %v35_v4 = vld [vmem:[%s197_s1 + $0x68] sm:$0xff]  ;;  %v32_v6 = vld [vmem:[%s197_s1 + $0x50] sm:$0xff]  ;;  %v33_v7 = vld [vmem:[%s197_s1 + $0x58] sm:$0xff] }
   0x3   :  { %v44_v5 = vpack.c.bf16 %v35_v4, %v34_v2  ;;  %v43_v8 = vpack.c.bf16 %v33_v7, %v32_v6  ;;  %v30_v9 = vld [vmem:[%s197_s1 + $0x40] sm:$0xff]  ;;  %v31_v10 = vld [vmem:[%s197_s1 + $0x48] sm:$0xff]  ;;  %v28_v12 = vld [vmem:[%s197_s1 + $0x30] sm:$0xff] }
   0x4   :  { %50 = vmatpush.bf16.msra.mxu0 %v45_v3  ;;  %v42_v11 = vpack.c.bf16 %v31_v10, %v30_v9  ;;  %v29_v13 = vld [vmem:[%s197_s1 + $0x38] sm:$0xff]  ;;  %v26_v15 = vld [vmem:[%s197_s1 + $0x20] sm:$0xff]  ;;  %v27_v16 = vld [vmem:[%s197_s1 + $0x28] sm:$0xff] }
   0x5   :  { %v41_v14 = vpack.c.bf16 %v29_v13, %v28_v12  ;;  %v40_v17 = vpack.c.bf16 %v27_v16, %v26_v15  ;;  %v24_v18 = vld [vmem:[%s197_s1 + $0x10] sm:$0xff]  ;;  %v25_v19 = vld [vmem:[%s197_s1 + $0x18] sm:$0xff]  ;;  %v22_v21 = vld [vmem:[%s197_s1] sm:$0xff] }
   0x6   :  { %v39_v20 = vpack.c.bf16 %v25_v19, %v24_v18  ;;  %v23_v22 = vld [vmem:[%s197_s1 + $0x8] sm:$0xff]  ;;  %v20_v24 = vld [vmem:[%s199_s0] sm:$0xf] }
   0x7   :  { %v38_v23 = vpack.c.bf16 %v23_v22, %v22_v21  ;;  %v21_v25 = vpack.c.bf16 %v20_v24, %v20_v24  ;;  %v65_v26 = vld [vmem:[%s200_s4] sm:$0x3] }
   0x8   :  { %51 = vmatpush.bf16.msra.mxu0 %v44_v5  ;;  %101 = vmatpush.msk.msra.mxu1 %vm70_vm0, %v65_v26  ;;  %v103_v27 = vld [vmem:[%s198_s2] ss:$0 sm:$0xff] }
   0x9   :  { %v63_v29 = vld [vmem:[%s201_s3] sm:$0xf] }
   0xc   :  { %52 = vmatpush.bf16.msra.mxu0 %v43_v8 }
  0x10   :  { %53 = vmatpush.bf16.msra.mxu0 %v42_v11 }
  0x14   :  { %54 = vmatpush.bf16.msra.mxu0 %v41_v14 }
  0x18   :  { %55 = vmatpush.bf16.msra.mxu0 %v40_v17 }
  0x1c   :  { %56 = vmatpush.bf16.msra.mxu0 %v39_v20 }
  0x20   :  { %57 = vmatpush.bf16.msra.mxu0 %v38_v23 }
  0x23   :  { %58 = vmatmul.bf16.vlgmr.msra.gmra.mxu0 %v21_v25 }
  0xa0   :  { %v59_v28 = vpop.f32.mrf.mxu0 }
  0xa1   :  { %v60_v30 = vadd.f32 %v103_v27, %v59_v28 }
  0xa3   :  { %v64_v31 = vmul.f32 %v63_v29, %v60_v30 }
  0xa5   :  { %102 = vmatmul.msk.f32.vlgmr.msra.gmra.mxu1 %vm66_vm1, %v64_v31 }
  0xa8   :  { %v61_v32 = vpop.f32.mrf.mxu0 }
 0x122   :  { %v91_v33 = vpop.f32.mrf.mxu1 }
 0x123   :  { %v94_v34 = vmul.f32 100.0, %v91_v33 }
 0x125   :  { %96 = vst.msk [vmem:[%s202_s5] sm:$0xf] %vm95_vm2, %v94_v34 }

// kernel: envelope_ql_forward.32
= control target key start
LH: loop header
LB: loop body
LE: loop exit
PB: predicated region body
PF: predicated region fallthrough
CT: control target
= control target key end

     0   :  { %s142_s7 = smov 2   ;;  %s143_s8 = smov 6   ;;  %vm102_vm0 = vcmask 1045504   ;;  %vm83_vm1 = vcmask 15360   ;;  %vm85_vm2 = vcmask 31744   ;;  %vm87_vm3 = vcmask 48128   ;;  %s244_s1 = inlined_call_operand.vmem [shape: f32[128,14], index: 1, kind: input, shape index: {}]   ;;  %s245_s3 = inlined_call_operand.vmem [shape: f32[7,2], index: 3, kind: input, shape index: {}]   ;;  %s246_s2 = inlined_call_operand.vmem [shape: f32[1,14], index: 2, kind: input, shape index: {}]   ;;  %s247_s0 = inlined_call_operand.vmem [shape: f32[7,128], index: 0, kind: input, shape index: {}]   ;;  %s248_s4 = inlined_call_operand.vmem [shape: f32[14,7], index: 4, kind: input, shape index: {}]   ;;  %s249_s5 = inlined_call_operand.vmem [shape: f32[7,7], index: 5, kind: output, shape index: {}]  }
   0x1   :  { %v36_v0 = vld [vmem:[%s244_s1 + $0x70] sm:$0xff]  ;;  %v37_v1 = vld [vmem:[%s244_s1 + $0x78] sm:$0xff]  ;;  %v34_v2 = vld [vmem:[%s244_s1 + $0x60] sm:$0xff]  ;;  %s144_s9 = smov 10   ;;  %s145_s17 = smov 4   ;;  %vm89_vm4 = vcmask 64512  }
   0x2   :  { %v45_v3 = vpack.c.bf16 %v37_v1, %v36_v0  ;;  %v35_v4 = vld [vmem:[%s244_s1 + $0x68] sm:$0xff]  ;;  %v32_v6 = vld [vmem:[%s244_s1 + $0x50] sm:$0xff]  ;;  %v33_v7 = vld [vmem:[%s244_s1 + $0x58] sm:$0xff]  ;;  %s146_s18 = smov 8   ;;  %s147_s19 = smov 12   ;;  %vm91_vm5 = vcmask 80896  }
   0x3   :  { %v44_v5 = vpack.c.bf16 %v35_v4, %v34_v2  ;;  %v63_v8 = vld [vmem:[%s245_s3] sm:$0x7f]  ;;  %v43_v9 = vpack.c.bf16 %v33_v7, %v32_v6  ;;  %v31_v11 = vld [vmem:[%s244_s1 + $0x48] sm:$0xff]  ;;  %v28_v13 = vld [vmem:[%s244_s1 + $0x30] sm:$0xff]  ;;  %vm93_vm6 = vcmask 97280   ;;  %vm98_vm7 = vcmask 113664  }
   0x4   :  { %50 = vmatpush.bf16.msra.mxu0 %v45_v3  ;;  %65 = vrot.lane.b32.xlu0 %v63_v8, %s142_s7  ;;  %v30_v10 = vld [vmem:[%s244_s1 + $0x40] sm:$0xff]  ;;  %v29_v14 = vld [vmem:[%s244_s1 + $0x38] sm:$0xff]  ;;  %v27_v17 = vld [vmem:[%s244_s1 + $0x28] sm:$0xff]  ;;  %vm127_vm8 = vcmask 55296  }
   0x5   :  { %71 = vrot.lane.b32.xlu1 %v63_v8, %s143_s8  ;;  %77 = vrot.lane.b32.xlu2 %v63_v8, %s144_s9  ;;  %v42_v12 = vpack.c.bf16 %v31_v11, %v30_v10  ;;  %v41_v15 = vpack.c.bf16 %v29_v14, %v28_v13  ;;  %v26_v16 = vld [vmem:[%s244_s1 + $0x20] sm:$0xff]  ;;  %v24_v19 = vld [vmem:[%s244_s1 + $0x10] sm:$0xff] }
   0x6   :  { %v40_v18 = vpack.c.bf16 %v27_v17, %v26_v16  ;;  %v25_v20 = vld [vmem:[%s244_s1 + $0x18] sm:$0xff]  ;;  %v22_v22 = vld [vmem:[%s244_s1] sm:$0xff]  ;;  %v23_v23 = vld [vmem:[%s244_s1 + $0x8] sm:$0xff] }
   0x7   :  { %v39_v21 = vpack.c.bf16 %v25_v20, %v24_v19  ;;  %v38_v24 = vpack.c.bf16 %v23_v23, %v22_v22  ;;  %v20_v25 = vld [vmem:[%s247_s0] sm:$0x7f]  ;;  %v97_v27 = vld [vmem:[%s248_s4 + $0x8] sm:$0x3f] }
   0x8   :  { %51 = vmatpush.bf16.msra.mxu0 %v44_v5  ;;  %v21_v26 = vpack.c.bf16 %v20_v25, %v20_v25  ;;  %133 = vmatpush.msk.msra.mxu1 %vm102_vm0, %v97_v27  ;;  %v96_v28 = vld [vmem:[%s248_s4] sm:$0xff] }
   0x9   :  { %v141_v38 = vld [vmem:[%s246_s2] ss:$0 sm:$0xff] }
   0xa   :  { %121 = vmatpush.msra.mxu1 %v96_v28 }
   0xc   :  { %52 = vmatpush.bf16.msra.mxu0 %v43_v9  ;;  %68 = vrot.lane.b32.xlu0 %v63_v8, %s145_s17 }
   0xd   :  { %74 = vrot.lane.b32.xlu1 %v63_v8, %s146_s18  ;;  %80 = vrot.lane.b32.xlu2 %v63_v8, %s147_s19 }
  0x10   :  { %53 = vmatpush.bf16.msra.mxu0 %v42_v12 }
  0x14   :  { %54 = vmatpush.bf16.msra.mxu0 %v41_v15 }
  0x18   :  { %55 = vmatpush.bf16.msra.mxu0 %v40_v18 }
  0x1c   :  { %56 = vmatpush.bf16.msra.mxu0 %v39_v21 }
  0x20   :  { %57 = vmatpush.bf16.msra.mxu0 %v38_v24 }
  0x23   :  { %58 = vmatmul.bf16.vlgmr.msra.gmra.mxu0 %v21_v26 }
  0x5f   :  { %v78_v33 = vpop.permute.xlu2 %77 }
  0x67   :  { %v81_v39 = vpop.permute.xlu2 %80 }
  0x76   :  { %v66_v29 = vpop.permute.xlu0 %65 }
  0x77   :  { %v72_v30 = vpop.permute.xlu1 %71  ;;  %v84_v31 = vsel %vm83_vm1, %v63_v8, %v66_v29 }
  0x7e   :  { %v69_v32 = vpop.permute.xlu0 %68 }
  0x7f   :  { %v86_v34 = vsel %vm85_vm2, %v84_v31, %v69_v32  ;;  %v75_v35 = vpop.permute.xlu1 %74 }
  0x80   :  { %v88_v36 = vsel %vm87_vm3, %v86_v34, %v72_v30 }
  0x81   :  { %v90_v37 = vsel %vm89_vm4, %v88_v36, %v75_v35 }
  0x82   :  { %v92_v40 = vsel %vm91_vm5, %v90_v37, %v78_v33 }
  0x83   :  { %v94_v43 = vsel %vm93_vm6, %v92_v40, %v81_v39 }
  0xa0   :  { %v59_v41 = vpop.f32.mrf.mxu0 }
  0xa1   :  { %v60_v42 = vadd.f32 %v141_v38, %v59_v41 }
  0xa3   :  { %v95_v44 = vmul.f32 %v94_v43, %v60_v42 }
  0xa5   :  { %134 = vmatmul.msk.f32.vlgmr.msra.gmra.mxu1 %vm98_vm7, %v95_v44 }
  0xa8   :  { %v61_v45 = vpop.f32.mrf.mxu0 }
 0x122   :  { %v123_v46 = vpop.f32.mrf.mxu1 }
 0x123   :  { %v126_v47 = vmul.f32 100.0, %v123_v46 }
 0x125   :  { %128 = vst.msk [vmem:[%s249_s5] sm:$0x7f] %vm127_vm8, %v126_v47 }

// kernel: envelope_ql_forward.33
= control target key start
LH: loop header
LB: loop body
LE: loop exit
PB: predicated region body
PF: predicated region fallthrough
CT: control target
= control target key end

     0   :  { %vm70_vm0 = vcmask 523264   ;;  %vm107_vm1 = vcmask 1041408   ;;  %vm103_vm2 = vcmask 15360   ;;  %vm132_vm3 = vcmask 1024   ;;  %s259_s1 = inlined_call_operand.vmem [shape: f32[192,2], index: 1, kind: input, shape index: {}]   ;;  %s260_s0 = inlined_call_operand.vmem [shape: f32[2,192], index: 0, kind: input, shape index: {}]   ;;  %s261_s2 = inlined_call_operand.vmem [shape: f32[1,2], index: 2, kind: input, shape index: {}]   ;;  %s262_s4 = inlined_call_operand.vmem [shape: f32[2,1], index: 4, kind: input, shape index: {}]   ;;  %s263_s3 = inlined_call_operand.vmem [shape: f32[2,2], index: 3, kind: input, shape index: {}]   ;;  %s264_s5 = inlined_call_operand.vmem [shape: f32[2,1], index: 5, kind: output, shape index: {}]  }
   0x1   :  { %v44_v0 = vld [vmem:[%s259_s1 + $0x70] sm:$0xff]  ;;  %v45_v1 = vld [vmem:[%s259_s1 + $0x78] sm:$0xff]  ;;  %v42_v2 = vld [vmem:[%s259_s1 + $0x60] sm:$0xff] }
   0x2   :  { %v61_v3 = vpack.c.bf16 %v45_v1, %v44_v0  ;;  %v43_v4 = vld [vmem:[%s259_s1 + $0x68] sm:$0xff]  ;;  %v52_v5 = vld [vmem:[%s259_s1 + $0xb0] sm:$0xff]  ;;  %v53_v6 = vld [vmem:[%s259_s1 + $0xb8] sm:$0xff] }
   0x3   :  { %v60_v7 = vpack.c.bf16 %v43_v4, %v42_v2  ;;  %v65_v8 = vpack.c.bf16 %v53_v6, %v52_v5  ;;  %v50_v9 = vld [vmem:[%s259_s1 + $0xa0] sm:$0xff]  ;;  %v51_v10 = vld [vmem:[%s259_s1 + $0xa8] sm:$0xff]  ;;  %v40_v11 = vld [vmem:[%s259_s1 + $0x50] sm:$0xff] }
   0x4   :  { %74 = vmatpush.bf16.msra.mxu0 %v61_v3  ;;  %v41_v12 = vld [vmem:[%s259_s1 + $0x58] sm:$0xff]  ;;  %v64_v13 = vpack.c.bf16 %v51_v10, %v50_v9  ;;  %v48_v14 = vld [vmem:[%s259_s1 + $0x90] sm:$0xff]  ;;  %v21_v17 = vld [vmem:[%s260_s0] sm:$0xf] }
   0x5   :  { %91 = vmatpush.bf16.msra.mxu1 %v65_v8  ;;  %v49_v15 = vld [vmem:[%s259_s1 + $0x98] sm:$0xff]  ;;  %v59_v16 = vpack.c.bf16 %v41_v12, %v40_v11  ;;  %v38_v18 = vld [vmem:[%s259_s1 + $0x40] sm:$0xff]  ;;  %v39_v19 = vld [vmem:[%s259_s1 + $0x48] sm:$0xff]  ;;  %23 = vst [vmem:[#allocation1] ss:$4 sm:$0xff] %v21_v17 }
   0x6   :  { %v63_v20 = vpack.c.bf16 %v49_v15, %v48_v14  ;;  %v46_v21 = vld [vmem:[%s259_s1 + $0x80] sm:$0xff]  ;;  %v47_v22 = vld [vmem:[%s259_s1 + $0x88] sm:$0xff]  ;;  %v58_v23 = vpack.c.bf16 %v39_v19, %v38_v18  ;;  %v36_v24 = vld [vmem:[%s259_s1 + $0x30] sm:$0xff] }
   0x7   :  { %v37_v25 = vld [vmem:[%s259_s1 + $0x38] sm:$0xff]  ;;  %v62_v26 = vpack.c.bf16 %v47_v22, %v46_v21  ;;  %v34_v29 = vld [vmem:[%s259_s1 + $0x20] sm:$0xff]  ;;  %v35_v30 = vld [vmem:[%s259_s1 + $0x28] sm:$0xff] }
   0x8   :  { %75 = vmatpush.bf16.msra.mxu0 %v60_v7  ;;  %v57_v27 = vpack.c.bf16 %v37_v25, %v36_v24  ;;  %v56_v32 = vpack.c.bf16 %v35_v30, %v34_v29  ;;  %v32_v33 = vld [vmem:[%s259_s1 + $0x10] sm:$0xff]  ;;  %v33_v34 = vld [vmem:[%s259_s1 + $0x18] sm:$0xff]  ;;  %v30_v36 = vld [vmem:[%s259_s1] sm:$0xff] }
   0x9   :  { %92 = vmatpush.bf16.msra.mxu1 %v64_v13  ;;  %v55_v35 = vpack.c.bf16 %v33_v34, %v32_v33  ;;  %v31_v37 = vld [vmem:[%s259_s1 + $0x8] sm:$0xff]  ;;  %v102_v41 = vld [vmem:[%s262_s4] sm:$0x3] }
   0xa   :  { %v54_v38 = vpack.c.bf16 %v31_v37, %v30_v36  ;;  %139 = vmatpush.msk.msra.mxu2 %vm107_vm1, %v102_v41  ;;  %v141_v44 = vld [vmem:[%s261_s2] ss:$0 sm:$0xff] }
   0xb   :  { %v100_v47 = vld [vmem:[%s263_s3] sm:$0x3] }
   0xc   :  { %76 = vmatpush.bf16.msra.mxu0 %v59_v16  ;;  %v25_v28 = vld.sshfl [vmem:[#allocation1 + $0x8] sm:$0xff pattern:$0x73625140]  ;;  %v24_v39 = vld.sshfl [vmem:[#allocation1] sm:$0xff pattern:$0x73625140] }
   0xd   :  { %93 = vmatpush.bf16.msra.mxu1 %v63_v20  ;;  %v29_v31 = vpack.c.bf16 %v25_v28, %v25_v28  ;;  %v28_v40 = vpack.c.bf16 %v24_v39, %v24_v39 }
  0x10   :  { %77 = vmatpush.bf16.msra.mxu0 %v58_v23 }
  0x11   :  { %94 = vmatpush.bf16.msra.mxu1 %v62_v26 }
  0x14   :  { %78 = vmatpush.bf16.msra.mxu0 %v57_v27  ;;  %138 = vmatmul.msk.bf16.vlgmr.msra.gmra.mxu1 %vm70_vm0, %v29_v31 }
  0x18   :  { %79 = vmatpush.bf16.msra.mxu0 %v56_v32 }
  0x1c   :  { %80 = vmatpush.bf16.msra.mxu0 %v55_v35 }
  0x20   :  { %81 = vmatpush.bf16.msra.mxu0 %v54_v38 }
  0x23   :  { %82 = vmatmul.bf16.vlgmr.msra.gmra.mxu0 %v28_v40 }
  0x91   :  { %v96_v42 = vpop.f32.mrf.mxu1 }
  0x99   :  { %v98_v43 = vpop.f32.mrf.mxu1 }
  0xa0   :  { %v83_v45 = vpop.f32.mrf.mxu0 }
  0xa1   :  { %v84_v46 = vadd.f32 %v141_v44, %v83_v45 }
  0xa3   :  { %v97_v48 = vadd.f32 %v96_v42, %v84_v46 }
  0xa5   :  { %v101_v49 = vmul.f32 %v100_v47, %v97_v48 }
  0xa7   :  { %140 = vmatmul.msk.f32.vlgmr.msra.gmra.mxu2 %vm103_vm2, %v101_v49 }
  0xa8   :  { %v85_v50 = vpop.f32.mrf.mxu0 }
 0x12a   :  { %v128_v51 = vpop.f32.mrf.mxu2 }
 0x12b   :  { %v131_v52 = vmul.f32 100.0, %v128_v51 }
 0x12d   :  { %133 = vst.msk [vmem:[%s264_s5] sm:$0x3] %vm132_vm3, %v131_v52 }

// kernel: envelope_ql_forward.31
= control target key start
LH: loop header
LB: loop body
LE: loop exit
PB: predicated region body
PF: predicated region fallthrough
CT: control target
= control target key end

     0   :  { %vm66_vm0 = vcmask 523264   ;;  %vm96_vm1 = vcmask 1024   ;;  %s205_s1 = inlined_call_operand.vmem [shape: f32[192,1], index: 1, kind: input, shape index: {}]   ;;  %s206_s0 = inlined_call_operand.vmem [shape: f32[2,192], index: 0, kind: input, shape index: {}]   ;;  %s207_s2 = inlined_call_operand.<no memory space> [shape: f32[1,1], index: 2, kind: input, shape index: {}]   ;;  %s208_s3 = inlined_call_operand.vmem [shape: f32[2,1], index: 3, kind: output, shape index: {}]  }
   0x1   :  { %v32_v0 = vld [vmem:[%s205_s1 + $0x70] sm:$0xff]  ;;  %v33_v1 = vld [vmem:[%s205_s1 + $0x78] sm:$0xff]  ;;  %v30_v2 = vld [vmem:[%s205_s1 + $0x60] sm:$0xff]  ;;  %v8_v41 = vstv %s207_s2 }
   0x2   :  { %v58_v3 = vpack.c.bf16 %v33_v1, %v32_v0  ;;  %v31_v4 = vld [vmem:[%s205_s1 + $0x68] sm:$0xff]  ;;  %v40_v5 = vld [vmem:[%s205_s1 + $0xb0] sm:$0xff]  ;;  %v41_v6 = vld [vmem:[%s205_s1 + $0xb8] sm:$0xff]  ;;  %9 = vst [vmem:[#allocation2] sm:$0x1] %v8_v41 }
   0x3   :  { %v57_v7 = vpack.c.bf16 %v31_v4, %v30_v2  ;;  %v62_v8 = vpack.c.bf16 %v41_v6, %v40_v5  ;;  %v38_v9 = vld [vmem:[%s205_s1 + $0xa0] sm:$0xff]  ;;  %v39_v10 = vld [vmem:[%s205_s1 + $0xa8] sm:$0xff]  ;;  %v28_v11 = vld [vmem:[%s205_s1 + $0x50] sm:$0xff] }
   0x4   :  { %70 = vmatpush.bf16.msra.mxu0 %v58_v3  ;;  %v29_v12 = vld [vmem:[%s205_s1 + $0x58] sm:$0xff]  ;;  %v61_v13 = vpack.c.bf16 %v39_v10, %v38_v9  ;;  %v36_v14 = vld [vmem:[%s205_s1 + $0x90] sm:$0xff]  ;;  %v17_v16 = vld [vmem:[%s206_s0] sm:$0xf] }
   0x5   :  { %87 = vmatpush.bf16.msra.mxu1 %v62_v8  ;;  %v37_v15 = vld [vmem:[%s205_s1 + $0x98] sm:$0xff]  ;;  %v56_v17 = vpack.c.bf16 %v29_v12, %v28_v11  ;;  %44 = vst [vmem:[#allocation1] ss:$4 sm:$0xff] %v17_v16  ;;  %v26_v18 = vld [vmem:[%s205_s1 + $0x40] sm:$0xff]  ;;  %v27_v19 = vld [vmem:[%s205_s1 + $0x48] sm:$0xff] }
   0x6   :  { %v60_v20 = vpack.c.bf16 %v37_v15, %v36_v14  ;;  %v34_v21 = vld [vmem:[%s205_s1 + $0x80] sm:$0xff]  ;;  %v35_v22 = vld [vmem:[%s205_s1 + $0x88] sm:$0xff]  ;;  %v55_v23 = vpack.c.bf16 %v27_v19, %v26_v18  ;;  %v24_v24 = vld [vmem:[%s205_s1 + $0x30] sm:$0xff] }
   0x7   :  { %v25_v25 = vld [vmem:[%s205_s1 + $0x38] sm:$0xff]  ;;  %v59_v26 = vpack.c.bf16 %v35_v22, %v34_v21  ;;  %v22_v29 = vld [vmem:[%s205_s1 + $0x20] sm:$0xff]  ;;  %v23_v30 = vld [vmem:[%s205_s1 + $0x28] sm:$0xff] }
   0x8   :  { %71 = vmatpush.bf16.msra.mxu0 %v57_v7  ;;  %v54_v28 = vpack.c.bf16 %v25_v25, %v24_v24  ;;  %v53_v32 = vpack.c.bf16 %v23_v30, %v22_v29  ;;  %v20_v33 = vld [vmem:[%s205_s1 + $0x10] sm:$0xff]  ;;  %v21_v34 = vld [vmem:[%s205_s1 + $0x18] sm:$0xff]  ;;  %v18_v36 = vld [vmem:[%s205_s1] sm:$0xff] }
   0x9   :  { %88 = vmatpush.bf16.msra.mxu1 %v61_v13  ;;  %v52_v35 = vpack.c.bf16 %v21_v34, %v20_v33  ;;  %v19_v37 = vld [vmem:[%s205_s1 + $0x8] sm:$0xff] }
   0xa   :  { %v51_v38 = vpack.c.bf16 %v19_v37, %v18_v36  ;;  %v103_v44 = vld [vmem:[#allocation2] ss:$0 sm:$0xff] }
   0xc   :  { %72 = vmatpush.bf16.msra.mxu0 %v56_v17  ;;  %v46_v27 = vld.sshfl [vmem:[#allocation1 + $0x8] sm:$0xff pattern:$0x73625140]  ;;  %v45_v39 = vld.sshfl [vmem:[#allocation1] sm:$0xff pattern:$0x73625140] }
   0xd   :  { %89 = vmatpush.bf16.msra.mxu1 %v60_v20  ;;  %v50_v31 = vpack.c.bf16 %v46_v27, %v46_v27  ;;  %v49_v40 = vpack.c.bf16 %v45_v39, %v45_v39 }
  0x10   :  { %73 = vmatpush.bf16.msra.mxu0 %v55_v23 }
  0x11   :  { %90 = vmatpush.bf16.msra.mxu1 %v59_v26 }
  0x14   :  { %74 = vmatpush.bf16.msra.mxu0 %v54_v28  ;;  %102 = vmatmul.msk.bf16.vlgmr.msra.gmra.mxu1 %vm66_vm0, %v50_v31 }
  0x18   :  { %75 = vmatpush.bf16.msra.mxu0 %v53_v32 }
  0x1c   :  { %76 = vmatpush.bf16.msra.mxu0 %v52_v35 }
  0x20   :  { %77 = vmatpush.bf16.msra.mxu0 %v51_v38 }
  0x23   :  { %78 = vmatmul.bf16.vlgmr.msra.gmra.mxu0 %v49_v40 }
  0x91   :  { %v92_v42 = vpop.f32.mrf.mxu1 }
  0x99   :  { %v94_v43 = vpop.f32.mrf.mxu1 }
  0xa0   :  { %v79_v45 = vpop.f32.mrf.mxu0 }
  0xa1   :  { %v80_v46 = vadd.f32 %v103_v44, %v79_v45 }
  0xa3   :  { %v93_v47 = vadd.f32 %v92_v42, %v80_v46 }
  0xa5   :  { %97 = vst.msk [vmem:[%s208_s3] sm:$0x3] %vm96_vm1, %v93_v47 }
  0xa8   :  { %v81_v48 = vpop.f32.mrf.mxu0 }

</bundles_post_ra>
